<compile_context>
chip_gen: v7x
topology: tpu7x:2x2x1
jax: 0.10.0
libtpu: 0.0.40
codegen_flags: <defaults>
</compile_context>

<pallas_src>
import jax
import jax.numpy as jnp
from jax.experimental import pallas as pl
from jax.experimental.pallas import tpu as pltpu

# Module-consistent small hyper-parameters (feature_size divisible by nhead=10;
# dim_feedforward shrunk from 2048 for the small-shape test).
D_MODEL = 80            # feature_size
N_HEAD = 10             # nhead
HEAD_DIM = D_MODEL // N_HEAD      # 8
D_FF = 128              # dim_feedforward (small stand-in for 2048)
DP = 128                # lane-padded model width (80 -> 128)
LN_EPS = 1e-5


# --------------------------------------------------------------------------- #
# Kernel
# --------------------------------------------------------------------------- #
def _make_kernel(bb, seq_len):
    """Kernel processing `bb` batch elements (bb*seq_len batch-major rows)."""
    R = bb * seq_len
    scale = 1.0 / float(HEAD_DIM) ** 0.5
    inv_d = 1.0 / D_MODEL

    def layernorm(x, gamma, beta):
        # x is exactly zero in padded lanes (80..127); statistics over the real
        # D_MODEL features: mean = sum/80, var = E[x^2] - mu^2 (padded lanes
        # contribute 0 to both sums). gamma/beta are zero-padded so the padded
        # lanes stay zero after normalization.
        mu = jnp.sum(x, axis=-1, keepdims=True) * inv_d
        var = jnp.sum(x * x, axis=-1, keepdims=True) * inv_d - mu * mu
        var = jnp.maximum(var, 0.0)
        return (x - mu) * jax.lax.rsqrt(var + LN_EPS) * gamma + beta

    def kernel(src_ref, pe_ref, wemb_ref, bemb_ref,
               wqkv_ref, bqkv_ref, wo_ref, bo_ref,
               g1_ref, bt1_ref, w1_ref, b1_ref, w2_ref, b2_ref,
               g2_ref, bt2_ref, wd_ref, bd_ref, out_ref):
        # ---- embedding Linear(1, D) + positional encoding (f32, VPU) --------
        src = src_ref[0]                                            # (R, 1)
        x = src * wemb_ref[...] + bemb_ref[...] + pe_ref[...]       # (R, DP) f32
        xb = x.astype(jnp.bfloat16)

        # ---- single shared (S,S) causal triangle, per-batch broadcast -------
        r_idx = jax.lax.broadcasted_iota(jnp.int32, (bb, seq_len, seq_len), 1)
        c_idx = jax.lax.broadcasted_iota(jnp.int32, (bb, seq_len, seq_len), 2)
        causal = c_idx <= r_idx
        neg = jnp.float32(-1e30)

        # ---- multi-head attention; heads accumulate straight into Wo --------
        attn = jnp.zeros((R, DP), jnp.float32)
        for h in range(N_HEAD):
            # per-head weights live on the (free) leading axis of the stacks
            q = jnp.dot(xb, wqkv_ref[h],
                        preferred_element_type=jnp.float32) + bqkv_ref[h]
            k = jnp.dot(xb, wqkv_ref[N_HEAD + h],
                        preferred_element_type=jnp.float32) + bqkv_ref[N_HEAD + h]
            v = jnp.dot(xb, wqkv_ref[2 * N_HEAD + h],
                        preferred_element_type=jnp.float32) + bqkv_ref[2 * N_HEAD + h]
            # batch-major rows -> free major-dim reshape to (bb, S, hd)
            qb = q.reshape(bb, seq_len, HEAD_DIM).astype(jnp.bfloat16)
            kb = k.reshape(bb, seq_len, HEAD_DIM).astype(jnp.bfloat16)
            vb = v.reshape(bb, seq_len, HEAD_DIM).astype(jnp.bfloat16)
            s = jnp.einsum('bqd,bkd->bqk', qb, kb,
                           preferred_element_type=jnp.float32) * scale
            s = jnp.where(causal, s, neg)
            s = s - jnp.max(s, axis=-1, keepdims=True)
            p = jnp.exp(s)
            p = p * pl.reciprocal(jnp.sum(p, axis=-1, keepdims=True), approx=True)
            o = jnp.einsum('bqk,bkd->bqd', p.astype(jnp.bfloat16), vb,
                           preferred_element_type=jnp.float32)      # (bb,S,hd)
            attn = attn + jnp.dot(o.reshape(R, HEAD_DIM).astype(jnp.bfloat16),
                                  wo_ref[h], preferred_element_type=jnp.float32)
        attn = attn + bo_ref[...]

        # ---- post-norm residual 1 -------------------------------------------
        y = layernorm(x + attn, g1_ref[...], bt1_ref[...])

        # ---- feed-forward (ReLU) ---------------------------------------------
        hdn = jnp.maximum(
            jnp.dot(y.astype(jnp.bfloat16), w1_ref[...],
                    preferred_element_type=jnp.float32) + b1_ref[...], 0.0)
        ff = jnp.dot(hdn.astype(jnp.bfloat16), w2_ref[...],
                     preferred_element_type=jnp.float32) + b2_ref[...]
        z = layernorm(y + ff, g2_ref[...], bt2_ref[...])            # (R, DP)

        # ---- last time step of every batch (cheap reshape + slice) ----------
        z_last = z.reshape(bb, seq_len, DP)[:, seq_len - 1, :]      # (bb, DP)

        # ---- decoder Linear(D,1), emitted lane-major: (1, bb) ----------------
        dec = jax.lax.dot_general(
            wd_ref[...], z_last.astype(jnp.bfloat16),
            (((1,), (1,)), ((), ())),
            preferred_element_type=jnp.float32) + bd_ref[...]       # (1, bb)
        out_ref[...] = dec.reshape(1, 1, bb)

    return kernel


# --------------------------------------------------------------------------- #
# Helpers
# --------------------------------------------------------------------------- #
def _positional_encoding(seq_len, d_model):
    # Exact reproduction of the module's PositionalEncoding buffer:
    #   div_term = 1 / 10000 ** (2 * arange(d) / d)
    #   pe[:, 0::2] = sin(pos * div_term[0::2]); pe[:, 1::2] = cos(pos * div_term[1::2])
    pos = jnp.arange(seq_len, dtype=jnp.float32)[:, None]
    div = 1.0 / (10000.0 ** (2.0 * jnp.arange(d_model, dtype=jnp.float32) / d_model))
    pe = jnp.zeros((seq_len, d_model), jnp.float32)
    pe = pe.at[:, 0::2].set(jnp.sin(pos * div[0::2]))
    pe = pe.at[:, 1::2].set(jnp.cos(pos * div[1::2]))
    return pe


def _pad_axis(a, target, axis):
    pads = [(0, 0)] * a.ndim
    pads[axis] = (0, target - a.shape[axis])
    return jnp.pad(a, pads)


def _pick_batch_block(batch, seq, target_rows=1024):
    """Largest batch chunk giving >=2 grid steps (v7x 2-TC split) within a
    per-step row budget; falls back to per-batch blocks for very long seqs."""
    if batch <= 1:
        return 1
    for bb in range(batch, 0, -1):
        if batch % bb == 0 and batch // bb >= 2 and bb * seq <= target_rows:
            return bb
    return 1


def init_params(key):
    ks = jax.random.split(key, 15)
    n = lambda k, shape, s=0.05: (jax.random.normal(k, shape) * s).astype(jnp.float32)
    zeros = lambda shape: jnp.zeros(shape, jnp.float32)
    return dict(
        w_emb=n(ks[0], (D_MODEL, 1), 0.1), b_emb=n(ks[1], (D_MODEL,), 0.1),
        wq=n(ks[2], (D_MODEL, D_MODEL)), bq=n(ks[3], (D_MODEL,), 0.02),
        wk=n(ks[4], (D_MODEL, D_MODEL)), bk=n(ks[5], (D_MODEL,), 0.02),
        wv=n(ks[6], (D_MODEL, D_MODEL)), bv=n(ks[7], (D_MODEL,), 0.02),
        wo=n(ks[8], (D_MODEL, D_MODEL)), bo=n(ks[9], (D_MODEL,), 0.02),
        g1=jnp.ones((D_MODEL,), jnp.float32), bt1=zeros((D_MODEL,)),
        w1=n(ks[10], (D_FF, D_MODEL)), b1=n(ks[11], (D_FF,), 0.02),
        w2=n(ks[12], (D_MODEL, D_FF)), b2=n(ks[13], (D_MODEL,), 0.02),
        g2=jnp.ones((D_MODEL,), jnp.float32), bt2=zeros((D_MODEL,)),
        # init_weights(): decoder bias zero, weight uniform(-0.1, 0.1)
        wd=jax.random.uniform(ks[14], (1, D_MODEL), jnp.float32, -0.1, 0.1),
        bd=zeros((1, 1)),
    )


# --------------------------------------------------------------------------- #
# Wrapper (layout plumbing stays in XLA: transposes, head stacks, lane padding,
# bf16 casts of matmul weights)
# --------------------------------------------------------------------------- #
def transformer_forward(src, params):
    """src: (batch, seq, 1) like the PyTorch module input. Returns (batch, 1)."""
    B, S, _ = src.shape
    bb = _pick_batch_block(B, S)
    n_blocks = B // bb
    R = bb * S
    bf = jnp.bfloat16

    # batch-major stacked rows per block
    src_rows = src.astype(jnp.float32).reshape(n_blocks, R, 1)

    pe = _pad_axis(_positional_encoding(S, D_MODEL), DP, 1)         # (S, DP)
    pe_block = jnp.tile(pe, (bb, 1))                                 # (R, DP)

    row = lambda v: _pad_axis(v[None, :], DP, 1)                     # (1, DP) f32

    def head_stack(w):   # torch (out, in) -> (N_HEAD, DP, HEAD_DIM)
        ws = w.reshape(N_HEAD, HEAD_DIM, D_MODEL)                    # (H, hd, D)
        ws = jnp.transpose(ws, (0, 2, 1))                            # (H, D, hd)
        return _pad_axis(ws, DP, 1)                                  # (H, DP, hd)

    wqkv = jnp.concatenate([head_stack(params['wq']),
                            head_stack(params['wk']),
                            head_stack(params['wv'])], axis=0).astype(bf)   # (3H,DP,hd)
    bqkv = jnp.concatenate([params['bq'].reshape(N_HEAD, 1, HEAD_DIM),
                            params['bk'].reshape(N_HEAD, 1, HEAD_DIM),
                            params['bv'].reshape(N_HEAD, 1, HEAD_DIM)],
                           axis=0)                                   # (3H,1,hd) f32

    wo = _pad_axis(params['wo'].T.reshape(N_HEAD, HEAD_DIM, D_MODEL),
                   DP, 2).astype(bf)                                 # (H, hd, DP)
    bo = row(params['bo'])

    w_emb = _pad_axis(params['w_emb'].T, DP, 1)                      # (1, DP) f32
    b_emb = row(params['b_emb'])
    g1, bt1 = row(params['g1']), row(params['bt1'])
    g2, bt2 = row(params['g2']), row(params['bt2'])
    w1 = _pad_axis(params['w1'].T, DP, 0).astype(bf)                 # (DP, D_FF)
    b1 = params['b1'][None, :]                                       # (1, D_FF) f32
    w2 = _pad_axis(params['w2'].T, DP, 1).astype(bf)                 # (D_FF, DP)
    b2 = row(params['b2'])
    wd = _pad_axis(params['wd'], DP, 1).astype(bf)                   # (1, DP)
    bd = params['bd']                                                # (1, 1) f32

    args = (src_rows, pe_block, w_emb, b_emb, wqkv, bqkv, wo, bo,
            g1, bt1, w1, b1, w2, b2, g2, bt2, wd, bd)

    def rep(a):
        nd = a.ndim
        return pl.BlockSpec(a.shape, lambda i, _n=nd: (0,) * _n)

    in_specs = [pl.BlockSpec((1, R, 1), lambda i: (i, 0, 0))] + [rep(a) for a in args[1:]]

    out = pl.pallas_call(
        _make_kernel(bb, S),
        out_shape=jax.ShapeDtypeStruct((n_blocks, 1, bb), jnp.float32),
        grid=(n_blocks,),
        in_specs=in_specs,
        out_specs=pl.BlockSpec((1, 1, bb), lambda i: (i, 0, 0)),
        compiler_params=pltpu.CompilerParams(
            dimension_semantics=("parallel",)),
    )(*args)
    return out.reshape(B, 1)


# --------------------------------------------------------------------------- #
# Pure-JAX reference (f32) mirroring the PyTorch module, for validation
# --------------------------------------------------------------------------- #
def _reference(src, params):
    B, S, _ = src.shape
    pe = _positional_encoding(S, D_MODEL)
    x = src * params['w_emb'][:, 0][None, None, :] + params['b_emb'][None, None, :]
    x = x + pe[None]

    def ln(v, g, b):
        mu = v.mean(-1, keepdims=True)
        var = ((v - mu) ** 2).mean(-1, keepdims=True)
        return (v - mu) / jnp.sqrt(var + LN_EPS) * g + b

    def mha(xb):  # (S, D)
        q = xb @ params['wq'].T + params['bq']
        k = xb @ params['wk'].T + params['bk']
        v = xb @ params['wv'].T + params['bv']
        qh = q.reshape(S, N_HEAD, HEAD_DIM).transpose(1, 0, 2)
        kh = k.reshape(S, N_HEAD, HEAD_DIM).transpose(1, 0, 2)
        vh = v.reshape(S, N_HEAD, HEAD_DIM).transpose(1, 0, 2)
        s = jnp.einsum('hqd,hkd->hqk', qh, kh) / jnp.sqrt(jnp.float32(HEAD_DIM))
        mask = jnp.tril(jnp.ones((S, S), bool))
        s = jnp.where(mask[None], s, -jnp.inf)
        p = jax.nn.softmax(s, axis=-1)
        o = jnp.einsum('hqk,hkd->hqd', p, vh).transpose(1, 0, 2).reshape(S, D_MODEL)
        return o @ params['wo'].T + params['bo']

    outs = []
    for b in range(B):
        xb = x[b]
        y = ln(xb + mha(xb), params['g1'], params['bt1'])
        h = jnp.maximum(y @ params['w1'].T + params['b1'], 0.0)
        z = ln(y + (h @ params['w2'].T + params['b2']), params['g2'], params['bt2'])
        outs.append(z[-1] @ params['wd'].T + params['bd'][0])
    return jnp.stack(outs)                                           # (B, 1)


if __name__ == "__main__":
    key = jax.random.PRNGKey(0)
    pkey, xkey = jax.random.split(key)
    params = init_params(pkey)
    src = jax.random.normal(xkey, (2, 8, 1), jnp.float32)            # (batch, seq, 1)
    out = transformer_forward(src, params)
    jax.block_until_ready(out)
    assert out.shape == (2, 1) and out.dtype == jnp.float32
    assert bool(jnp.all(jnp.isfinite(out)))
    ref = _reference(src, params)
    assert bool(jnp.allclose(out, ref, atol=5e-2, rtol=5e-2)), (out, ref)
    print("KERNEL_OK")
</pallas_src>

<mosaic_0001>
module attributes {stable_mosaic.version = 11 : i64} {
  func.func @kernel(%arg0: i32, %arg1: memref<1x8x1xf32, #tpu.memory_space<vmem>>, %arg2: memref<8x128xf32, #tpu.memory_space<vmem>>, %arg3: memref<1x128xf32, #tpu.memory_space<vmem>>, %arg4: memref<1x128xf32, #tpu.memory_space<vmem>>, %arg5: memref<30x128x8xbf16, #tpu.memory_space<vmem>>, %arg6: memref<30x1x8xf32, #tpu.memory_space<vmem>>, %arg7: memref<10x8x128xbf16, #tpu.memory_space<vmem>>, %arg8: memref<1x128xf32, #tpu.memory_space<vmem>>, %arg9: memref<1x128xf32, #tpu.memory_space<vmem>>, %arg10: memref<1x128xf32, #tpu.memory_space<vmem>>, %arg11: memref<128x128xbf16, #tpu.memory_space<vmem>>, %arg12: memref<1x128xf32, #tpu.memory_space<vmem>>, %arg13: memref<128x128xbf16, #tpu.memory_space<vmem>>, %arg14: memref<1x128xf32, #tpu.memory_space<vmem>>, %arg15: memref<1x128xf32, #tpu.memory_space<vmem>>, %arg16: memref<1x128xf32, #tpu.memory_space<vmem>>, %arg17: memref<1x128xbf16, #tpu.memory_space<vmem>>, %arg18: memref<1x1xf32, #tpu.memory_space<vmem>>, %arg19: memref<1x1x1xf32, #tpu.memory_space<vmem>>) attributes {dimension_semantics = [#tpu.dimension_semantics<parallel>], iteration_bounds = array<i64: 2>, scalar_prefetch = 0 : i64, scratch_operands = 0 : i64, tpu.core_type = #tpu.core_type<tc>, window_params = [{transform_indices = @transform_0, window_bounds = array<i64: 1, 8, 1>}, {pipeline_mode = #tpu.pipeline_mode<synchronous>, transform_indices = @transform_1, window_bounds = array<i64: 8, 128>}, {pipeline_mode = #tpu.pipeline_mode<synchronous>, transform_indices = @transform_2, window_bounds = array<i64: 1, 128>}, {pipeline_mode = #tpu.pipeline_mode<synchronous>, transform_indices = @transform_3, window_bounds = array<i64: 1, 128>}, {pipeline_mode = #tpu.pipeline_mode<synchronous>, transform_indices = @transform_4, window_bounds = array<i64: 30, 128, 8>}, {pipeline_mode = #tpu.pipeline_mode<synchronous>, transform_indices = @transform_5, window_bounds = array<i64: 30, 1, 8>}, {pipeline_mode = #tpu.pipeline_mode<synchronous>, transform_indices = @transform_6, window_bounds = array<i64: 10, 8, 128>}, {pipeline_mode = #tpu.pipeline_mode<synchronous>, transform_indices = @transform_7, window_bounds = array<i64: 1, 128>}, {pipeline_mode = #tpu.pipeline_mode<synchronous>, transform_indices = @transform_8, window_bounds = array<i64: 1, 128>}, {pipeline_mode = #tpu.pipeline_mode<synchronous>, transform_indices = @transform_9, window_bounds = array<i64: 1, 128>}, {pipeline_mode = #tpu.pipeline_mode<synchronous>, transform_indices = @transform_10, window_bounds = array<i64: 128, 128>}, {pipeline_mode = #tpu.pipeline_mode<synchronous>, transform_indices = @transform_11, window_bounds = array<i64: 1, 128>}, {pipeline_mode = #tpu.pipeline_mode<synchronous>, transform_indices = @transform_12, window_bounds = array<i64: 128, 128>}, {pipeline_mode = #tpu.pipeline_mode<synchronous>, transform_indices = @transform_13, window_bounds = array<i64: 1, 128>}, {pipeline_mode = #tpu.pipeline_mode<synchronous>, transform_indices = @transform_14, window_bounds = array<i64: 1, 128>}, {pipeline_mode = #tpu.pipeline_mode<synchronous>, transform_indices = @transform_15, window_bounds = array<i64: 1, 128>}, {pipeline_mode = #tpu.pipeline_mode<synchronous>, transform_indices = @transform_16, window_bounds = array<i64: 1, 128>}, {pipeline_mode = #tpu.pipeline_mode<synchronous>, transform_indices = @transform_17, window_bounds = array<i64: 1, 1>}, {transform_indices = @transform_18, window_bounds = array<i64: 1, 1, 1>}]} {
    %c0 = arith.constant 0 : index
    %c0_0 = arith.constant 0 : index
    %c0_1 = arith.constant 0 : index
    %0 = vector.load %arg1[%c0, %c0_0, %c0_1] : memref<1x8x1xf32, #tpu.memory_space<vmem>>, vector<1x8x1xf32>
    %1 = vector.shape_cast %0 : vector<1x8x1xf32> to vector<8x1xf32>
    %c0_2 = arith.constant 0 : index
    %c0_3 = arith.constant 0 : index
    %2 = vector.load %arg3[%c0_2, %c0_3] : memref<1x128xf32, #tpu.memory_space<vmem>>, vector<1x128xf32>
    %3 = vector.broadcast %1 : vector<8x1xf32> to vector<8x128xf32>
    %4 = vector.broadcast %2 : vector<1x128xf32> to vector<8x128xf32>
    %5 = arith.mulf %3, %4 : vector<8x128xf32>
    %c0_4 = arith.constant 0 : index
    %c0_5 = arith.constant 0 : index
    %6 = vector.load %arg4[%c0_4, %c0_5] : memref<1x128xf32, #tpu.memory_space<vmem>>, vector<1x128xf32>
    %7 = vector.broadcast %6 : vector<1x128xf32> to vector<8x128xf32>
    %8 = arith.addf %5, %7 : vector<8x128xf32>
    %c0_6 = arith.constant 0 : index
    %c0_7 = arith.constant 0 : index
    %9 = vector.load %arg2[%c0_6, %c0_7] : memref<8x128xf32, #tpu.memory_space<vmem>>, vector<8x128xf32>
    %10 = arith.addf %8, %9 : vector<8x128xf32>
    %11 = arith.truncf %10 : vector<8x128xf32> to vector<8x128xbf16>
    %12 = tpu.iota {dimensions = array<i32: 1>} : vector<1x8x8xi32>
    %13 = tpu.iota {dimensions = array<i32: 2>} : vector<1x8x8xi32>
    %14 = arith.cmpi sle, %13, %12 : vector<1x8x8xi32>
    %cst = arith.constant 0.000000e+00 : f32
    %15 = vector.broadcast %cst : f32 to vector<8x128xf32>
    %c0_8 = arith.constant 0 : index
    %c0_9 = arith.constant 0 : index
    %c0_10 = arith.constant 0 : index
    %16 = vector.load %arg5[%c0_8, %c0_9, %c0_10] : memref<30x128x8xbf16, #tpu.memory_space<vmem>>, vector<1x128x8xbf16>
    %17 = vector.shape_cast %16 : vector<1x128x8xbf16> to vector<128x8xbf16>
    %cst_11 = arith.constant dense<0.000000e+00> : vector<8x8xf32>
    %18 = tpu.matmul %11, %17, %cst_11 {dimension_numbers = #tpu.dot_dimension_numbers<[1], [0], [0], [1], [0, 0, 1, 1], [], []>} : vector<8x128xbf16>, vector<128x8xbf16>, vector<8x8xf32> -> vector<8x8xf32>
    %c0_12 = arith.constant 0 : index
    %c0_13 = arith.constant 0 : index
    %c0_14 = arith.constant 0 : index
    %19 = vector.load %arg6[%c0_12, %c0_13, %c0_14] : memref<30x1x8xf32, #tpu.memory_space<vmem>>, vector<1x1x8xf32>
    %20 = vector.shape_cast %19 : vector<1x1x8xf32> to vector<1x8xf32>
    %21 = vector.broadcast %20 : vector<1x8xf32> to vector<8x8xf32>
    %22 = arith.addf %18, %21 : vector<8x8xf32>
    %c10 = arith.constant 10 : index
    %c0_15 = arith.constant 0 : index
    %c0_16 = arith.constant 0 : index
    %23 = vector.load %arg5[%c10, %c0_15, %c0_16] : memref<30x128x8xbf16, #tpu.memory_space<vmem>>, vector<1x128x8xbf16>
    %24 = vector.shape_cast %23 : vector<1x128x8xbf16> to vector<128x8xbf16>
    %cst_17 = arith.constant dense<0.000000e+00> : vector<8x8xf32>
    %25 = tpu.matmul %11, %24, %cst_17 {dimension_numbers = #tpu.dot_dimension_numbers<[1], [0], [0], [1], [0, 0, 1, 1], [], []>} : vector<8x128xbf16>, vector<128x8xbf16>, vector<8x8xf32> -> vector<8x8xf32>
    %c10_18 = arith.constant 10 : index
    %c0_19 = arith.constant 0 : index
    %c0_20 = arith.constant 0 : index
    %26 = vector.load %arg6[%c10_18, %c0_19, %c0_20] : memref<30x1x8xf32, #tpu.memory_space<vmem>>, vector<1x1x8xf32>
    %27 = vector.shape_cast %26 : vector<1x1x8xf32> to vector<1x8xf32>
    %28 = vector.broadcast %27 : vector<1x8xf32> to vector<8x8xf32>
    %29 = arith.addf %25, %28 : vector<8x8xf32>
    %c20 = arith.constant 20 : index
    %c0_21 = arith.constant 0 : index
    %c0_22 = arith.constant 0 : index
    %30 = vector.load %arg5[%c20, %c0_21, %c0_22] : memref<30x128x8xbf16, #tpu.memory_space<vmem>>, vector<1x128x8xbf16>
    %31 = vector.shape_cast %30 : vector<1x128x8xbf16> to vector<128x8xbf16>
    %cst_23 = arith.constant dense<0.000000e+00> : vector<8x8xf32>
    %32 = tpu.matmul %11, %31, %cst_23 {dimension_numbers = #tpu.dot_dimension_numbers<[1], [0], [0], [1], [0, 0, 1, 1], [], []>} : vector<8x128xbf16>, vector<128x8xbf16>, vector<8x8xf32> -> vector<8x8xf32>
    %c20_24 = arith.constant 20 : index
    %c0_25 = arith.constant 0 : index
    %c0_26 = arith.constant 0 : index
    %33 = vector.load %arg6[%c20_24, %c0_25, %c0_26] : memref<30x1x8xf32, #tpu.memory_space<vmem>>, vector<1x1x8xf32>
    %34 = vector.shape_cast %33 : vector<1x1x8xf32> to vector<1x8xf32>
    %35 = vector.broadcast %34 : vector<1x8xf32> to vector<8x8xf32>
    %36 = arith.addf %32, %35 : vector<8x8xf32>
    %37 = vector.shape_cast %22 : vector<8x8xf32> to vector<1x8x8xf32>
    %38 = arith.truncf %37 : vector<1x8x8xf32> to vector<1x8x8xbf16>
    %39 = vector.shape_cast %29 : vector<8x8xf32> to vector<1x8x8xf32>
    %40 = arith.truncf %39 : vector<1x8x8xf32> to vector<1x8x8xbf16>
    %41 = vector.shape_cast %36 : vector<8x8xf32> to vector<1x8x8xf32>
    %42 = arith.truncf %41 : vector<1x8x8xf32> to vector<1x8x8xbf16>
    "tpu.trace_start"() <{level = 10 : i32, message = "bqd,bkd->bqk"}> : () -> ()
    %cst_27 = arith.constant dense<0.000000e+00> : vector<1x8x8xf32>
    %43 = tpu.matmul %38, %40, %cst_27 {dimension_numbers = #tpu.dot_dimension_numbers<[2], [2], [1], [1], [0, 0, 0, 1, 1, 1], [0], [0]>} : vector<1x8x8xbf16>, vector<1x8x8xbf16>, vector<1x8x8xf32> -> vector<1x8x8xf32>
    "tpu.trace_stop"() : () -> ()
    %cst_28 = arith.constant 0.353553385 : f32
    %44 = vector.broadcast %cst_28 : f32 to vector<1x8x8xf32>
    %45 = arith.mulf %43, %44 : vector<1x8x8xf32>
    %cst_29 = arith.constant -1.000000e+30 : f32
    %46 = vector.broadcast %cst_29 : f32 to vector<1x8x8xf32>
    %47 = arith.select %14, %45, %46 : vector<1x8x8xi1>, vector<1x8x8xf32>
    %cst_30 = arith.constant dense<0xFF800000> : vector<1x8xf32>
    %48 = vector.multi_reduction <maximumf>, %47, %cst_30 [2] : vector<1x8x8xf32> to vector<1x8xf32>
    %49 = vector.shape_cast %48 : vector<1x8xf32> to vector<1x8x1xf32>
    %50 = vector.broadcast %49 : vector<1x8x1xf32> to vector<1x8x8xf32>
    %51 = arith.subf %47, %50 : vector<1x8x8xf32>
    %52 = math.exp %51 : vector<1x8x8xf32>
    %cst_31 = arith.constant dense<0.000000e+00> : vector<1x8xf32>
    %53 = vector.multi_reduction <add>, %52, %cst_31 [2] : vector<1x8x8xf32> to vector<1x8xf32>
    %54 = vector.shape_cast %53 : vector<1x8xf32> to vector<1x8x1xf32>
    %55 = tpu.reciprocal %54 {approx = true} : vector<1x8x1xf32> -> vector<1x8x1xf32>
    %56 = vector.broadcast %55 : vector<1x8x1xf32> to vector<1x8x8xf32>
    %57 = arith.mulf %52, %56 : vector<1x8x8xf32>
    %58 = arith.truncf %57 : vector<1x8x8xf32> to vector<1x8x8xbf16>
    "tpu.trace_start"() <{level = 10 : i32, message = "bqk,bkd->bqd"}> : () -> ()
    %cst_32 = arith.constant dense<0.000000e+00> : vector<1x8x8xf32>
    %59 = tpu.matmul %58, %42, %cst_32 {dimension_numbers = #tpu.dot_dimension_numbers<[2], [1], [1], [2], [0, 0, 0, 1, 1, 2], [0], [0]>} : vector<1x8x8xbf16>, vector<1x8x8xbf16>, vector<1x8x8xf32> -> vector<1x8x8xf32>
    "tpu.trace_stop"() : () -> ()
    %60 = vector.shape_cast %59 : vector<1x8x8xf32> to vector<8x8xf32>
    %61 = arith.truncf %60 : vector<8x8xf32> to vector<8x8xbf16>
    %c0_33 = arith.constant 0 : index
    %c0_34 = arith.constant 0 : index
    %c0_35 = arith.constant 0 : index
    %62 = vector.load %arg7[%c0_33, %c0_34, %c0_35] : memref<10x8x128xbf16, #tpu.memory_space<vmem>>, vector<1x8x128xbf16>
    %63 = vector.shape_cast %62 : vector<1x8x128xbf16> to vector<8x128xbf16>
    %cst_36 = arith.constant dense<0.000000e+00> : vector<8x128xf32>
    %64 = tpu.matmul %61, %63, %cst_36 {dimension_numbers = #tpu.dot_dimension_numbers<[1], [0], [0], [1], [0, 0, 1, 1], [], []>} : vector<8x8xbf16>, vector<8x128xbf16>, vector<8x128xf32> -> vector<8x128xf32>
    %65 = arith.addf %15, %64 : vector<8x128xf32>
    %c1 = arith.constant 1 : index
    %c0_37 = arith.constant 0 : index
    %c0_38 = arith.constant 0 : index
    %66 = vector.load %arg5[%c1, %c0_37, %c0_38] : memref<30x128x8xbf16, #tpu.memory_space<vmem>>, vector<1x128x8xbf16>
    %67 = vector.shape_cast %66 : vector<1x128x8xbf16> to vector<128x8xbf16>
    %cst_39 = arith.constant dense<0.000000e+00> : vector<8x8xf32>
    %68 = tpu.matmul %11, %67, %cst_39 {dimension_numbers = #tpu.dot_dimension_numbers<[1], [0], [0], [1], [0, 0, 1, 1], [], []>} : vector<8x128xbf16>, vector<128x8xbf16>, vector<8x8xf32> -> vector<8x8xf32>
    %c1_40 = arith.constant 1 : index
    %c0_41 = arith.constant 0 : index
    %c0_42 = arith.constant 0 : index
    %69 = vector.load %arg6[%c1_40, %c0_41, %c0_42] : memref<30x1x8xf32, #tpu.memory_space<vmem>>, vector<1x1x8xf32>
    %70 = vector.shape_cast %69 : vector<1x1x8xf32> to vector<1x8xf32>
    %71 = vector.broadcast %70 : vector<1x8xf32> to vector<8x8xf32>
    %72 = arith.addf %68, %71 : vector<8x8xf32>
    %c11 = arith.constant 11 : index
    %c0_43 = arith.constant 0 : index
    %c0_44 = arith.constant 0 : index
    %73 = vector.load %arg5[%c11, %c0_43, %c0_44] : memref<30x128x8xbf16, #tpu.memory_space<vmem>>, vector<1x128x8xbf16>
    %74 = vector.shape_cast %73 : vector<1x128x8xbf16> to vector<128x8xbf16>
    %cst_45 = arith.constant dense<0.000000e+00> : vector<8x8xf32>
    %75 = tpu.matmul %11, %74, %cst_45 {dimension_numbers = #tpu.dot_dimension_numbers<[1], [0], [0], [1], [0, 0, 1, 1], [], []>} : vector<8x128xbf16>, vector<128x8xbf16>, vector<8x8xf32> -> vector<8x8xf32>
    %c11_46 = arith.constant 11 : index
    %c0_47 = arith.constant 0 : index
    %c0_48 = arith.constant 0 : index
    %76 = vector.load %arg6[%c11_46, %c0_47, %c0_48] : memref<30x1x8xf32, #tpu.memory_space<vmem>>, vector<1x1x8xf32>
    %77 = vector.shape_cast %76 : vector<1x1x8xf32> to vector<1x8xf32>
    %78 = vector.broadcast %77 : vector<1x8xf32> to vector<8x8xf32>
    %79 = arith.addf %75, %78 : vector<8x8xf32>
    %c21 = arith.constant 21 : index
    %c0_49 = arith.constant 0 : index
    %c0_50 = arith.constant 0 : index
    %80 = vector.load %arg5[%c21, %c0_49, %c0_50] : memref<30x128x8xbf16, #tpu.memory_space<vmem>>, vector<1x128x8xbf16>
    %81 = vector.shape_cast %80 : vector<1x128x8xbf16> to vector<128x8xbf16>
    %cst_51 = arith.constant dense<0.000000e+00> : vector<8x8xf32>
    %82 = tpu.matmul %11, %81, %cst_51 {dimension_numbers = #tpu.dot_dimension_numbers<[1], [0], [0], [1], [0, 0, 1, 1], [], []>} : vector<8x128xbf16>, vector<128x8xbf16>, vector<8x8xf32> -> vector<8x8xf32>
    %c21_52 = arith.constant 21 : index
    %c0_53 = arith.constant 0 : index
    %c0_54 = arith.constant 0 : index
    %83 = vector.load %arg6[%c21_52, %c0_53, %c0_54] : memref<30x1x8xf32, #tpu.memory_space<vmem>>, vector<1x1x8xf32>
    %84 = vector.shape_cast %83 : vector<1x1x8xf32> to vector<1x8xf32>
    %85 = vector.broadcast %84 : vector<1x8xf32> to vector<8x8xf32>
    %86 = arith.addf %82, %85 : vector<8x8xf32>
    %87 = vector.shape_cast %72 : vector<8x8xf32> to vector<1x8x8xf32>
    %88 = arith.truncf %87 : vector<1x8x8xf32> to vector<1x8x8xbf16>
    %89 = vector.shape_cast %79 : vector<8x8xf32> to vector<1x8x8xf32>
    %90 = arith.truncf %89 : vector<1x8x8xf32> to vector<1x8x8xbf16>
    %91 = vector.shape_cast %86 : vector<8x8xf32> to vector<1x8x8xf32>
    %92 = arith.truncf %91 : vector<1x8x8xf32> to vector<1x8x8xbf16>
    "tpu.trace_start"() <{level = 10 : i32, message = "bqd,bkd->bqk"}> : () -> ()
    %cst_55 = arith.constant dense<0.000000e+00> : vector<1x8x8xf32>
    %93 = tpu.matmul %88, %90, %cst_55 {dimension_numbers = #tpu.dot_dimension_numbers<[2], [2], [1], [1], [0, 0, 0, 1, 1, 1], [0], [0]>} : vector<1x8x8xbf16>, vector<1x8x8xbf16>, vector<1x8x8xf32> -> vector<1x8x8xf32>
    "tpu.trace_stop"() : () -> ()
    %cst_56 = arith.constant 0.353553385 : f32
    %94 = vector.broadcast %cst_56 : f32 to vector<1x8x8xf32>
    %95 = arith.mulf %93, %94 : vector<1x8x8xf32>
    %cst_57 = arith.constant -1.000000e+30 : f32
    %96 = vector.broadcast %cst_57 : f32 to vector<1x8x8xf32>
    %97 = arith.select %14, %95, %96 : vector<1x8x8xi1>, vector<1x8x8xf32>
    %cst_58 = arith.constant dense<0xFF800000> : vector<1x8xf32>
    %98 = vector.multi_reduction <maximumf>, %97, %cst_58 [2] : vector<1x8x8xf32> to vector<1x8xf32>
    %99 = vector.shape_cast %98 : vector<1x8xf32> to vector<1x8x1xf32>
    %100 = vector.broadcast %99 : vector<1x8x1xf32> to vector<1x8x8xf32>
    %101 = arith.subf %97, %100 : vector<1x8x8xf32>
    %102 = math.exp %101 : vector<1x8x8xf32>
    %cst_59 = arith.constant dense<0.000000e+00> : vector<1x8xf32>
    %103 = vector.multi_reduction <add>, %102, %cst_59 [2] : vector<1x8x8xf32> to vector<1x8xf32>
    %104 = vector.shape_cast %103 : vector<1x8xf32> to vector<1x8x1xf32>
    %105 = tpu.reciprocal %104 {approx = true} : vector<1x8x1xf32> -> vector<1x8x1xf32>
    %106 = vector.broadcast %105 : vector<1x8x1xf32> to vector<1x8x8xf32>
    %107 = arith.mulf %102, %106 : vector<1x8x8xf32>
    %108 = arith.truncf %107 : vector<1x8x8xf32> to vector<1x8x8xbf16>
    "tpu.trace_start"() <{level = 10 : i32, message = "bqk,bkd->bqd"}> : () -> ()
    %cst_60 = arith.constant dense<0.000000e+00> : vector<1x8x8xf32>
    %109 = tpu.matmul %108, %92, %cst_60 {dimension_numbers = #tpu.dot_dimension_numbers<[2], [1], [1], [2], [0, 0, 0, 1, 1, 2], [0], [0]>} : vector<1x8x8xbf16>, vector<1x8x8xbf16>, vector<1x8x8xf32> -> vector<1x8x8xf32>
    "tpu.trace_stop"() : () -> ()
    %110 = vector.shape_cast %109 : vector<1x8x8xf32> to vector<8x8xf32>
    %111 = arith.truncf %110 : vector<8x8xf32> to vector<8x8xbf16>
    %c1_61 = arith.constant 1 : index
    %c0_62 = arith.constant 0 : index
    %c0_63 = arith.constant 0 : index
    %112 = vector.load %arg7[%c1_61, %c0_62, %c0_63] : memref<10x8x128xbf16, #tpu.memory_space<vmem>>, vector<1x8x128xbf16>
    %113 = vector.shape_cast %112 : vector<1x8x128xbf16> to vector<8x128xbf16>
    %cst_64 = arith.constant dense<0.000000e+00> : vector<8x128xf32>
    %114 = tpu.matmul %111, %113, %cst_64 {dimension_numbers = #tpu.dot_dimension_numbers<[1], [0], [0], [1], [0, 0, 1, 1], [], []>} : vector<8x8xbf16>, vector<8x128xbf16>, vector<8x128xf32> -> vector<8x128xf32>
    %115 = arith.addf %65, %114 : vector<8x128xf32>
    %c2 = arith.constant 2 : index
    %c0_65 = arith.constant 0 : index
    %c0_66 = arith.constant 0 : index
    %116 = vector.load %arg5[%c2, %c0_65, %c0_66] : memref<30x128x8xbf16, #tpu.memory_space<vmem>>, vector<1x128x8xbf16>
    %117 = vector.shape_cast %116 : vector<1x128x8xbf16> to vector<128x8xbf16>
    %cst_67 = arith.constant dense<0.000000e+00> : vector<8x8xf32>
    %118 = tpu.matmul %11, %117, %cst_67 {dimension_numbers = #tpu.dot_dimension_numbers<[1], [0], [0], [1], [0, 0, 1, 1], [], []>} : vector<8x128xbf16>, vector<128x8xbf16>, vector<8x8xf32> -> vector<8x8xf32>
    %c2_68 = arith.constant 2 : index
    %c0_69 = arith.constant 0 : index
    %c0_70 = arith.constant 0 : index
    %119 = vector.load %arg6[%c2_68, %c0_69, %c0_70] : memref<30x1x8xf32, #tpu.memory_space<vmem>>, vector<1x1x8xf32>
    %120 = vector.shape_cast %119 : vector<1x1x8xf32> to vector<1x8xf32>
    %121 = vector.broadcast %120 : vector<1x8xf32> to vector<8x8xf32>
    %122 = arith.addf %118, %121 : vector<8x8xf32>
    %c12 = arith.constant 12 : index
    %c0_71 = arith.constant 0 : index
    %c0_72 = arith.constant 0 : index
    %123 = vector.load %arg5[%c12, %c0_71, %c0_72] : memref<30x128x8xbf16, #tpu.memory_space<vmem>>, vector<1x128x8xbf16>
    %124 = vector.shape_cast %123 : vector<1x128x8xbf16> to vector<128x8xbf16>
    %cst_73 = arith.constant dense<0.000000e+00> : vector<8x8xf32>
    %125 = tpu.matmul %11, %124, %cst_73 {dimension_numbers = #tpu.dot_dimension_numbers<[1], [0], [0], [1], [0, 0, 1, 1], [], []>} : vector<8x128xbf16>, vector<128x8xbf16>, vector<8x8xf32> -> vector<8x8xf32>
    %c12_74 = arith.constant 12 : index
    %c0_75 = arith.constant 0 : index
    %c0_76 = arith.constant 0 : index
    %126 = vector.load %arg6[%c12_74, %c0_75, %c0_76] : memref<30x1x8xf32, #tpu.memory_space<vmem>>, vector<1x1x8xf32>
    %127 = vector.shape_cast %126 : vector<1x1x8xf32> to vector<1x8xf32>
    %128 = vector.broadcast %127 : vector<1x8xf32> to vector<8x8xf32>
    %129 = arith.addf %125, %128 : vector<8x8xf32>
    %c22 = arith.constant 22 : index
    %c0_77 = arith.constant 0 : index
    %c0_78 = arith.constant 0 : index
    %130 = vector.load %arg5[%c22, %c0_77, %c0_78] : memref<30x128x8xbf16, #tpu.memory_space<vmem>>, vector<1x128x8xbf16>
    %131 = vector.shape_cast %130 : vector<1x128x8xbf16> to vector<128x8xbf16>
    %cst_79 = arith.constant dense<0.000000e+00> : vector<8x8xf32>
    %132 = tpu.matmul %11, %131, %cst_79 {dimension_numbers = #tpu.dot_dimension_numbers<[1], [0], [0], [1], [0, 0, 1, 1], [], []>} : vector<8x128xbf16>, vector<128x8xbf16>, vector<8x8xf32> -> vector<8x8xf32>
    %c22_80 = arith.constant 22 : index
    %c0_81 = arith.constant 0 : index
    %c0_82 = arith.constant 0 : index
    %133 = vector.load %arg6[%c22_80, %c0_81, %c0_82] : memref<30x1x8xf32, #tpu.memory_space<vmem>>, vector<1x1x8xf32>
    %134 = vector.shape_cast %133 : vector<1x1x8xf32> to vector<1x8xf32>
    %135 = vector.broadcast %134 : vector<1x8xf32> to vector<8x8xf32>
    %136 = arith.addf %132, %135 : vector<8x8xf32>
    %137 = vector.shape_cast %122 : vector<8x8xf32> to vector<1x8x8xf32>
    %138 = arith.truncf %137 : vector<1x8x8xf32> to vector<1x8x8xbf16>
    %139 = vector.shape_cast %129 : vector<8x8xf32> to vector<1x8x8xf32>
    %140 = arith.truncf %139 : vector<1x8x8xf32> to vector<1x8x8xbf16>
    %141 = vector.shape_cast %136 : vector<8x8xf32> to vector<1x8x8xf32>
    %142 = arith.truncf %141 : vector<1x8x8xf32> to vector<1x8x8xbf16>
    "tpu.trace_start"() <{level = 10 : i32, message = "bqd,bkd->bqk"}> : () -> ()
    %cst_83 = arith.constant dense<0.000000e+00> : vector<1x8x8xf32>
    %143 = tpu.matmul %138, %140, %cst_83 {dimension_numbers = #tpu.dot_dimension_numbers<[2], [2], [1], [1], [0, 0, 0, 1, 1, 1], [0], [0]>} : vector<1x8x8xbf16>, vector<1x8x8xbf16>, vector<1x8x8xf32> -> vector<1x8x8xf32>
    "tpu.trace_stop"() : () -> ()
    %cst_84 = arith.constant 0.353553385 : f32
    %144 = vector.broadcast %cst_84 : f32 to vector<1x8x8xf32>
    %145 = arith.mulf %143, %144 : vector<1x8x8xf32>
    %cst_85 = arith.constant -1.000000e+30 : f32
    %146 = vector.broadcast %cst_85 : f32 to vector<1x8x8xf32>
    %147 = arith.select %14, %145, %146 : vector<1x8x8xi1>, vector<1x8x8xf32>
    %cst_86 = arith.constant dense<0xFF800000> : vector<1x8xf32>
    %148 = vector.multi_reduction <maximumf>, %147, %cst_86 [2] : vector<1x8x8xf32> to vector<1x8xf32>
    %149 = vector.shape_cast %148 : vector<1x8xf32> to vector<1x8x1xf32>
    %150 = vector.broadcast %149 : vector<1x8x1xf32> to vector<1x8x8xf32>
    %151 = arith.subf %147, %150 : vector<1x8x8xf32>
    %152 = math.exp %151 : vector<1x8x8xf32>
    %cst_87 = arith.constant dense<0.000000e+00> : vector<1x8xf32>
    %153 = vector.multi_reduction <add>, %152, %cst_87 [2] : vector<1x8x8xf32> to vector<1x8xf32>
    %154 = vector.shape_cast %153 : vector<1x8xf32> to vector<1x8x1xf32>
    %155 = tpu.reciprocal %154 {approx = true} : vector<1x8x1xf32> -> vector<1x8x1xf32>
    %156 = vector.broadcast %155 : vector<1x8x1xf32> to vector<1x8x8xf32>
    %157 = arith.mulf %152, %156 : vector<1x8x8xf32>
    %158 = arith.truncf %157 : vector<1x8x8xf32> to vector<1x8x8xbf16>
    "tpu.trace_start"() <{level = 10 : i32, message = "bqk,bkd->bqd"}> : () -> ()
    %cst_88 = arith.constant dense<0.000000e+00> : vector<1x8x8xf32>
    %159 = tpu.matmul %158, %142, %cst_88 {dimension_numbers = #tpu.dot_dimension_numbers<[2], [1], [1], [2], [0, 0, 0, 1, 1, 2], [0], [0]>} : vector<1x8x8xbf16>, vector<1x8x8xbf16>, vector<1x8x8xf32> -> vector<1x8x8xf32>
    "tpu.trace_stop"() : () -> ()
    %160 = vector.shape_cast %159 : vector<1x8x8xf32> to vector<8x8xf32>
    %161 = arith.truncf %160 : vector<8x8xf32> to vector<8x8xbf16>
    %c2_89 = arith.constant 2 : index
    %c0_90 = arith.constant 0 : index
    %c0_91 = arith.constant 0 : index
    %162 = vector.load %arg7[%c2_89, %c0_90, %c0_91] : memref<10x8x128xbf16, #tpu.memory_space<vmem>>, vector<1x8x128xbf16>
    %163 = vector.shape_cast %162 : vector<1x8x128xbf16> to vector<8x128xbf16>
    %cst_92 = arith.constant dense<0.000000e+00> : vector<8x128xf32>
    %164 = tpu.matmul %161, %163, %cst_92 {dimension_numbers = #tpu.dot_dimension_numbers<[1], [0], [0], [1], [0, 0, 1, 1], [], []>} : vector<8x8xbf16>, vector<8x128xbf16>, vector<8x128xf32> -> vector<8x128xf32>
    %165 = arith.addf %115, %164 : vector<8x128xf32>
    %c3 = arith.constant 3 : index
    %c0_93 = arith.constant 0 : index
    %c0_94 = arith.constant 0 : index
    %166 = vector.load %arg5[%c3, %c0_93, %c0_94] : memref<30x128x8xbf16, #tpu.memory_space<vmem>>, vector<1x128x8xbf16>
    %167 = vector.shape_cast %166 : vector<1x128x8xbf16> to vector<128x8xbf16>
    %cst_95 = arith.constant dense<0.000000e+00> : vector<8x8xf32>
    %168 = tpu.matmul %11, %167, %cst_95 {dimension_numbers = #tpu.dot_dimension_numbers<[1], [0], [0], [1], [0, 0, 1, 1], [], []>} : vector<8x128xbf16>, vector<128x8xbf16>, vector<8x8xf32> -> vector<8x8xf32>
    %c3_96 = arith.constant 3 : index
    %c0_97 = arith.constant 0 : index
    %c0_98 = arith.constant 0 : index
    %169 = vector.load %arg6[%c3_96, %c0_97, %c0_98] : memref<30x1x8xf32, #tpu.memory_space<vmem>>, vector<1x1x8xf32>
    %170 = vector.shape_cast %169 : vector<1x1x8xf32> to vector<1x8xf32>
    %171 = vector.broadcast %170 : vector<1x8xf32> to vector<8x8xf32>
    %172 = arith.addf %168, %171 : vector<8x8xf32>
    %c13 = arith.constant 13 : index
    %c0_99 = arith.constant 0 : index
    %c0_100 = arith.constant 0 : index
    %173 = vector.load %arg5[%c13, %c0_99, %c0_100] : memref<30x128x8xbf16, #tpu.memory_space<vmem>>, vector<1x128x8xbf16>
    %174 = vector.shape_cast %173 : vector<1x128x8xbf16> to vector<128x8xbf16>
    %cst_101 = arith.constant dense<0.000000e+00> : vector<8x8xf32>
    %175 = tpu.matmul %11, %174, %cst_101 {dimension_numbers = #tpu.dot_dimension_numbers<[1], [0], [0], [1], [0, 0, 1, 1], [], []>} : vector<8x128xbf16>, vector<128x8xbf16>, vector<8x8xf32> -> vector<8x8xf32>
    %c13_102 = arith.constant 13 : index
    %c0_103 = arith.constant 0 : index
    %c0_104 = arith.constant 0 : index
    %176 = vector.load %arg6[%c13_102, %c0_103, %c0_104] : memref<30x1x8xf32, #tpu.memory_space<vmem>>, vector<1x1x8xf32>
    %177 = vector.shape_cast %176 : vector<1x1x8xf32> to vector<1x8xf32>
    %178 = vector.broadcast %177 : vector<1x8xf32> to vector<8x8xf32>
    %179 = arith.addf %175, %178 : vector<8x8xf32>
    %c23 = arith.constant 23 : index
    %c0_105 = arith.constant 0 : index
    %c0_106 = arith.constant 0 : index
    %180 = vector.load %arg5[%c23, %c0_105, %c0_106] : memref<30x128x8xbf16, #tpu.memory_space<vmem>>, vector<1x128x8xbf16>
    %181 = vector.shape_cast %180 : vector<1x128x8xbf16> to vector<128x8xbf16>
    %cst_107 = arith.constant dense<0.000000e+00> : vector<8x8xf32>
    %182 = tpu.matmul %11, %181, %cst_107 {dimension_numbers = #tpu.dot_dimension_numbers<[1], [0], [0], [1], [0, 0, 1, 1], [], []>} : vector<8x128xbf16>, vector<128x8xbf16>, vector<8x8xf32> -> vector<8x8xf32>
    %c23_108 = arith.constant 23 : index
    %c0_109 = arith.constant 0 : index
    %c0_110 = arith.constant 0 : index
    %183 = vector.load %arg6[%c23_108, %c0_109, %c0_110] : memref<30x1x8xf32, #tpu.memory_space<vmem>>, vector<1x1x8xf32>
    %184 = vector.shape_cast %183 : vector<1x1x8xf32> to vector<1x8xf32>
    %185 = vector.broadcast %184 : vector<1x8xf32> to vector<8x8xf32>
    %186 = arith.addf %182, %185 : vector<8x8xf32>
    %187 = vector.shape_cast %172 : vector<8x8xf32> to vector<1x8x8xf32>
    %188 = arith.truncf %187 : vector<1x8x8xf32> to vector<1x8x8xbf16>
    %189 = vector.shape_cast %179 : vector<8x8xf32> to vector<1x8x8xf32>
    %190 = arith.truncf %189 : vector<1x8x8xf32> to vector<1x8x8xbf16>
    %191 = vector.shape_cast %186 : vector<8x8xf32> to vector<1x8x8xf32>
    %192 = arith.truncf %191 : vector<1x8x8xf32> to vector<1x8x8xbf16>
    "tpu.trace_start"() <{level = 10 : i32, message = "bqd,bkd->bqk"}> : () -> ()
    %cst_111 = arith.constant dense<0.000000e+00> : vector<1x8x8xf32>
    %193 = tpu.matmul %188, %190, %cst_111 {dimension_numbers = #tpu.dot_dimension_numbers<[2], [2], [1], [1], [0, 0, 0, 1, 1, 1], [0], [0]>} : vector<1x8x8xbf16>, vector<1x8x8xbf16>, vector<1x8x8xf32> -> vector<1x8x8xf32>
    "tpu.trace_stop"() : () -> ()
    %cst_112 = arith.constant 0.353553385 : f32
    %194 = vector.broadcast %cst_112 : f32 to vector<1x8x8xf32>
    %195 = arith.mulf %193, %194 : vector<1x8x8xf32>
    %cst_113 = arith.constant -1.000000e+30 : f32
    %196 = vector.broadcast %cst_113 : f32 to vector<1x8x8xf32>
    %197 = arith.select %14, %195, %196 : vector<1x8x8xi1>, vector<1x8x8xf32>
    %cst_114 = arith.constant dense<0xFF800000> : vector<1x8xf32>
    %198 = vector.multi_reduction <maximumf>, %197, %cst_114 [2] : vector<1x8x8xf32> to vector<1x8xf32>
    %199 = vector.shape_cast %198 : vector<1x8xf32> to vector<1x8x1xf32>
    %200 = vector.broadcast %199 : vector<1x8x1xf32> to vector<1x8x8xf32>
    %201 = arith.subf %197, %200 : vector<1x8x8xf32>
    %202 = math.exp %201 : vector<1x8x8xf32>
    %cst_115 = arith.constant dense<0.000000e+00> : vector<1x8xf32>
    %203 = vector.multi_reduction <add>, %202, %cst_115 [2] : vector<1x8x8xf32> to vector<1x8xf32>
    %204 = vector.shape_cast %203 : vector<1x8xf32> to vector<1x8x1xf32>
    %205 = tpu.reciprocal %204 {approx = true} : vector<1x8x1xf32> -> vector<1x8x1xf32>
    %206 = vector.broadcast %205 : vector<1x8x1xf32> to vector<1x8x8xf32>
    %207 = arith.mulf %202, %206 : vector<1x8x8xf32>
    %208 = arith.truncf %207 : vector<1x8x8xf32> to vector<1x8x8xbf16>
    "tpu.trace_start"() <{level = 10 : i32, message = "bqk,bkd->bqd"}> : () -> ()
    %cst_116 = arith.constant dense<0.000000e+00> : vector<1x8x8xf32>
    %209 = tpu.matmul %208, %192, %cst_116 {dimension_numbers = #tpu.dot_dimension_numbers<[2], [1], [1], [2], [0, 0, 0, 1, 1, 2], [0], [0]>} : vector<1x8x8xbf16>, vector<1x8x8xbf16>, vector<1x8x8xf32> -> vector<1x8x8xf32>
    "tpu.trace_stop"() : () -> ()
    %210 = vector.shape_cast %209 : vector<1x8x8xf32> to vector<8x8xf32>
    %211 = arith.truncf %210 : vector<8x8xf32> to vector<8x8xbf16>
    %c3_117 = arith.constant 3 : index
    %c0_118 = arith.constant 0 : index
    %c0_119 = arith.constant 0 : index
    %212 = vector.load %arg7[%c3_117, %c0_118, %c0_119] : memref<10x8x128xbf16, #tpu.memory_space<vmem>>, vector<1x8x128xbf16>
    %213 = vector.shape_cast %212 : vector<1x8x128xbf16> to vector<8x128xbf16>
    %cst_120 = arith.constant dense<0.000000e+00> : vector<8x128xf32>
    %214 = tpu.matmul %211, %213, %cst_120 {dimension_numbers = #tpu.dot_dimension_numbers<[1], [0], [0], [1], [0, 0, 1, 1], [], []>} : vector<8x8xbf16>, vector<8x128xbf16>, vector<8x128xf32> -> vector<8x128xf32>
    %215 = arith.addf %165, %214 : vector<8x128xf32>
    %c4 = arith.constant 4 : index
    %c0_121 = arith.constant 0 : index
    %c0_122 = arith.constant 0 : index
    %216 = vector.load %arg5[%c4, %c0_121, %c0_122] : memref<30x128x8xbf16, #tpu.memory_space<vmem>>, vector<1x128x8xbf16>
    %217 = vector.shape_cast %216 : vector<1x128x8xbf16> to vector<128x8xbf16>
    %cst_123 = arith.constant dense<0.000000e+00> : vector<8x8xf32>
    %218 = tpu.matmul %11, %217, %cst_123 {dimension_numbers = #tpu.dot_dimension_numbers<[1], [0], [0], [1], [0, 0, 1, 1], [], []>} : vector<8x128xbf16>, vector<128x8xbf16>, vector<8x8xf32> -> vector<8x8xf32>
    %c4_124 = arith.constant 4 : index
    %c0_125 = arith.constant 0 : index
    %c0_126 = arith.constant 0 : index
    %219 = vector.load %arg6[%c4_124, %c0_125, %c0_126] : memref<30x1x8xf32, #tpu.memory_space<vmem>>, vector<1x1x8xf32>
    %220 = vector.shape_cast %219 : vector<1x1x8xf32> to vector<1x8xf32>
    %221 = vector.broadcast %220 : vector<1x8xf32> to vector<8x8xf32>
    %222 = arith.addf %218, %221 : vector<8x8xf32>
    %c14 = arith.constant 14 : index
    %c0_127 = arith.constant 0 : index
    %c0_128 = arith.constant 0 : index
    %223 = vector.load %arg5[%c14, %c0_127, %c0_128] : memref<30x128x8xbf16, #tpu.memory_space<vmem>>, vector<1x128x8xbf16>
    %224 = vector.shape_cast %223 : vector<1x128x8xbf16> to vector<128x8xbf16>
    %cst_129 = arith.constant dense<0.000000e+00> : vector<8x8xf32>
    %225 = tpu.matmul %11, %224, %cst_129 {dimension_numbers = #tpu.dot_dimension_numbers<[1], [0], [0], [1], [0, 0, 1, 1], [], []>} : vector<8x128xbf16>, vector<128x8xbf16>, vector<8x8xf32> -> vector<8x8xf32>
    %c14_130 = arith.constant 14 : index
    %c0_131 = arith.constant 0 : index
    %c0_132 = arith.constant 0 : index
    %226 = vector.load %arg6[%c14_130, %c0_131, %c0_132] : memref<30x1x8xf32, #tpu.memory_space<vmem>>, vector<1x1x8xf32>
    %227 = vector.shape_cast %226 : vector<1x1x8xf32> to vector<1x8xf32>
    %228 = vector.broadcast %227 : vector<1x8xf32> to vector<8x8xf32>
    %229 = arith.addf %225, %228 : vector<8x8xf32>
    %c24 = arith.constant 24 : index
    %c0_133 = arith.constant 0 : index
    %c0_134 = arith.constant 0 : index
    %230 = vector.load %arg5[%c24, %c0_133, %c0_134] : memref<30x128x8xbf16, #tpu.memory_space<vmem>>, vector<1x128x8xbf16>
    %231 = vector.shape_cast %230 : vector<1x128x8xbf16> to vector<128x8xbf16>
    %cst_135 = arith.constant dense<0.000000e+00> : vector<8x8xf32>
    %232 = tpu.matmul %11, %231, %cst_135 {dimension_numbers = #tpu.dot_dimension_numbers<[1], [0], [0], [1], [0, 0, 1, 1], [], []>} : vector<8x128xbf16>, vector<128x8xbf16>, vector<8x8xf32> -> vector<8x8xf32>
    %c24_136 = arith.constant 24 : index
    %c0_137 = arith.constant 0 : index
    %c0_138 = arith.constant 0 : index
    %233 = vector.load %arg6[%c24_136, %c0_137, %c0_138] : memref<30x1x8xf32, #tpu.memory_space<vmem>>, vector<1x1x8xf32>
    %234 = vector.shape_cast %233 : vector<1x1x8xf32> to vector<1x8xf32>
    %235 = vector.broadcast %234 : vector<1x8xf32> to vector<8x8xf32>
    %236 = arith.addf %232, %235 : vector<8x8xf32>
    %237 = vector.shape_cast %222 : vector<8x8xf32> to vector<1x8x8xf32>
    %238 = arith.truncf %237 : vector<1x8x8xf32> to vector<1x8x8xbf16>
    %239 = vector.shape_cast %229 : vector<8x8xf32> to vector<1x8x8xf32>
    %240 = arith.truncf %239 : vector<1x8x8xf32> to vector<1x8x8xbf16>
    %241 = vector.shape_cast %236 : vector<8x8xf32> to vector<1x8x8xf32>
    %242 = arith.truncf %241 : vector<1x8x8xf32> to vector<1x8x8xbf16>
    "tpu.trace_start"() <{level = 10 : i32, message = "bqd,bkd->bqk"}> : () -> ()
    %cst_139 = arith.constant dense<0.000000e+00> : vector<1x8x8xf32>
    %243 = tpu.matmul %238, %240, %cst_139 {dimension_numbers = #tpu.dot_dimension_numbers<[2], [2], [1], [1], [0, 0, 0, 1, 1, 1], [0], [0]>} : vector<1x8x8xbf16>, vector<1x8x8xbf16>, vector<1x8x8xf32> -> vector<1x8x8xf32>
    "tpu.trace_stop"() : () -> ()
    %cst_140 = arith.constant 0.353553385 : f32
    %244 = vector.broadcast %cst_140 : f32 to vector<1x8x8xf32>
    %245 = arith.mulf %243, %244 : vector<1x8x8xf32>
    %cst_141 = arith.constant -1.000000e+30 : f32
    %246 = vector.broadcast %cst_141 : f32 to vector<1x8x8xf32>
    %247 = arith.select %14, %245, %246 : vector<1x8x8xi1>, vector<1x8x8xf32>
    %cst_142 = arith.constant dense<0xFF800000> : vector<1x8xf32>
    %248 = vector.multi_reduction <maximumf>, %247, %cst_142 [2] : vector<1x8x8xf32> to vector<1x8xf32>
    %249 = vector.shape_cast %248 : vector<1x8xf32> to vector<1x8x1xf32>
    %250 = vector.broadcast %249 : vector<1x8x1xf32> to vector<1x8x8xf32>
    %251 = arith.subf %247, %250 : vector<1x8x8xf32>
    %252 = math.exp %251 : vector<1x8x8xf32>
    %cst_143 = arith.constant dense<0.000000e+00> : vector<1x8xf32>
    %253 = vector.multi_reduction <add>, %252, %cst_143 [2] : vector<1x8x8xf32> to vector<1x8xf32>
    %254 = vector.shape_cast %253 : vector<1x8xf32> to vector<1x8x1xf32>
    %255 = tpu.reciprocal %254 {approx = true} : vector<1x8x1xf32> -> vector<1x8x1xf32>
    %256 = vector.broadcast %255 : vector<1x8x1xf32> to vector<1x8x8xf32>
    %257 = arith.mulf %252, %256 : vector<1x8x8xf32>
    %258 = arith.truncf %257 : vector<1x8x8xf32> to vector<1x8x8xbf16>
    "tpu.trace_start"() <{level = 10 : i32, message = "bqk,bkd->bqd"}> : () -> ()
    %cst_144 = arith.constant dense<0.000000e+00> : vector<1x8x8xf32>
    %259 = tpu.matmul %258, %242, %cst_144 {dimension_numbers = #tpu.dot_dimension_numbers<[2], [1], [1], [2], [0, 0, 0, 1, 1, 2], [0], [0]>} : vector<1x8x8xbf16>, vector<1x8x8xbf16>, vector<1x8x8xf32> -> vector<1x8x8xf32>
    "tpu.trace_stop"() : () -> ()
    %260 = vector.shape_cast %259 : vector<1x8x8xf32> to vector<8x8xf32>
    %261 = arith.truncf %260 : vector<8x8xf32> to vector<8x8xbf16>
    %c4_145 = arith.constant 4 : index
    %c0_146 = arith.constant 0 : index
    %c0_147 = arith.constant 0 : index
    %262 = vector.load %arg7[%c4_145, %c0_146, %c0_147] : memref<10x8x128xbf16, #tpu.memory_space<vmem>>, vector<1x8x128xbf16>
    %263 = vector.shape_cast %262 : vector<1x8x128xbf16> to vector<8x128xbf16>
    %cst_148 = arith.constant dense<0.000000e+00> : vector<8x128xf32>
    %264 = tpu.matmul %261, %263, %cst_148 {dimension_numbers = #tpu.dot_dimension_numbers<[1], [0], [0], [1], [0, 0, 1, 1], [], []>} : vector<8x8xbf16>, vector<8x128xbf16>, vector<8x128xf32> -> vector<8x128xf32>
    %265 = arith.addf %215, %264 : vector<8x128xf32>
    %c5 = arith.constant 5 : index
    %c0_149 = arith.constant 0 : index
    %c0_150 = arith.constant 0 : index
    %266 = vector.load %arg5[%c5, %c0_149, %c0_150] : memref<30x128x8xbf16, #tpu.memory_space<vmem>>, vector<1x128x8xbf16>
    %267 = vector.shape_cast %266 : vector<1x128x8xbf16> to vector<128x8xbf16>
    %cst_151 = arith.constant dense<0.000000e+00> : vector<8x8xf32>
    %268 = tpu.matmul %11, %267, %cst_151 {dimension_numbers = #tpu.dot_dimension_numbers<[1], [0], [0], [1], [0, 0, 1, 1], [], []>} : vector<8x128xbf16>, vector<128x8xbf16>, vector<8x8xf32> -> vector<8x8xf32>
    %c5_152 = arith.constant 5 : index
    %c0_153 = arith.constant 0 : index
    %c0_154 = arith.constant 0 : index
    %269 = vector.load %arg6[%c5_152, %c0_153, %c0_154] : memref<30x1x8xf32, #tpu.memory_space<vmem>>, vector<1x1x8xf32>
    %270 = vector.shape_cast %269 : vector<1x1x8xf32> to vector<1x8xf32>
    %271 = vector.broadcast %270 : vector<1x8xf32> to vector<8x8xf32>
    %272 = arith.addf %268, %271 : vector<8x8xf32>
    %c15 = arith.constant 15 : index
    %c0_155 = arith.constant 0 : index
    %c0_156 = arith.constant 0 : index
    %273 = vector.load %arg5[%c15, %c0_155, %c0_156] : memref<30x128x8xbf16, #tpu.memory_space<vmem>>, vector<1x128x8xbf16>
    %274 = vector.shape_cast %273 : vector<1x128x8xbf16> to vector<128x8xbf16>
    %cst_157 = arith.constant dense<0.000000e+00> : vector<8x8xf32>
    %275 = tpu.matmul %11, %274, %cst_157 {dimension_numbers = #tpu.dot_dimension_numbers<[1], [0], [0], [1], [0, 0, 1, 1], [], []>} : vector<8x128xbf16>, vector<128x8xbf16>, vector<8x8xf32> -> vector<8x8xf32>
    %c15_158 = arith.constant 15 : index
    %c0_159 = arith.constant 0 : index
    %c0_160 = arith.constant 0 : index
    %276 = vector.load %arg6[%c15_158, %c0_159, %c0_160] : memref<30x1x8xf32, #tpu.memory_space<vmem>>, vector<1x1x8xf32>
    %277 = vector.shape_cast %276 : vector<1x1x8xf32> to vector<1x8xf32>
    %278 = vector.broadcast %277 : vector<1x8xf32> to vector<8x8xf32>
    %279 = arith.addf %275, %278 : vector<8x8xf32>
    %c25 = arith.constant 25 : index
    %c0_161 = arith.constant 0 : index
    %c0_162 = arith.constant 0 : index
    %280 = vector.load %arg5[%c25, %c0_161, %c0_162] : memref<30x128x8xbf16, #tpu.memory_space<vmem>>, vector<1x128x8xbf16>
    %281 = vector.shape_cast %280 : vector<1x128x8xbf16> to vector<128x8xbf16>
    %cst_163 = arith.constant dense<0.000000e+00> : vector<8x8xf32>
    %282 = tpu.matmul %11, %281, %cst_163 {dimension_numbers = #tpu.dot_dimension_numbers<[1], [0], [0], [1], [0, 0, 1, 1], [], []>} : vector<8x128xbf16>, vector<128x8xbf16>, vector<8x8xf32> -> vector<8x8xf32>
    %c25_164 = arith.constant 25 : index
    %c0_165 = arith.constant 0 : index
    %c0_166 = arith.constant 0 : index
    %283 = vector.load %arg6[%c25_164, %c0_165, %c0_166] : memref<30x1x8xf32, #tpu.memory_space<vmem>>, vector<1x1x8xf32>
    %284 = vector.shape_cast %283 : vector<1x1x8xf32> to vector<1x8xf32>
    %285 = vector.broadcast %284 : vector<1x8xf32> to vector<8x8xf32>
    %286 = arith.addf %282, %285 : vector<8x8xf32>
    %287 = vector.shape_cast %272 : vector<8x8xf32> to vector<1x8x8xf32>
    %288 = arith.truncf %287 : vector<1x8x8xf32> to vector<1x8x8xbf16>
    %289 = vector.shape_cast %279 : vector<8x8xf32> to vector<1x8x8xf32>
    %290 = arith.truncf %289 : vector<1x8x8xf32> to vector<1x8x8xbf16>
    %291 = vector.shape_cast %286 : vector<8x8xf32> to vector<1x8x8xf32>
    %292 = arith.truncf %291 : vector<1x8x8xf32> to vector<1x8x8xbf16>
    "tpu.trace_start"() <{level = 10 : i32, message = "bqd,bkd->bqk"}> : () -> ()
    %cst_167 = arith.constant dense<0.000000e+00> : vector<1x8x8xf32>
    %293 = tpu.matmul %288, %290, %cst_167 {dimension_numbers = #tpu.dot_dimension_numbers<[2], [2], [1], [1], [0, 0, 0, 1, 1, 1], [0], [0]>} : vector<1x8x8xbf16>, vector<1x8x8xbf16>, vector<1x8x8xf32> -> vector<1x8x8xf32>
    "tpu.trace_stop"() : () -> ()
    %cst_168 = arith.constant 0.353553385 : f32
    %294 = vector.broadcast %cst_168 : f32 to vector<1x8x8xf32>
    %295 = arith.mulf %293, %294 : vector<1x8x8xf32>
    %cst_169 = arith.constant -1.000000e+30 : f32
    %296 = vector.broadcast %cst_169 : f32 to vector<1x8x8xf32>
    %297 = arith.select %14, %295, %296 : vector<1x8x8xi1>, vector<1x8x8xf32>
    %cst_170 = arith.constant dense<0xFF800000> : vector<1x8xf32>
    %298 = vector.multi_reduction <maximumf>, %297, %cst_170 [2] : vector<1x8x8xf32> to vector<1x8xf32>
    %299 = vector.shape_cast %298 : vector<1x8xf32> to vector<1x8x1xf32>
    %300 = vector.broadcast %299 : vector<1x8x1xf32> to vector<1x8x8xf32>
    %301 = arith.subf %297, %300 : vector<1x8x8xf32>
    %302 = math.exp %301 : vector<1x8x8xf32>
    %cst_171 = arith.constant dense<0.000000e+00> : vector<1x8xf32>
    %303 = vector.multi_reduction <add>, %302, %cst_171 [2] : vector<1x8x8xf32> to vector<1x8xf32>
    %304 = vector.shape_cast %303 : vector<1x8xf32> to vector<1x8x1xf32>
    %305 = tpu.reciprocal %304 {approx = true} : vector<1x8x1xf32> -> vector<1x8x1xf32>
    %306 = vector.broadcast %305 : vector<1x8x1xf32> to vector<1x8x8xf32>
    %307 = arith.mulf %302, %306 : vector<1x8x8xf32>
    %308 = arith.truncf %307 : vector<1x8x8xf32> to vector<1x8x8xbf16>
    "tpu.trace_start"() <{level = 10 : i32, message = "bqk,bkd->bqd"}> : () -> ()
    %cst_172 = arith.constant dense<0.000000e+00> : vector<1x8x8xf32>
    %309 = tpu.matmul %308, %292, %cst_172 {dimension_numbers = #tpu.dot_dimension_numbers<[2], [1], [1], [2], [0, 0, 0, 1, 1, 2], [0], [0]>} : vector<1x8x8xbf16>, vector<1x8x8xbf16>, vector<1x8x8xf32> -> vector<1x8x8xf32>
    "tpu.trace_stop"() : () -> ()
    %310 = vector.shape_cast %309 : vector<1x8x8xf32> to vector<8x8xf32>
    %311 = arith.truncf %310 : vector<8x8xf32> to vector<8x8xbf16>
    %c5_173 = arith.constant 5 : index
    %c0_174 = arith.constant 0 : index
    %c0_175 = arith.constant 0 : index
    %312 = vector.load %arg7[%c5_173, %c0_174, %c0_175] : memref<10x8x128xbf16, #tpu.memory_space<vmem>>, vector<1x8x128xbf16>
    %313 = vector.shape_cast %312 : vector<1x8x128xbf16> to vector<8x128xbf16>
    %cst_176 = arith.constant dense<0.000000e+00> : vector<8x128xf32>
    %314 = tpu.matmul %311, %313, %cst_176 {dimension_numbers = #tpu.dot_dimension_numbers<[1], [0], [0], [1], [0, 0, 1, 1], [], []>} : vector<8x8xbf16>, vector<8x128xbf16>, vector<8x128xf32> -> vector<8x128xf32>
    %315 = arith.addf %265, %314 : vector<8x128xf32>
    %c6 = arith.constant 6 : index
    %c0_177 = arith.constant 0 : index
    %c0_178 = arith.constant 0 : index
    %316 = vector.load %arg5[%c6, %c0_177, %c0_178] : memref<30x128x8xbf16, #tpu.memory_space<vmem>>, vector<1x128x8xbf16>
    %317 = vector.shape_cast %316 : vector<1x128x8xbf16> to vector<128x8xbf16>
    %cst_179 = arith.constant dense<0.000000e+00> : vector<8x8xf32>
    %318 = tpu.matmul %11, %317, %cst_179 {dimension_numbers = #tpu.dot_dimension_numbers<[1], [0], [0], [1], [0, 0, 1, 1], [], []>} : vector<8x128xbf16>, vector<128x8xbf16>, vector<8x8xf32> -> vector<8x8xf32>
    %c6_180 = arith.constant 6 : index
    %c0_181 = arith.constant 0 : index
    %c0_182 = arith.constant 0 : index
    %319 = vector.load %arg6[%c6_180, %c0_181, %c0_182] : memref<30x1x8xf32, #tpu.memory_space<vmem>>, vector<1x1x8xf32>
    %320 = vector.shape_cast %319 : vector<1x1x8xf32> to vector<1x8xf32>
    %321 = vector.broadcast %320 : vector<1x8xf32> to vector<8x8xf32>
    %322 = arith.addf %318, %321 : vector<8x8xf32>
    %c16 = arith.constant 16 : index
    %c0_183 = arith.constant 0 : index
    %c0_184 = arith.constant 0 : index
    %323 = vector.load %arg5[%c16, %c0_183, %c0_184] : memref<30x128x8xbf16, #tpu.memory_space<vmem>>, vector<1x128x8xbf16>
    %324 = vector.shape_cast %323 : vector<1x128x8xbf16> to vector<128x8xbf16>
    %cst_185 = arith.constant dense<0.000000e+00> : vector<8x8xf32>
    %325 = tpu.matmul %11, %324, %cst_185 {dimension_numbers = #tpu.dot_dimension_numbers<[1], [0], [0], [1], [0, 0, 1, 1], [], []>} : vector<8x128xbf16>, vector<128x8xbf16>, vector<8x8xf32> -> vector<8x8xf32>
    %c16_186 = arith.constant 16 : index
    %c0_187 = arith.constant 0 : index
    %c0_188 = arith.constant 0 : index
    %326 = vector.load %arg6[%c16_186, %c0_187, %c0_188] : memref<30x1x8xf32, #tpu.memory_space<vmem>>, vector<1x1x8xf32>
    %327 = vector.shape_cast %326 : vector<1x1x8xf32> to vector<1x8xf32>
    %328 = vector.broadcast %327 : vector<1x8xf32> to vector<8x8xf32>
    %329 = arith.addf %325, %328 : vector<8x8xf32>
    %c26 = arith.constant 26 : index
    %c0_189 = arith.constant 0 : index
    %c0_190 = arith.constant 0 : index
    %330 = vector.load %arg5[%c26, %c0_189, %c0_190] : memref<30x128x8xbf16, #tpu.memory_space<vmem>>, vector<1x128x8xbf16>
    %331 = vector.shape_cast %330 : vector<1x128x8xbf16> to vector<128x8xbf16>
    %cst_191 = arith.constant dense<0.000000e+00> : vector<8x8xf32>
    %332 = tpu.matmul %11, %331, %cst_191 {dimension_numbers = #tpu.dot_dimension_numbers<[1], [0], [0], [1], [0, 0, 1, 1], [], []>} : vector<8x128xbf16>, vector<128x8xbf16>, vector<8x8xf32> -> vector<8x8xf32>
    %c26_192 = arith.constant 26 : index
    %c0_193 = arith.constant 0 : index
    %c0_194 = arith.constant 0 : index
    %333 = vector.load %arg6[%c26_192, %c0_193, %c0_194] : memref<30x1x8xf32, #tpu.memory_space<vmem>>, vector<1x1x8xf32>
    %334 = vector.shape_cast %333 : vector<1x1x8xf32> to vector<1x8xf32>
    %335 = vector.broadcast %334 : vector<1x8xf32> to vector<8x8xf32>
    %336 = arith.addf %332, %335 : vector<8x8xf32>
    %337 = vector.shape_cast %322 : vector<8x8xf32> to vector<1x8x8xf32>
    %338 = arith.truncf %337 : vector<1x8x8xf32> to vector<1x8x8xbf16>
    %339 = vector.shape_cast %329 : vector<8x8xf32> to vector<1x8x8xf32>
    %340 = arith.truncf %339 : vector<1x8x8xf32> to vector<1x8x8xbf16>
    %341 = vector.shape_cast %336 : vector<8x8xf32> to vector<1x8x8xf32>
    %342 = arith.truncf %341 : vector<1x8x8xf32> to vector<1x8x8xbf16>
    "tpu.trace_start"() <{level = 10 : i32, message = "bqd,bkd->bqk"}> : () -> ()
    %cst_195 = arith.constant dense<0.000000e+00> : vector<1x8x8xf32>
    %343 = tpu.matmul %338, %340, %cst_195 {dimension_numbers = #tpu.dot_dimension_numbers<[2], [2], [1], [1], [0, 0, 0, 1, 1, 1], [0], [0]>} : vector<1x8x8xbf16>, vector<1x8x8xbf16>, vector<1x8x8xf32> -> vector<1x8x8xf32>
    "tpu.trace_stop"() : () -> ()
    %cst_196 = arith.constant 0.353553385 : f32
    %344 = vector.broadcast %cst_196 : f32 to vector<1x8x8xf32>
    %345 = arith.mulf %343, %344 : vector<1x8x8xf32>
    %cst_197 = arith.constant -1.000000e+30 : f32
    %346 = vector.broadcast %cst_197 : f32 to vector<1x8x8xf32>
    %347 = arith.select %14, %345, %346 : vector<1x8x8xi1>, vector<1x8x8xf32>
    %cst_198 = arith.constant dense<0xFF800000> : vector<1x8xf32>
    %348 = vector.multi_reduction <maximumf>, %347, %cst_198 [2] : vector<1x8x8xf32> to vector<1x8xf32>
    %349 = vector.shape_cast %348 : vector<1x8xf32> to vector<1x8x1xf32>
    %350 = vector.broadcast %349 : vector<1x8x1xf32> to vector<1x8x8xf32>
    %351 = arith.subf %347, %350 : vector<1x8x8xf32>
    %352 = math.exp %351 : vector<1x8x8xf32>
    %cst_199 = arith.constant dense<0.000000e+00> : vector<1x8xf32>
    %353 = vector.multi_reduction <add>, %352, %cst_199 [2] : vector<1x8x8xf32> to vector<1x8xf32>
    %354 = vector.shape_cast %353 : vector<1x8xf32> to vector<1x8x1xf32>
    %355 = tpu.reciprocal %354 {approx = true} : vector<1x8x1xf32> -> vector<1x8x1xf32>
    %356 = vector.broadcast %355 : vector<1x8x1xf32> to vector<1x8x8xf32>
    %357 = arith.mulf %352, %356 : vector<1x8x8xf32>
    %358 = arith.truncf %357 : vector<1x8x8xf32> to vector<1x8x8xbf16>
    "tpu.trace_start"() <{level = 10 : i32, message = "bqk,bkd->bqd"}> : () -> ()
    %cst_200 = arith.constant dense<0.000000e+00> : vector<1x8x8xf32>
    %359 = tpu.matmul %358, %342, %cst_200 {dimension_numbers = #tpu.dot_dimension_numbers<[2], [1], [1], [2], [0, 0, 0, 1, 1, 2], [0], [0]>} : vector<1x8x8xbf16>, vector<1x8x8xbf16>, vector<1x8x8xf32> -> vector<1x8x8xf32>
    "tpu.trace_stop"() : () -> ()
    %360 = vector.shape_cast %359 : vector<1x8x8xf32> to vector<8x8xf32>
    %361 = arith.truncf %360 : vector<8x8xf32> to vector<8x8xbf16>
    %c6_201 = arith.constant 6 : index
    %c0_202 = arith.constant 0 : index
    %c0_203 = arith.constant 0 : index
    %362 = vector.load %arg7[%c6_201, %c0_202, %c0_203] : memref<10x8x128xbf16, #tpu.memory_space<vmem>>, vector<1x8x128xbf16>
    %363 = vector.shape_cast %362 : vector<1x8x128xbf16> to vector<8x128xbf16>
    %cst_204 = arith.constant dense<0.000000e+00> : vector<8x128xf32>
    %364 = tpu.matmul %361, %363, %cst_204 {dimension_numbers = #tpu.dot_dimension_numbers<[1], [0], [0], [1], [0, 0, 1, 1], [], []>} : vector<8x8xbf16>, vector<8x128xbf16>, vector<8x128xf32> -> vector<8x128xf32>
    %365 = arith.addf %315, %364 : vector<8x128xf32>
    %c7 = arith.constant 7 : index
    %c0_205 = arith.constant 0 : index
    %c0_206 = arith.constant 0 : index
    %366 = vector.load %arg5[%c7, %c0_205, %c0_206] : memref<30x128x8xbf16, #tpu.memory_space<vmem>>, vector<1x128x8xbf16>
    %367 = vector.shape_cast %366 : vector<1x128x8xbf16> to vector<128x8xbf16>
    %cst_207 = arith.constant dense<0.000000e+00> : vector<8x8xf32>
    %368 = tpu.matmul %11, %367, %cst_207 {dimension_numbers = #tpu.dot_dimension_numbers<[1], [0], [0], [1], [0, 0, 1, 1], [], []>} : vector<8x128xbf16>, vector<128x8xbf16>, vector<8x8xf32> -> vector<8x8xf32>
    %c7_208 = arith.constant 7 : index
    %c0_209 = arith.constant 0 : index
    %c0_210 = arith.constant 0 : index
    %369 = vector.load %arg6[%c7_208, %c0_209, %c0_210] : memref<30x1x8xf32, #tpu.memory_space<vmem>>, vector<1x1x8xf32>
    %370 = vector.shape_cast %369 : vector<1x1x8xf32> to vector<1x8xf32>
    %371 = vector.broadcast %370 : vector<1x8xf32> to vector<8x8xf32>
    %372 = arith.addf %368, %371 : vector<8x8xf32>
    %c17 = arith.constant 17 : index
    %c0_211 = arith.constant 0 : index
    %c0_212 = arith.constant 0 : index
    %373 = vector.load %arg5[%c17, %c0_211, %c0_212] : memref<30x128x8xbf16, #tpu.memory_space<vmem>>, vector<1x128x8xbf16>
    %374 = vector.shape_cast %373 : vector<1x128x8xbf16> to vector<128x8xbf16>
    %cst_213 = arith.constant dense<0.000000e+00> : vector<8x8xf32>
    %375 = tpu.matmul %11, %374, %cst_213 {dimension_numbers = #tpu.dot_dimension_numbers<[1], [0], [0], [1], [0, 0, 1, 1], [], []>} : vector<8x128xbf16>, vector<128x8xbf16>, vector<8x8xf32> -> vector<8x8xf32>
    %c17_214 = arith.constant 17 : index
    %c0_215 = arith.constant 0 : index
    %c0_216 = arith.constant 0 : index
    %376 = vector.load %arg6[%c17_214, %c0_215, %c0_216] : memref<30x1x8xf32, #tpu.memory_space<vmem>>, vector<1x1x8xf32>
    %377 = vector.shape_cast %376 : vector<1x1x8xf32> to vector<1x8xf32>
    %378 = vector.broadcast %377 : vector<1x8xf32> to vector<8x8xf32>
    %379 = arith.addf %375, %378 : vector<8x8xf32>
    %c27 = arith.constant 27 : index
    %c0_217 = arith.constant 0 : index
    %c0_218 = arith.constant 0 : index
    %380 = vector.load %arg5[%c27, %c0_217, %c0_218] : memref<30x128x8xbf16, #tpu.memory_space<vmem>>, vector<1x128x8xbf16>
    %381 = vector.shape_cast %380 : vector<1x128x8xbf16> to vector<128x8xbf16>
    %cst_219 = arith.constant dense<0.000000e+00> : vector<8x8xf32>
    %382 = tpu.matmul %11, %381, %cst_219 {dimension_numbers = #tpu.dot_dimension_numbers<[1], [0], [0], [1], [0, 0, 1, 1], [], []>} : vector<8x128xbf16>, vector<128x8xbf16>, vector<8x8xf32> -> vector<8x8xf32>
    %c27_220 = arith.constant 27 : index
    %c0_221 = arith.constant 0 : index
    %c0_222 = arith.constant 0 : index
    %383 = vector.load %arg6[%c27_220, %c0_221, %c0_222] : memref<30x1x8xf32, #tpu.memory_space<vmem>>, vector<1x1x8xf32>
    %384 = vector.shape_cast %383 : vector<1x1x8xf32> to vector<1x8xf32>
    %385 = vector.broadcast %384 : vector<1x8xf32> to vector<8x8xf32>
    %386 = arith.addf %382, %385 : vector<8x8xf32>
    %387 = vector.shape_cast %372 : vector<8x8xf32> to vector<1x8x8xf32>
    %388 = arith.truncf %387 : vector<1x8x8xf32> to vector<1x8x8xbf16>
    %389 = vector.shape_cast %379 : vector<8x8xf32> to vector<1x8x8xf32>
    %390 = arith.truncf %389 : vector<1x8x8xf32> to vector<1x8x8xbf16>
    %391 = vector.shape_cast %386 : vector<8x8xf32> to vector<1x8x8xf32>
    %392 = arith.truncf %391 : vector<1x8x8xf32> to vector<1x8x8xbf16>
    "tpu.trace_start"() <{level = 10 : i32, message = "bqd,bkd->bqk"}> : () -> ()
    %cst_223 = arith.constant dense<0.000000e+00> : vector<1x8x8xf32>
    %393 = tpu.matmul %388, %390, %cst_223 {dimension_numbers = #tpu.dot_dimension_numbers<[2], [2], [1], [1], [0, 0, 0, 1, 1, 1], [0], [0]>} : vector<1x8x8xbf16>, vector<1x8x8xbf16>, vector<1x8x8xf32> -> vector<1x8x8xf32>
    "tpu.trace_stop"() : () -> ()
    %cst_224 = arith.constant 0.353553385 : f32
    %394 = vector.broadcast %cst_224 : f32 to vector<1x8x8xf32>
    %395 = arith.mulf %393, %394 : vector<1x8x8xf32>
    %cst_225 = arith.constant -1.000000e+30 : f32
    %396 = vector.broadcast %cst_225 : f32 to vector<1x8x8xf32>
    %397 = arith.select %14, %395, %396 : vector<1x8x8xi1>, vector<1x8x8xf32>
    %cst_226 = arith.constant dense<0xFF800000> : vector<1x8xf32>
    %398 = vector.multi_reduction <maximumf>, %397, %cst_226 [2] : vector<1x8x8xf32> to vector<1x8xf32>
    %399 = vector.shape_cast %398 : vector<1x8xf32> to vector<1x8x1xf32>
    %400 = vector.broadcast %399 : vector<1x8x1xf32> to vector<1x8x8xf32>
    %401 = arith.subf %397, %400 : vector<1x8x8xf32>
    %402 = math.exp %401 : vector<1x8x8xf32>
    %cst_227 = arith.constant dense<0.000000e+00> : vector<1x8xf32>
    %403 = vector.multi_reduction <add>, %402, %cst_227 [2] : vector<1x8x8xf32> to vector<1x8xf32>
    %404 = vector.shape_cast %403 : vector<1x8xf32> to vector<1x8x1xf32>
    %405 = tpu.reciprocal %404 {approx = true} : vector<1x8x1xf32> -> vector<1x8x1xf32>
    %406 = vector.broadcast %405 : vector<1x8x1xf32> to vector<1x8x8xf32>
    %407 = arith.mulf %402, %406 : vector<1x8x8xf32>
    %408 = arith.truncf %407 : vector<1x8x8xf32> to vector<1x8x8xbf16>
    "tpu.trace_start"() <{level = 10 : i32, message = "bqk,bkd->bqd"}> : () -> ()
    %cst_228 = arith.constant dense<0.000000e+00> : vector<1x8x8xf32>
    %409 = tpu.matmul %408, %392, %cst_228 {dimension_numbers = #tpu.dot_dimension_numbers<[2], [1], [1], [2], [0, 0, 0, 1, 1, 2], [0], [0]>} : vector<1x8x8xbf16>, vector<1x8x8xbf16>, vector<1x8x8xf32> -> vector<1x8x8xf32>
    "tpu.trace_stop"() : () -> ()
    %410 = vector.shape_cast %409 : vector<1x8x8xf32> to vector<8x8xf32>
    %411 = arith.truncf %410 : vector<8x8xf32> to vector<8x8xbf16>
    %c7_229 = arith.constant 7 : index
    %c0_230 = arith.constant 0 : index
    %c0_231 = arith.constant 0 : index
    %412 = vector.load %arg7[%c7_229, %c0_230, %c0_231] : memref<10x8x128xbf16, #tpu.memory_space<vmem>>, vector<1x8x128xbf16>
    %413 = vector.shape_cast %412 : vector<1x8x128xbf16> to vector<8x128xbf16>
    %cst_232 = arith.constant dense<0.000000e+00> : vector<8x128xf32>
    %414 = tpu.matmul %411, %413, %cst_232 {dimension_numbers = #tpu.dot_dimension_numbers<[1], [0], [0], [1], [0, 0, 1, 1], [], []>} : vector<8x8xbf16>, vector<8x128xbf16>, vector<8x128xf32> -> vector<8x128xf32>
    %415 = arith.addf %365, %414 : vector<8x128xf32>
    %c8 = arith.constant 8 : index
    %c0_233 = arith.constant 0 : index
    %c0_234 = arith.constant 0 : index
    %416 = vector.load %arg5[%c8, %c0_233, %c0_234] : memref<30x128x8xbf16, #tpu.memory_space<vmem>>, vector<1x128x8xbf16>
    %417 = vector.shape_cast %416 : vector<1x128x8xbf16> to vector<128x8xbf16>
    %cst_235 = arith.constant dense<0.000000e+00> : vector<8x8xf32>
    %418 = tpu.matmul %11, %417, %cst_235 {dimension_numbers = #tpu.dot_dimension_numbers<[1], [0], [0], [1], [0, 0, 1, 1], [], []>} : vector<8x128xbf16>, vector<128x8xbf16>, vector<8x8xf32> -> vector<8x8xf32>
    %c8_236 = arith.constant 8 : index
    %c0_237 = arith.constant 0 : index
    %c0_238 = arith.constant 0 : index
    %419 = vector.load %arg6[%c8_236, %c0_237, %c0_238] : memref<30x1x8xf32, #tpu.memory_space<vmem>>, vector<1x1x8xf32>
    %420 = vector.shape_cast %419 : vector<1x1x8xf32> to vector<1x8xf32>
    %421 = vector.broadcast %420 : vector<1x8xf32> to vector<8x8xf32>
    %422 = arith.addf %418, %421 : vector<8x8xf32>
    %c18 = arith.constant 18 : index
    %c0_239 = arith.constant 0 : index
    %c0_240 = arith.constant 0 : index
    %423 = vector.load %arg5[%c18, %c0_239, %c0_240] : memref<30x128x8xbf16, #tpu.memory_space<vmem>>, vector<1x128x8xbf16>
    %424 = vector.shape_cast %423 : vector<1x128x8xbf16> to vector<128x8xbf16>
    %cst_241 = arith.constant dense<0.000000e+00> : vector<8x8xf32>
    %425 = tpu.matmul %11, %424, %cst_241 {dimension_numbers = #tpu.dot_dimension_numbers<[1], [0], [0], [1], [0, 0, 1, 1], [], []>} : vector<8x128xbf16>, vector<128x8xbf16>, vector<8x8xf32> -> vector<8x8xf32>
    %c18_242 = arith.constant 18 : index
    %c0_243 = arith.constant 0 : index
    %c0_244 = arith.constant 0 : index
    %426 = vector.load %arg6[%c18_242, %c0_243, %c0_244] : memref<30x1x8xf32, #tpu.memory_space<vmem>>, vector<1x1x8xf32>
    %427 = vector.shape_cast %426 : vector<1x1x8xf32> to vector<1x8xf32>
    %428 = vector.broadcast %427 : vector<1x8xf32> to vector<8x8xf32>
    %429 = arith.addf %425, %428 : vector<8x8xf32>
    %c28 = arith.constant 28 : index
    %c0_245 = arith.constant 0 : index
    %c0_246 = arith.constant 0 : index
    %430 = vector.load %arg5[%c28, %c0_245, %c0_246] : memref<30x128x8xbf16, #tpu.memory_space<vmem>>, vector<1x128x8xbf16>
    %431 = vector.shape_cast %430 : vector<1x128x8xbf16> to vector<128x8xbf16>
    %cst_247 = arith.constant dense<0.000000e+00> : vector<8x8xf32>
    %432 = tpu.matmul %11, %431, %cst_247 {dimension_numbers = #tpu.dot_dimension_numbers<[1], [0], [0], [1], [0, 0, 1, 1], [], []>} : vector<8x128xbf16>, vector<128x8xbf16>, vector<8x8xf32> -> vector<8x8xf32>
    %c28_248 = arith.constant 28 : index
    %c0_249 = arith.constant 0 : index
    %c0_250 = arith.constant 0 : index
    %433 = vector.load %arg6[%c28_248, %c0_249, %c0_250] : memref<30x1x8xf32, #tpu.memory_space<vmem>>, vector<1x1x8xf32>
    %434 = vector.shape_cast %433 : vector<1x1x8xf32> to vector<1x8xf32>
    %435 = vector.broadcast %434 : vector<1x8xf32> to vector<8x8xf32>
    %436 = arith.addf %432, %435 : vector<8x8xf32>
    %437 = vector.shape_cast %422 : vector<8x8xf32> to vector<1x8x8xf32>
    %438 = arith.truncf %437 : vector<1x8x8xf32> to vector<1x8x8xbf16>
    %439 = vector.shape_cast %429 : vector<8x8xf32> to vector<1x8x8xf32>
    %440 = arith.truncf %439 : vector<1x8x8xf32> to vector<1x8x8xbf16>
    %441 = vector.shape_cast %436 : vector<8x8xf32> to vector<1x8x8xf32>
    %442 = arith.truncf %441 : vector<1x8x8xf32> to vector<1x8x8xbf16>
    "tpu.trace_start"() <{level = 10 : i32, message = "bqd,bkd->bqk"}> : () -> ()
    %cst_251 = arith.constant dense<0.000000e+00> : vector<1x8x8xf32>
    %443 = tpu.matmul %438, %440, %cst_251 {dimension_numbers = #tpu.dot_dimension_numbers<[2], [2], [1], [1], [0, 0, 0, 1, 1, 1], [0], [0]>} : vector<1x8x8xbf16>, vector<1x8x8xbf16>, vector<1x8x8xf32> -> vector<1x8x8xf32>
    "tpu.trace_stop"() : () -> ()
    %cst_252 = arith.constant 0.353553385 : f32
    %444 = vector.broadcast %cst_252 : f32 to vector<1x8x8xf32>
    %445 = arith.mulf %443, %444 : vector<1x8x8xf32>
    %cst_253 = arith.constant -1.000000e+30 : f32
    %446 = vector.broadcast %cst_253 : f32 to vector<1x8x8xf32>
    %447 = arith.select %14, %445, %446 : vector<1x8x8xi1>, vector<1x8x8xf32>
    %cst_254 = arith.constant dense<0xFF800000> : vector<1x8xf32>
    %448 = vector.multi_reduction <maximumf>, %447, %cst_254 [2] : vector<1x8x8xf32> to vector<1x8xf32>
    %449 = vector.shape_cast %448 : vector<1x8xf32> to vector<1x8x1xf32>
    %450 = vector.broadcast %449 : vector<1x8x1xf32> to vector<1x8x8xf32>
    %451 = arith.subf %447, %450 : vector<1x8x8xf32>
    %452 = math.exp %451 : vector<1x8x8xf32>
    %cst_255 = arith.constant dense<0.000000e+00> : vector<1x8xf32>
    %453 = vector.multi_reduction <add>, %452, %cst_255 [2] : vector<1x8x8xf32> to vector<1x8xf32>
    %454 = vector.shape_cast %453 : vector<1x8xf32> to vector<1x8x1xf32>
    %455 = tpu.reciprocal %454 {approx = true} : vector<1x8x1xf32> -> vector<1x8x1xf32>
    %456 = vector.broadcast %455 : vector<1x8x1xf32> to vector<1x8x8xf32>
    %457 = arith.mulf %452, %456 : vector<1x8x8xf32>
    %458 = arith.truncf %457 : vector<1x8x8xf32> to vector<1x8x8xbf16>
    "tpu.trace_start"() <{level = 10 : i32, message = "bqk,bkd->bqd"}> : () -> ()
    %cst_256 = arith.constant dense<0.000000e+00> : vector<1x8x8xf32>
    %459 = tpu.matmul %458, %442, %cst_256 {dimension_numbers = #tpu.dot_dimension_numbers<[2], [1], [1], [2], [0, 0, 0, 1, 1, 2], [0], [0]>} : vector<1x8x8xbf16>, vector<1x8x8xbf16>, vector<1x8x8xf32> -> vector<1x8x8xf32>
    "tpu.trace_stop"() : () -> ()
    %460 = vector.shape_cast %459 : vector<1x8x8xf32> to vector<8x8xf32>
    %461 = arith.truncf %460 : vector<8x8xf32> to vector<8x8xbf16>
    %c8_257 = arith.constant 8 : index
    %c0_258 = arith.constant 0 : index
    %c0_259 = arith.constant 0 : index
    %462 = vector.load %arg7[%c8_257, %c0_258, %c0_259] : memref<10x8x128xbf16, #tpu.memory_space<vmem>>, vector<1x8x128xbf16>
    %463 = vector.shape_cast %462 : vector<1x8x128xbf16> to vector<8x128xbf16>
    %cst_260 = arith.constant dense<0.000000e+00> : vector<8x128xf32>
    %464 = tpu.matmul %461, %463, %cst_260 {dimension_numbers = #tpu.dot_dimension_numbers<[1], [0], [0], [1], [0, 0, 1, 1], [], []>} : vector<8x8xbf16>, vector<8x128xbf16>, vector<8x128xf32> -> vector<8x128xf32>
    %465 = arith.addf %415, %464 : vector<8x128xf32>
    %c9 = arith.constant 9 : index
    %c0_261 = arith.constant 0 : index
    %c0_262 = arith.constant 0 : index
    %466 = vector.load %arg5[%c9, %c0_261, %c0_262] : memref<30x128x8xbf16, #tpu.memory_space<vmem>>, vector<1x128x8xbf16>
    %467 = vector.shape_cast %466 : vector<1x128x8xbf16> to vector<128x8xbf16>
    %cst_263 = arith.constant dense<0.000000e+00> : vector<8x8xf32>
    %468 = tpu.matmul %11, %467, %cst_263 {dimension_numbers = #tpu.dot_dimension_numbers<[1], [0], [0], [1], [0, 0, 1, 1], [], []>} : vector<8x128xbf16>, vector<128x8xbf16>, vector<8x8xf32> -> vector<8x8xf32>
    %c9_264 = arith.constant 9 : index
    %c0_265 = arith.constant 0 : index
    %c0_266 = arith.constant 0 : index
    %469 = vector.load %arg6[%c9_264, %c0_265, %c0_266] : memref<30x1x8xf32, #tpu.memory_space<vmem>>, vector<1x1x8xf32>
    %470 = vector.shape_cast %469 : vector<1x1x8xf32> to vector<1x8xf32>
    %471 = vector.broadcast %470 : vector<1x8xf32> to vector<8x8xf32>
    %472 = arith.addf %468, %471 : vector<8x8xf32>
    %c19 = arith.constant 19 : index
    %c0_267 = arith.constant 0 : index
    %c0_268 = arith.constant 0 : index
    %473 = vector.load %arg5[%c19, %c0_267, %c0_268] : memref<30x128x8xbf16, #tpu.memory_space<vmem>>, vector<1x128x8xbf16>
    %474 = vector.shape_cast %473 : vector<1x128x8xbf16> to vector<128x8xbf16>
    %cst_269 = arith.constant dense<0.000000e+00> : vector<8x8xf32>
    %475 = tpu.matmul %11, %474, %cst_269 {dimension_numbers = #tpu.dot_dimension_numbers<[1], [0], [0], [1], [0, 0, 1, 1], [], []>} : vector<8x128xbf16>, vector<128x8xbf16>, vector<8x8xf32> -> vector<8x8xf32>
    %c19_270 = arith.constant 19 : index
    %c0_271 = arith.constant 0 : index
    %c0_272 = arith.constant 0 : index
    %476 = vector.load %arg6[%c19_270, %c0_271, %c0_272] : memref<30x1x8xf32, #tpu.memory_space<vmem>>, vector<1x1x8xf32>
    %477 = vector.shape_cast %476 : vector<1x1x8xf32> to vector<1x8xf32>
    %478 = vector.broadcast %477 : vector<1x8xf32> to vector<8x8xf32>
    %479 = arith.addf %475, %478 : vector<8x8xf32>
    %c29 = arith.constant 29 : index
    %c0_273 = arith.constant 0 : index
    %c0_274 = arith.constant 0 : index
    %480 = vector.load %arg5[%c29, %c0_273, %c0_274] : memref<30x128x8xbf16, #tpu.memory_space<vmem>>, vector<1x128x8xbf16>
    %481 = vector.shape_cast %480 : vector<1x128x8xbf16> to vector<128x8xbf16>
    %cst_275 = arith.constant dense<0.000000e+00> : vector<8x8xf32>
    %482 = tpu.matmul %11, %481, %cst_275 {dimension_numbers = #tpu.dot_dimension_numbers<[1], [0], [0], [1], [0, 0, 1, 1], [], []>} : vector<8x128xbf16>, vector<128x8xbf16>, vector<8x8xf32> -> vector<8x8xf32>
    %c29_276 = arith.constant 29 : index
    %c0_277 = arith.constant 0 : index
    %c0_278 = arith.constant 0 : index
    %483 = vector.load %arg6[%c29_276, %c0_277, %c0_278] : memref<30x1x8xf32, #tpu.memory_space<vmem>>, vector<1x1x8xf32>
    %484 = vector.shape_cast %483 : vector<1x1x8xf32> to vector<1x8xf32>
    %485 = vector.broadcast %484 : vector<1x8xf32> to vector<8x8xf32>
    %486 = arith.addf %482, %485 : vector<8x8xf32>
    %487 = vector.shape_cast %472 : vector<8x8xf32> to vector<1x8x8xf32>
    %488 = arith.truncf %487 : vector<1x8x8xf32> to vector<1x8x8xbf16>
    %489 = vector.shape_cast %479 : vector<8x8xf32> to vector<1x8x8xf32>
    %490 = arith.truncf %489 : vector<1x8x8xf32> to vector<1x8x8xbf16>
    %491 = vector.shape_cast %486 : vector<8x8xf32> to vector<1x8x8xf32>
    %492 = arith.truncf %491 : vector<1x8x8xf32> to vector<1x8x8xbf16>
    "tpu.trace_start"() <{level = 10 : i32, message = "bqd,bkd->bqk"}> : () -> ()
    %cst_279 = arith.constant dense<0.000000e+00> : vector<1x8x8xf32>
    %493 = tpu.matmul %488, %490, %cst_279 {dimension_numbers = #tpu.dot_dimension_numbers<[2], [2], [1], [1], [0, 0, 0, 1, 1, 1], [0], [0]>} : vector<1x8x8xbf16>, vector<1x8x8xbf16>, vector<1x8x8xf32> -> vector<1x8x8xf32>
    "tpu.trace_stop"() : () -> ()
    %cst_280 = arith.constant 0.353553385 : f32
    %494 = vector.broadcast %cst_280 : f32 to vector<1x8x8xf32>
    %495 = arith.mulf %493, %494 : vector<1x8x8xf32>
    %cst_281 = arith.constant -1.000000e+30 : f32
    %496 = vector.broadcast %cst_281 : f32 to vector<1x8x8xf32>
    %497 = arith.select %14, %495, %496 : vector<1x8x8xi1>, vector<1x8x8xf32>
    %cst_282 = arith.constant dense<0xFF800000> : vector<1x8xf32>
    %498 = vector.multi_reduction <maximumf>, %497, %cst_282 [2] : vector<1x8x8xf32> to vector<1x8xf32>
    %499 = vector.shape_cast %498 : vector<1x8xf32> to vector<1x8x1xf32>
    %500 = vector.broadcast %499 : vector<1x8x1xf32> to vector<1x8x8xf32>
    %501 = arith.subf %497, %500 : vector<1x8x8xf32>
    %502 = math.exp %501 : vector<1x8x8xf32>
    %cst_283 = arith.constant dense<0.000000e+00> : vector<1x8xf32>
    %503 = vector.multi_reduction <add>, %502, %cst_283 [2] : vector<1x8x8xf32> to vector<1x8xf32>
    %504 = vector.shape_cast %503 : vector<1x8xf32> to vector<1x8x1xf32>
    %505 = tpu.reciprocal %504 {approx = true} : vector<1x8x1xf32> -> vector<1x8x1xf32>
    %506 = vector.broadcast %505 : vector<1x8x1xf32> to vector<1x8x8xf32>
    %507 = arith.mulf %502, %506 : vector<1x8x8xf32>
    %508 = arith.truncf %507 : vector<1x8x8xf32> to vector<1x8x8xbf16>
    "tpu.trace_start"() <{level = 10 : i32, message = "bqk,bkd->bqd"}> : () -> ()
    %cst_284 = arith.constant dense<0.000000e+00> : vector<1x8x8xf32>
    %509 = tpu.matmul %508, %492, %cst_284 {dimension_numbers = #tpu.dot_dimension_numbers<[2], [1], [1], [2], [0, 0, 0, 1, 1, 2], [0], [0]>} : vector<1x8x8xbf16>, vector<1x8x8xbf16>, vector<1x8x8xf32> -> vector<1x8x8xf32>
    "tpu.trace_stop"() : () -> ()
    %510 = vector.shape_cast %509 : vector<1x8x8xf32> to vector<8x8xf32>
    %511 = arith.truncf %510 : vector<8x8xf32> to vector<8x8xbf16>
    %c9_285 = arith.constant 9 : index
    %c0_286 = arith.constant 0 : index
    %c0_287 = arith.constant 0 : index
    %512 = vector.load %arg7[%c9_285, %c0_286, %c0_287] : memref<10x8x128xbf16, #tpu.memory_space<vmem>>, vector<1x8x128xbf16>
    %513 = vector.shape_cast %512 : vector<1x8x128xbf16> to vector<8x128xbf16>
    %cst_288 = arith.constant dense<0.000000e+00> : vector<8x128xf32>
    %514 = tpu.matmul %511, %513, %cst_288 {dimension_numbers = #tpu.dot_dimension_numbers<[1], [0], [0], [1], [0, 0, 1, 1], [], []>} : vector<8x8xbf16>, vector<8x128xbf16>, vector<8x128xf32> -> vector<8x128xf32>
    %515 = arith.addf %465, %514 : vector<8x128xf32>
    %c0_289 = arith.constant 0 : index
    %c0_290 = arith.constant 0 : index
    %516 = vector.load %arg8[%c0_289, %c0_290] : memref<1x128xf32, #tpu.memory_space<vmem>>, vector<1x128xf32>
    %517 = vector.broadcast %516 : vector<1x128xf32> to vector<8x128xf32>
    %518 = arith.addf %515, %517 : vector<8x128xf32>
    %519 = arith.addf %10, %518 : vector<8x128xf32>
    %c0_291 = arith.constant 0 : index
    %c0_292 = arith.constant 0 : index
    %520 = vector.load %arg9[%c0_291, %c0_292] : memref<1x128xf32, #tpu.memory_space<vmem>>, vector<1x128xf32>
    %c0_293 = arith.constant 0 : index
    %c0_294 = arith.constant 0 : index
    %521 = vector.load %arg10[%c0_293, %c0_294] : memref<1x128xf32, #tpu.memory_space<vmem>>, vector<1x128xf32>
    %cst_295 = arith.constant dense<0.000000e+00> : vector<8xf32>
    %522 = vector.multi_reduction <add>, %519, %cst_295 [1] : vector<8x128xf32> to vector<8xf32>
    %523 = vector.shape_cast %522 : vector<8xf32> to vector<8x1xf32>
    %cst_296 = arith.constant 1.250000e-02 : f32
    %524 = vector.broadcast %cst_296 : f32 to vector<8x1xf32>
    %525 = arith.mulf %523, %524 : vector<8x1xf32>
    %526 = arith.mulf %519, %519 : vector<8x128xf32>
    %cst_297 = arith.constant dense<0.000000e+00> : vector<8xf32>
    %527 = vector.multi_reduction <add>, %526, %cst_297 [1] : vector<8x128xf32> to vector<8xf32>
    %528 = vector.shape_cast %527 : vector<8xf32> to vector<8x1xf32>
    %cst_298 = arith.constant 1.250000e-02 : f32
    %529 = vector.broadcast %cst_298 : f32 to vector<8x1xf32>
    %530 = arith.mulf %528, %529 : vector<8x1xf32>
    %531 = arith.mulf %525, %525 : vector<8x1xf32>
    %532 = arith.subf %530, %531 : vector<8x1xf32>
    %cst_299 = arith.constant 0.000000e+00 : f32
    %533 = vector.broadcast %cst_299 : f32 to vector<8x1xf32>
    %534 = arith.maximumf %532, %533 : vector<8x1xf32>
    %535 = vector.broadcast %525 : vector<8x1xf32> to vector<8x128xf32>
    %536 = arith.subf %519, %535 : vector<8x128xf32>
    %cst_300 = arith.constant 9.99999974E-6 : f32
    %537 = vector.broadcast %cst_300 : f32 to vector<8x1xf32>
    %538 = arith.addf %534, %537 : vector<8x1xf32>
    %539 = math.rsqrt %538 : vector<8x1xf32>
    %540 = vector.broadcast %539 : vector<8x1xf32> to vector<8x128xf32>
    %541 = arith.mulf %536, %540 : vector<8x128xf32>
    %542 = vector.broadcast %520 : vector<1x128xf32> to vector<8x128xf32>
    %543 = arith.mulf %541, %542 : vector<8x128xf32>
    %544 = vector.broadcast %521 : vector<1x128xf32> to vector<8x128xf32>
    %545 = arith.addf %543, %544 : vector<8x128xf32>
    %546 = arith.truncf %545 : vector<8x128xf32> to vector<8x128xbf16>
    %c0_301 = arith.constant 0 : index
    %c0_302 = arith.constant 0 : index
    %547 = vector.load %arg11[%c0_301, %c0_302] : memref<128x128xbf16, #tpu.memory_space<vmem>>, vector<128x128xbf16>
    %cst_303 = arith.constant dense<0.000000e+00> : vector<8x128xf32>
    %548 = tpu.matmul %546, %547, %cst_303 {dimension_numbers = #tpu.dot_dimension_numbers<[1], [0], [0], [1], [0, 0, 1, 1], [], []>} : vector<8x128xbf16>, vector<128x128xbf16>, vector<8x128xf32> -> vector<8x128xf32>
    %c0_304 = arith.constant 0 : index
    %c0_305 = arith.constant 0 : index
    %549 = vector.load %arg12[%c0_304, %c0_305] : memref<1x128xf32, #tpu.memory_space<vmem>>, vector<1x128xf32>
    %550 = vector.broadcast %549 : vector<1x128xf32> to vector<8x128xf32>
    %551 = arith.addf %548, %550 : vector<8x128xf32>
    %cst_306 = arith.constant 0.000000e+00 : f32
    %552 = vector.broadcast %cst_306 : f32 to vector<8x128xf32>
    %553 = arith.maximumf %551, %552 : vector<8x128xf32>
    %554 = arith.truncf %553 : vector<8x128xf32> to vector<8x128xbf16>
    %c0_307 = arith.constant 0 : index
    %c0_308 = arith.constant 0 : index
    %555 = vector.load %arg13[%c0_307, %c0_308] : memref<128x128xbf16, #tpu.memory_space<vmem>>, vector<128x128xbf16>
    %cst_309 = arith.constant dense<0.000000e+00> : vector<8x128xf32>
    %556 = tpu.matmul %554, %555, %cst_309 {dimension_numbers = #tpu.dot_dimension_numbers<[1], [0], [0], [1], [0, 0, 1, 1], [], []>} : vector<8x128xbf16>, vector<128x128xbf16>, vector<8x128xf32> -> vector<8x128xf32>
    %c0_310 = arith.constant 0 : index
    %c0_311 = arith.constant 0 : index
    %557 = vector.load %arg14[%c0_310, %c0_311] : memref<1x128xf32, #tpu.memory_space<vmem>>, vector<1x128xf32>
    %558 = vector.broadcast %557 : vector<1x128xf32> to vector<8x128xf32>
    %559 = arith.addf %556, %558 : vector<8x128xf32>
    %560 = arith.addf %545, %559 : vector<8x128xf32>
    %c0_312 = arith.constant 0 : index
    %c0_313 = arith.constant 0 : index
    %561 = vector.load %arg15[%c0_312, %c0_313] : memref<1x128xf32, #tpu.memory_space<vmem>>, vector<1x128xf32>
    %c0_314 = arith.constant 0 : index
    %c0_315 = arith.constant 0 : index
    %562 = vector.load %arg16[%c0_314, %c0_315] : memref<1x128xf32, #tpu.memory_space<vmem>>, vector<1x128xf32>
    %cst_316 = arith.constant dense<0.000000e+00> : vector<8xf32>
    %563 = vector.multi_reduction <add>, %560, %cst_316 [1] : vector<8x128xf32> to vector<8xf32>
    %564 = vector.shape_cast %563 : vector<8xf32> to vector<8x1xf32>
    %cst_317 = arith.constant 1.250000e-02 : f32
    %565 = vector.broadcast %cst_317 : f32 to vector<8x1xf32>
    %566 = arith.mulf %564, %565 : vector<8x1xf32>
    %567 = arith.mulf %560, %560 : vector<8x128xf32>
    %cst_318 = arith.constant dense<0.000000e+00> : vector<8xf32>
    %568 = vector.multi_reduction <add>, %567, %cst_318 [1] : vector<8x128xf32> to vector<8xf32>
    %569 = vector.shape_cast %568 : vector<8xf32> to vector<8x1xf32>
    %cst_319 = arith.constant 1.250000e-02 : f32
    %570 = vector.broadcast %cst_319 : f32 to vector<8x1xf32>
    %571 = arith.mulf %569, %570 : vector<8x1xf32>
    %572 = arith.mulf %566, %566 : vector<8x1xf32>
    %573 = arith.subf %571, %572 : vector<8x1xf32>
    %cst_320 = arith.constant 0.000000e+00 : f32
    %574 = vector.broadcast %cst_320 : f32 to vector<8x1xf32>
    %575 = arith.maximumf %573, %574 : vector<8x1xf32>
    %576 = vector.broadcast %566 : vector<8x1xf32> to vector<8x128xf32>
    %577 = arith.subf %560, %576 : vector<8x128xf32>
    %cst_321 = arith.constant 9.99999974E-6 : f32
    %578 = vector.broadcast %cst_321 : f32 to vector<8x1xf32>
    %579 = arith.addf %575, %578 : vector<8x1xf32>
    %580 = math.rsqrt %579 : vector<8x1xf32>
    %581 = vector.broadcast %580 : vector<8x1xf32> to vector<8x128xf32>
    %582 = arith.mulf %577, %581 : vector<8x128xf32>
    %583 = vector.broadcast %561 : vector<1x128xf32> to vector<8x128xf32>
    %584 = arith.mulf %582, %583 : vector<8x128xf32>
    %585 = vector.broadcast %562 : vector<1x128xf32> to vector<8x128xf32>
    %586 = arith.addf %584, %585 : vector<8x128xf32>
    %587 = vector.shape_cast %586 : vector<8x128xf32> to vector<1x8x128xf32>
    %588 = vector.extract_strided_slice %587 {offsets = [0, 7, 0], sizes = [1, 1, 128], strides = [1, 1, 1]} : vector<1x8x128xf32> to vector<1x1x128xf32>
    %589 = vector.shape_cast %588 : vector<1x1x128xf32> to vector<1x128xf32>
    %c0_322 = arith.constant 0 : index
    %c0_323 = arith.constant 0 : index
    %590 = vector.load %arg17[%c0_322, %c0_323] : memref<1x128xbf16, #tpu.memory_space<vmem>>, vector<1x128xbf16>
    %591 = arith.truncf %589 : vector<1x128xf32> to vector<1x128xbf16>
    %592 = arith.extf %590 : vector<1x128xbf16> to vector<1x128xf32>
    %593 = arith.extf %591 : vector<1x128xbf16> to vector<1x128xf32>
    %cst_324 = arith.constant dense<0.000000e+00> : vector<1xf32>
    %594 = arith.mulf %592, %593 : vector<1x128xf32>
    %595 = vector.multi_reduction <add>, %594, %cst_324 [1] : vector<1x128xf32> to vector<1xf32>
    %596 = vector.shape_cast %595 : vector<1xf32> to vector<1x1xf32>
    %c0_325 = arith.constant 0 : index
    %c0_326 = arith.constant 0 : index
    %597 = vector.load %arg18[%c0_325, %c0_326] : memref<1x1xf32, #tpu.memory_space<vmem>>, vector<1x1xf32>
    %598 = arith.addf %596, %597 : vector<1x1xf32>
    %599 = vector.shape_cast %598 : vector<1x1xf32> to vector<1x1x1xf32>
    %c0_327 = arith.constant 0 : index
    %c0_328 = arith.constant 0 : index
    %c0_329 = arith.constant 0 : index
    %600 = vector.load %arg19[%c0_327, %c0_328, %c0_329] : memref<1x1x1xf32, #tpu.memory_space<vmem>>, vector<1x1x1xf32>
    tpu.vector_store %arg19[%c0_327, %c0_328, %c0_329], %599 {strides = array<i32>} : memref<1x1x1xf32, #tpu.memory_space<vmem>>, vector<1x1x1xf32>,
    return
  }
  func.func @transform_0(%arg0: i32) -> (i32, i32, i32) {
    %c0_i32 = arith.constant 0 : i32
    %c0_i32_0 = arith.constant 0 : i32
    %c0_i32_1 = arith.constant 0 : i32
    return %arg0, %c0_i32, %c0_i32_0 : i32, i32, i32
  }
  func.func @transform_1(%arg0: i32) -> (i32, i32) {
    %c0_i32 = arith.constant 0 : i32
    %c0_i32_0 = arith.constant 0 : i32
    %c0_i32_1 = arith.constant 0 : i32
    return %c0_i32, %c0_i32_0 : i32, i32
  }
  func.func @transform_2(%arg0: i32) -> (i32, i32) {
    %c0_i32 = arith.constant 0 : i32
    %c0_i32_0 = arith.constant 0 : i32
    %c0_i32_1 = arith.constant 0 : i32
    return %c0_i32, %c0_i32_0 : i32, i32
  }
  func.func @transform_3(%arg0: i32) -> (i32, i32) {
    %c0_i32 = arith.constant 0 : i32
    %c0_i32_0 = arith.constant 0 : i32
    %c0_i32_1 = arith.constant 0 : i32
    return %c0_i32, %c0_i32_0 : i32, i32
  }
  func.func @transform_4(%arg0: i32) -> (i32, i32, i32) {
    %c0_i32 = arith.constant 0 : i32
    %c0_i32_0 = arith.constant 0 : i32
    %c0_i32_1 = arith.constant 0 : i32
    %c0_i32_2 = arith.constant 0 : i32
    return %c0_i32, %c0_i32_0, %c0_i32_1 : i32, i32, i32
  }
  func.func @transform_5(%arg0: i32) -> (i32, i32, i32) {
    %c0_i32 = arith.constant 0 : i32
    %c0_i32_0 = arith.constant 0 : i32
    %c0_i32_1 = arith.constant 0 : i32
    %c0_i32_2 = arith.constant 0 : i32
    return %c0_i32, %c0_i32_0, %c0_i32_1 : i32, i32, i32
  }
  func.func @transform_6(%arg0: i32) -> (i32, i32, i32) {
    %c0_i32 = arith.constant 0 : i32
    %c0_i32_0 = arith.constant 0 : i32
    %c0_i32_1 = arith.constant 0 : i32
    %c0_i32_2 = arith.constant 0 : i32
    return %c0_i32, %c0_i32_0, %c0_i32_1 : i32, i32, i32
  }
  func.func @transform_7(%arg0: i32) -> (i32, i32) {
    %c0_i32 = arith.constant 0 : i32
    %c0_i32_0 = arith.constant 0 : i32
    %c0_i32_1 = arith.constant 0 : i32
    return %c0_i32, %c0_i32_0 : i32, i32
  }
  func.func @transform_8(%arg0: i32) -> (i32, i32) {
    %c0_i32 = arith.constant 0 : i32
    %c0_i32_0 = arith.constant 0 : i32
    %c0_i32_1 = arith.constant 0 : i32
    return %c0_i32, %c0_i32_0 : i32, i32
  }
  func.func @transform_9(%arg0: i32) -> (i32, i32) {
    %c0_i32 = arith.constant 0 : i32
    %c0_i32_0 = arith.constant 0 : i32
    %c0_i32_1 = arith.constant 0 : i32
    return %c0_i32, %c0_i32_0 : i32, i32
  }
  func.func @transform_10(%arg0: i32) -> (i32, i32) {
    %c0_i32 = arith.constant 0 : i32
    %c0_i32_0 = arith.constant 0 : i32
    %c0_i32_1 = arith.constant 0 : i32
    return %c0_i32, %c0_i32_0 : i32, i32
  }
  func.func @transform_11(%arg0: i32) -> (i32, i32) {
    %c0_i32 = arith.constant 0 : i32
    %c0_i32_0 = arith.constant 0 : i32
    %c0_i32_1 = arith.constant 0 : i32
    return %c0_i32, %c0_i32_0 : i32, i32
  }
  func.func @transform_12(%arg0: i32) -> (i32, i32) {
    %c0_i32 = arith.constant 0 : i32
    %c0_i32_0 = arith.constant 0 : i32
    %c0_i32_1 = arith.constant 0 : i32
    return %c0_i32, %c0_i32_0 : i32, i32
  }
  func.func @transform_13(%arg0: i32) -> (i32, i32) {
    %c0_i32 = arith.constant 0 : i32
    %c0_i32_0 = arith.constant 0 : i32
    %c0_i32_1 = arith.constant 0 : i32
    return %c0_i32, %c0_i32_0 : i32, i32
  }
  func.func @transform_14(%arg0: i32) -> (i32, i32) {
    %c0_i32 = arith.constant 0 : i32
    %c0_i32_0 = arith.constant 0 : i32
    %c0_i32_1 = arith.constant 0 : i32
    return %c0_i32, %c0_i32_0 : i32, i32
  }
  func.func @transform_15(%arg0: i32) -> (i32, i32) {
    %c0_i32 = arith.constant 0 : i32
    %c0_i32_0 = arith.constant 0 : i32
    %c0_i32_1 = arith.constant 0 : i32
    return %c0_i32, %c0_i32_0 : i32, i32
  }
  func.func @transform_16(%arg0: i32) -> (i32, i32) {
    %c0_i32 = arith.constant 0 : i32
    %c0_i32_0 = arith.constant 0 : i32
    %c0_i32_1 = arith.constant 0 : i32
    return %c0_i32, %c0_i32_0 : i32, i32
  }
  func.func @transform_17(%arg0: i32) -> (i32, i32) {
    %c0_i32 = arith.constant 0 : i32
    %c0_i32_0 = arith.constant 0 : i32
    %c0_i32_1 = arith.constant 0 : i32
    return %c0_i32, %c0_i32_0 : i32, i32
  }
  func.func @transform_18(%arg0: i32) -> (i32, i32, i32) {
    %c0_i32 = arith.constant 0 : i32
    %c0_i32_0 = arith.constant 0 : i32
    %c0_i32_1 = arith.constant 0 : i32
    return %arg0, %c0_i32, %c0_i32_0 : i32, i32, i32
  }
}

</mosaic_0001>

<bundles_post_ra>
// kernel: tpu_custom_call.1
= control target key start
LH: loop header
LB: loop body
LE: loop exit
PB: predicated region body
PF: predicated region fallthrough
CT: control target
= control target key end

     0   :  { %s8374_s29 = smov 0   ;;  %s9895_s0 = inlined_call_operand.vmem [shape: f32[2,8,1], index: 0, kind: input, shape index: {}]   ;;  %s9896_s1 = inlined_call_operand.vmem [shape: f32[8,128], index: 1, kind: input, shape index: {}]   ;;  %s9897_s2 = inlined_call_operand.vmem [shape: f32[1,128], index: 2, kind: input, shape index: {}]   ;;  %s9898_s3 = inlined_call_operand.vmem [shape: f32[1,128], index: 3, kind: input, shape index: {}]   ;;  %s9899_s4 = inlined_call_operand.vmem [shape: bf16[30,128,8], index: 4, kind: input, shape index: {}]   ;;  %s9900_s5 = inlined_call_operand.vmem [shape: f32[30,1,8], index: 5, kind: input, shape index: {}]   ;;  %s9901_s6 = inlined_call_operand.vmem [shape: bf16[10,8,128], index: 6, kind: input, shape index: {}]   ;;  %s9902_s7 = inlined_call_operand.vmem [shape: f32[1,128], index: 7, kind: input, shape index: {}]   ;;  %s9903_s8 = inlined_call_operand.vmem [shape: f32[1,128], index: 8, kind: input, shape index: {}]   ;;  %s9904_s9 = inlined_call_operand.vmem [shape: f32[1,128], index: 9, kind: input, shape index: {}]   ;;  %s9905_s10 = inlined_call_operand.vmem [shape: bf16[128,128], index: 10, kind: input, shape index: {}]   ;;  %s9906_s11 = inlined_call_operand.vmem [shape: f32[1,128], index: 11, kind: input, shape index: {}]   ;;  %s9907_s12 = inlined_call_operand.vmem [shape: bf16[128,128], index: 12, kind: input, shape index: {}]   ;;  %s9908_s13 = inlined_call_operand.vmem [shape: f32[1,128], index: 13, kind: input, shape index: {}]   ;;  %s9909_s14 = inlined_call_operand.vmem [shape: f32[1,128], index: 14, kind: input, shape index: {}]   ;;  %s9910_s15 = inlined_call_operand.vmem [shape: f32[1,128], index: 15, kind: input, shape index: {}]   ;;  %s9911_s16 = inlined_call_operand.vmem [shape: bf16[1,128], index: 16, kind: input, shape index: {}]   ;;  %s9912_s17 = inlined_call_operand.<no memory space> [shape: f32[1,1], index: 17, kind: input, shape index: {}]   ;;  %s9913_s18 = inlined_call_operand.vmem [shape: f32[2,1,1], index: 18, kind: output, shape index: {}]  }
   0x1   :  { %9914 = sst [smem:[#allocation3_spill]] %s9895_s0  ;;  %v23_v0 = vstv %s9912_s17 }
   0x2   :  { %9915 = sst [smem:[#allocation4_spill]] %s9896_s1  ;;  %24 = vst [vmem:[#allocation2] sm:$0x1] %v23_v0 }
   0x3   :  { %9916 = sst [smem:[#allocation5_spill]] %s9897_s2 }
   0x4 LB: > { %s5947_s30 = sadd.s32 4294967295, %s8270_s29   ;;  %p5951_p0 = scmp.ge.s32.totalorder %s8270_s29, 1  ;;  %s8270_s29 = sphi %s8374_s29, %s30_s29  }
   0x5   : > { %p513_p1 = scmp.lt.s32.totalorder %s8270_s29, 3 }
   0x7   : > { %p514_p2 = pnand %p5951_p0, %p513_p1 }
   0x8   : > { %p564_p3 = scmp.lt.s32.totalorder (!%p514_p2), %s5947_s30, 1  ;;  %v7964_v1 = vld [vmem:[%s9899_s4] sm:$0xff] (!%p514_p2)   ;;  %v8272_v2 = vmov (!%p514_p2), 0   ;;  %v8273_v3 = vmov (!%p514_p2), 0.0   ;;  %v7966_v5 = vld [vmem:[%s9899_s4 + $0x8] sm:$0xff] (!%p514_p2)   ;;  %s9917_s26 = sld [smem:[#allocation3_spill]] (!%p514_p2) }
   0x9   : > { %517 = sbr.rel (%p514_p2) target bundleno = 11000 (0x2af8), region = 92  ;;  %7963 = vset.pattern.permute.xlu0 (!%p514_p2), %v8272_v2  ;;  %7131 = vmatprep.subr.bf16.mxu0 (!%p514_p2), %v8273_v3  ;;  %v7965_v4 = vld [vmem:[%s9899_s4 + $0x280] sm:$0xff] (!%p514_p2)   ;;  %v7967_v6 = vld [vmem:[%s9899_s4 + $0x288] sm:$0xff] (!%p514_p2)   ;;  %v7968_v8 = vld [vmem:[%s9899_s4 + $0x10] sm:$0xff] (!%p514_p2)   ;;  %vm8274_vm0 = vmmov (!%p514_p2), 0   ;;  %s9919_s17 = sld [smem:[#allocation4_spill]] (!%p514_p2) }
   0xa   : > { %7132 = vmatpush3.bf16.msra.mxu0 (!%p514_p2), %v7964_v1  ;;  %7151 = vmatprep.subr.bf16.mxu1 (!%p514_p2), %v8273_v3  ;;  %v7969_v9 = vld [vmem:[%s9899_s4 + $0x290] sm:$0xff] (!%p514_p2)   ;;  %v7970_v10 = vld [vmem:[%s9899_s4 + $0x18] sm:$0xff] (!%p514_p2)   ;;  %v7972_v12 = vld [vmem:[%s9899_s4 + $0x20] sm:$0xff] (!%p514_p2)   ;;  %vm942_vm1 = vcmask (!%p514_p2), 64512   ;;  %vm1006_vm2 = vcmask (!%p514_p2), 1043456   ;;  %vm5892_vm4 = vcmask (!%p514_p2), 1040384  }
   0xb   : > { %7133 = vmatprep.subr.bf16.mxu0 (!%p514_p2), %v8273_v3  ;;  %7152 = vmatpush3.bf16.msra.mxu1 (!%p514_p2), %v7965_v4  ;;  %v7971_v11 = vld [vmem:[%s9899_s4 + $0x298] sm:$0xff] (!%p514_p2)   ;;  %v7973_v13 = vld [vmem:[%s9899_s4 + $0x2a0] sm:$0xff] (!%p514_p2)   ;;  %v7974_v14 = vld [vmem:[%s9899_s4 + $0x28] sm:$0xff] (!%p514_p2)   ;;  %vm5898_vm5 = vcmask (!%p514_p2), 0  }
   0xc   : > { %7153 = vmatprep.subr.bf16.mxu1 (!%p514_p2), %v8273_v3  ;;  %7147 = vmatprep.mubr.msk.bf16.mxu0 (!%p514_p2), %vm8274_vm0, %v8273_v3  ;;  %v7975_v15 = vld [vmem:[%s9899_s4 + $0x2a8] sm:$0xff] (!%p514_p2)   ;;  %v7976_v16 = vld [vmem:[%s9899_s4 + $0x30] sm:$0xff] (!%p514_p2)   ;;  %v7978_v18 = vld [vmem:[%s9899_s4 + $0x38] sm:$0xff] (!%p514_p2)  }
   0xd   : > { %7167 = vmatprep.mubr.msk.bf16.mxu1 (!%p514_p2), %vm8274_vm0, %v8273_v3  ;;  %v7977_v17 = vld [vmem:[%s9899_s4 + $0x2b0] sm:$0xff] (!%p514_p2)   ;;  %v7979_v19 = vld [vmem:[%s9899_s4 + $0x2b8] sm:$0xff] (!%p514_p2)   ;;  %v5954_v21 = vld [vmem:[%s9898_s3] ss:$0 sm:$0xff] (!%p514_p2) }
   0xe   : > { %7134 = vmatpush3.bf16.msra.mxu0 (!%p514_p2), %v7966_v5  ;;  %v7980_v26 = vld [vmem:[%s9899_s4 + $0x500] sm:$0xff] (!%p514_p2)   ;;  %v7981_v29 = vld [vmem:[%s9899_s4 + $0x508] sm:$0xff] (!%p514_p2)   ;;  %v7982_v30 = vld [vmem:[%s9899_s4 + $0x510] sm:$0xff] (!%p514_p2)  }
   0xf   : > { %7135 = vmatprep.subr.bf16.mxu0 (!%p514_p2), %v8273_v3  ;;  %7154 = vmatpush3.bf16.msra.mxu1 (!%p514_p2), %v7967_v6  ;;  %v594_v22 = vld [vmem:[%s9919_s17] sm:$0xff] (!%p514_p2)  ;;  %v7983_v31 = vld [vmem:[%s9899_s4 + $0x518] sm:$0xff] (!%p514_p2)   ;;  %v7985_v33 = vld [vmem:[%s9899_s4 + $0x528] sm:$0xff] (!%p514_p2)  }
  0x10   : > { %s9923_s30 = smov (!%p564_p3, %s5947_s30), 1  ;;  %7155 = vmatprep.subr.bf16.mxu1 %v8273_v3  ;;  %v7984_v32 = vld [vmem:[%s9899_s4 + $0x520] sm:$0xff]   ;;  %v7986_v34 = vld [vmem:[%s9899_s4 + $0x530] sm:$0xff]   ;;  %v7987_v35 = vld [vmem:[%s9899_s4 + $0x538] sm:$0xff]  }
  0x11   : > { %s5952_s22 = sshll.u32 %s9923_s30, 3  ;;  %v7988_v36 = vld [vmem:[%s9899_s4 + $0x2c0] sm:$0xff]   ;;  %v7989_v37 = vld [vmem:[%s9899_s4 + $0x2c8] sm:$0xff]   ;;  %v7990_v38 = vld [vmem:[%s9899_s4 + $0x2d0] sm:$0xff]   ;;  %s570_s2 = scalar_lea.vmem %s9913_s18, %s9923_s30 }
  0x12   : > { %s567_s27 = scalar_lea.vmem %s9917_s26, %s5952_s22  ;;  %7136 = vmatpush3.bf16.msra.mxu0 %v7968_v8  ;;  %s9918_s26 = sld [smem:[#allocation5_spill]]  ;;  %v7991_v39 = vld [vmem:[%s9899_s4 + $0x2d8] sm:$0xff]   ;;  %v7992_v40 = vld [vmem:[%s9899_s4 + $0x2e0] sm:$0xff]   ;;  %v7993_v41 = vld [vmem:[%s9899_s4 + $0x2e8] sm:$0xff]  }
  0x13   : > { %v572_v7 = vld [vmem:[%s567_s27] sm:$0xff]  ;;  %7137 = vmatprep.subr.bf16.mxu0 %v8273_v3  ;;  %7156 = vmatpush3.bf16.msra.mxu1 %v7969_v9  ;;  %v7994_v42 = vld [vmem:[%s9899_s4 + $0x2f0] sm:$0xff]   ;;  %v7995_v43 = vld [vmem:[%s9899_s4 + $0x2f8] sm:$0xff]  }
  0x14   : > { %576 = vperm.xlu0 %7963, %v572_v7   ;;  %7157 = vmatprep.subr.bf16.mxu1 %v8273_v3  ;;  %v5981_v44 = vld [vmem:[%s9900_s5 + $0xa] ss:$0 sm:$0xff]  ;;  %v5955_v55 = vld [vmem:[%s9900_s5] ss:$0 sm:$0xff]  ;;  %v6007_v59 = vld [vmem:[%s9900_s5 + $0x14] ss:$0 sm:$0xff] }
  0x15   : > { %v6061_v4 = vld [vmem:[%s9900_s5 + $0xb] ss:$0 sm:$0xff] }
  0x16   : > { %7138 = vmatpush3.bf16.msra.mxu0 %v7970_v10 }
  0x17   : > { %7139 = vmatprep.subr.bf16.mxu0 %v8273_v3  ;;  %7158 = vmatpush3.bf16.msra.mxu1 %v7971_v11 }
  0x18   : > { %7159 = vmatprep.subr.bf16.mxu1 %v8273_v3  ;;  %v5953_v20 = vld [vmem:[%s9918_s26] ss:$0 sm:$0xff] }
  0x1a   : > { %7140 = vmatpush3.bf16.msra.mxu0 %v7972_v12  ;;  %v597_v12 = vlaneseq }
  0x1b   : > { %7141 = vmatprep.subr.bf16.mxu0 %v8273_v3  ;;  %7160 = vmatpush3.bf16.msra.mxu1 %v7973_v13 }
  0x1c   : > { %7161 = vmatprep.subr.bf16.mxu1 %v8273_v3  ;;  %v8570_v13 = vshrl.u32 %v597_v12, 7 }
  0x1e   : > { %7142 = vmatpush3.bf16.msra.mxu0 %v7974_v14  ;;  %v600_v14 = vand.u32 127, %v597_v12 }
  0x1f   : > { %7143 = vmatprep.subr.bf16.mxu0 %v8273_v3  ;;  %7162 = vmatpush3.bf16.msra.mxu1 %v7975_v15 }
  0x20   : > { %7163 = vmatprep.subr.bf16.mxu1 %v8273_v3  ;;  %vm8573_vm3 = vcmp.le.s32.totalorder %v600_v14, %v8570_v13 }
  0x22   : > { %7144 = vmatpush3.bf16.msra.mxu0 %v7976_v16 }
  0x23   : > { %7145 = vmatprep.subr.bf16.mxu0 %v8273_v3  ;;  %7164 = vmatpush3.bf16.msra.mxu1 %v7977_v17 }
  0x24   : > { %7165 = vmatprep.subr.bf16.mxu1 %v8273_v3 }
  0x26   : > { %7146 = vmatpush3.bf16.msra.mxu0 %v7978_v18 }
  0x27   : > { %7171 = vmatprep.subr.bf16.mxu0 %v8273_v3  ;;  %7166 = vmatpush3.bf16.msra.mxu1 %v7979_v19 }
  0x28   : > { %7191 = vmatprep.subr.bf16.mxu1 %v8273_v3 }
  0x93   : > { %v577_v23 = vpop.permute.xlu0 %576 }
  0x94   : > { %v585_v24 = vmul.f32 %v5953_v20, %v577_v23 }
  0x96   : > { %v593_v25 = vadd.f32 %v5954_v21, %v585_v24 }
  0x98   : > { %v8470_v27 = vadd.f32 %v594_v22, %v593_v25 }
  0x9a   : > { %v8474_v28 = vpack.c.bf16 %v8470_v27, %v8470_v27 }
  0x9c   : > { %7148 = vmatmul.mubr.bf16.vlgmr.msra.gmra.mrb[0].mxu0 %v8474_v28  ;;  %7168 = vmatmul.mubr.bf16.vlgmr.msra.gmra.mrb[0].mxu1 %v8474_v28 }
  0x9d   : > { %7172 = vmatpush3.bf16.msra.mxu0 %v7980_v26  ;;  %7187 = vmatprep.mubr.msk.bf16.mxu0 %vm8274_vm0, %v8273_v3 }
  0x9e   : > { %7173 = vmatprep.subr.bf16.mxu0 %v8273_v3  ;;  %7193 = vmatprep.mubr.msk.bf16.mxu1 %vm8274_vm0, %v8273_v3 }
  0xa1   : > { %7174 = vmatpush3.bf16.msra.mxu0 %v7981_v29 }
  0xa2   : > { %7175 = vmatprep.subr.bf16.mxu0 %v8273_v3 }
  0xa5   : > { %7176 = vmatpush3.bf16.msra.mxu0 %v7982_v30 }
  0xa6   : > { %7177 = vmatprep.subr.bf16.mxu0 %v8273_v3 }
  0xa9   : > { %7178 = vmatpush3.bf16.msra.mxu0 %v7983_v31 }
  0xaa   : > { %7179 = vmatprep.subr.bf16.mxu0 %v8273_v3 }
  0xad   : > { %7180 = vmatpush3.bf16.msra.mxu0 %v7984_v32 }
  0xae   : > { %7181 = vmatprep.subr.bf16.mxu0 %v8273_v3 }
  0xb1   : > { %7182 = vmatpush3.bf16.msra.mxu0 %v7985_v33  ;;  %v7996_v33 = vld [vmem:[%s9899_s4 + $0x40] sm:$0xff]  }
  0xb2   : > { %7183 = vmatprep.subr.bf16.mxu0 %v8273_v3 }
  0xb5   : > { %7184 = vmatpush3.bf16.msra.mxu0 %v7986_v34 }
  0xb6   : > { %7185 = vmatprep.subr.bf16.mxu0 %v8273_v3 }
  0xb9   : > { %7186 = vmatpush3.bf16.msra.mxu0 %v7987_v35  ;;  %v7997_v35 = vld [vmem:[%s9899_s4 + $0x48] sm:$0xff]  }
  0xba   : > { %7223 = vmatprep.subr.bf16.mxu0 %v8273_v3 }
  0xbc   : > { %7188 = vmatmul.mubr.bf16.vlgmr.msra.gmra.mrb[4].mxu0 %v8474_v28 }
  0xbd   : > { %7224 = vmatpush3.bf16.msra.mxu0 %v7988_v36  ;;  %7239 = vmatprep.mubr.msk.bf16.mxu0 %vm8274_vm0, %v8273_v3  ;;  %v7998_v36 = vld [vmem:[%s9899_s4 + $0x50] sm:$0xff]  }
  0xbe   : > { %7225 = vmatprep.subr.bf16.mxu0 %v8273_v3 }
  0xc1   : > { %7226 = vmatpush3.bf16.msra.mxu0 %v7989_v37  ;;  %v7999_v37 = vld [vmem:[%s9899_s4 + $0x58] sm:$0xff]  }
  0xc2   : > { %7227 = vmatprep.subr.bf16.mxu0 %v8273_v3 }
  0xc5   : > { %7228 = vmatpush3.bf16.msra.mxu0 %v7990_v38  ;;  %v8000_v38 = vld [vmem:[%s9899_s4 + $0x60] sm:$0xff]  }
  0xc6   : > { %7229 = vmatprep.subr.bf16.mxu0 %v8273_v3 }
  0xc9   : > { %7230 = vmatpush3.bf16.msra.mxu0 %v7991_v39  ;;  %v8001_v39 = vld [vmem:[%s9899_s4 + $0x68] sm:$0xff]  }
  0xca   : > { %7231 = vmatprep.subr.bf16.mxu0 %v8273_v3 }
  0xcd   : > { %7232 = vmatpush3.bf16.msra.mxu0 %v7992_v40  ;;  %v8002_v40 = vld [vmem:[%s9899_s4 + $0x70] sm:$0xff]  }
  0xce   : > { %7233 = vmatprep.subr.bf16.mxu0 %v8273_v3 }
  0xd1   : > { %7234 = vmatpush3.bf16.msra.mxu0 %v7993_v41  ;;  %v8003_v41 = vld [vmem:[%s9899_s4 + $0x78] sm:$0xff]  }
  0xd2   : > { %7235 = vmatprep.subr.bf16.mxu0 %v8273_v3 }
  0xd5   : > { %7236 = vmatpush3.bf16.msra.mxu0 %v7994_v42  ;;  %v8004_v42 = vld [vmem:[%s9899_s4 + $0x540] sm:$0xff]  }
  0xd6   : > { %7237 = vmatprep.subr.bf16.mxu0 %v8273_v3 }
  0xd9   : > { %7238 = vmatpush3.bf16.msra.mxu0 %v7995_v43  ;;  %v8005_v43 = vld [vmem:[%s9899_s4 + $0x548] sm:$0xff]  }
  0xda   : > { %7263 = vmatprep.subr.bf16.mxu0 %v8273_v3 }
  0xdc   : > { %7240 = vmatmul.mubr.bf16.vlgmr.msra.gmra.mrb[8].mxu0 %v8474_v28 }
  0xdd   : > { %7265 = vmatprep.mubr.msk.bf16.mxu0 %vm8274_vm0, %v8273_v3 }
 0x16f   : > { %v707_v45 = vpop.f32.mrb[0].mxu0  ;;  %v820_v46 = vpop.f32.mrb[0].mxu1 }
 0x170   : > { %v821_v47 = vadd.f32 %v5981_v44, %v820_v46  ;;  %v7149_v48 = vpop.f32.mrb[1].mxu0  ;;  %v7169_v49 = vpop.f32.mrb[1].mxu1  ;;  %v708_v57 = vadd.f32 %v5955_v55, %v707_v45  ;;  %v8006_v44 = vld [vmem:[%s9899_s4 + $0x550] sm:$0xff]   ;;  %v8007_v45 = vld [vmem:[%s9899_s4 + $0x558] sm:$0xff]   ;;  %v8008_v46 = vld [vmem:[%s9899_s4 + $0x560] sm:$0xff]  }
 0x171   : > { %v710_v50 = vpop.f32.mrb[2].mxu0  ;;  %v823_v51 = vpop.f32.mrb[2].mxu1  ;;  %v8010_v48 = vld [vmem:[%s9899_s4 + $0x570] sm:$0xff]   ;;  %v8011_v49 = vld [vmem:[%s9899_s4 + $0x578] sm:$0xff]  }
 0x172   : > { %v940_v52 = vpack.c.bf16 %v821_v47, %v821_v47  ;;  %v7150_v53 = vpop.f32.mrb[3].mxu0  ;;  %v7170_v54 = vpop.f32.mrb[3].mxu1  ;;  %v939_v58 = vpack.c.bf16 %v708_v57, %v708_v57  ;;  %v8009_v47 = vld [vmem:[%s9899_s4 + $0x568] sm:$0xff]   ;;  %v1051_v50 = vld [vmem:[%s9901_s6] sm:$0xf] }
 0x173   : > { %v1553_v51 = vsel %vm1006_vm2, %v1051_v50, 0  ;;  %v8012_v53 = vld [vmem:[%s9899_s4 + $0x300] sm:$0xff]  }
 0x174   : > { %v947_v56 = vsel %vm942_vm1, %v940_v52, 0 }
 0x175   : > { %7192 = vmatpush3.bf16.xpose.msra.mxu1 %v947_v56 }
 0x176   : > { %7197 = vmatprep.subr.bf16.mxu1 %v8273_v3 }
 0x17c   : > { %7194 = vmatmul.mubr.msk.bf16.vlgmr.msra.gmra.mrb[4].mxu1 %vm942_vm1, %v939_v58  ;;  %v8013_v58 = vld [vmem:[%s9899_s4 + $0x308] sm:$0xff]  }
 0x17d   : > { %7199 = vmatprep.mubr.msk.bf16.mxu1 %vm8274_vm0, %v8273_v3 }
 0x18f   : > { %v933_v60 = vpop.f32.mrb[4].mxu0 }
 0x190   : > { %v934_v61 = vadd.f32 %v6007_v59, %v933_v60  ;;  %v7189_v62 = vpop.f32.mrb[5].mxu0  ;;  %v8014_v59 = vld [vmem:[%s9899_s4 + $0x310] sm:$0xff]   ;;  %v8015_v60 = vld [vmem:[%s9899_s4 + $0x318] sm:$0xff]  }
 0x191   : > { %v936_v63 = vpop.f32.mrb[6].mxu0  ;;  %v8017_v62 = vld [vmem:[%s9899_s4 + $0x328] sm:$0xff]  }
 0x192   : > { %v941_v0 = vpack.c.bf16 %v934_v61, %v934_v61  ;;  %v7190_v1 = vpop.f32.mrb[7].mxu0  ;;  %v8016_v61 = vld [vmem:[%s9899_s4 + $0x320] sm:$0xff]   ;;  %v8018_v63 = vld [vmem:[%s9899_s4 + $0x330] sm:$0xff]  }
 0x193   : > { %v6035_v1 = vld [vmem:[%s9900_s5 + $0x1] ss:$0 sm:$0xff] }
 0x194   : > { %v1008_v2 = vsel %vm1006_vm2, %v941_v0, 0  ;;  %v8019_v0 = vld [vmem:[%s9899_s4 + $0x338] sm:$0xff]  }
 0x195   : > { %7198 = vmatpush3.bf16.msra.mxu1 %v1008_v2 }
 0x196   : > { %7203 = vmatprep.subr.bf16.mxu1 %v8273_v3 }
 0x1af   : > { %v1272_v5 = vpop.f32.mrb[8].mxu0 }
 0x1b0   : > { %v1273_v6 = vadd.f32 %v6061_v4, %v1272_v5  ;;  %v7241_v7 = vpop.f32.mrb[9].mxu0 }
 0x1b1   : > { %v1275_v8 = vpop.f32.mrb[10].mxu0 }
 0x1b2   : > { %v1392_v9 = vpack.c.bf16 %v1273_v6, %v1273_v6  ;;  %v7242_v10 = vpop.f32.mrb[11].mxu0 }
 0x1b4   : > { %v1398_v11 = vsel %vm942_vm1, %v1392_v9, 0  ;;  %v6087_v9 = vld [vmem:[%s9900_s5 + $0x15] ss:$0 sm:$0xff] }
 0x1b5   : > { %7264 = vmatpush3.bf16.xpose.msra.mxu0 %v1398_v11 }
 0x1b6   : > { %7269 = vmatprep.subr.bf16.mxu0 %v8273_v3 }
 0x24f   : > { %v983_v15 = vpop.f32.mrb[4].mxu1 }
 0x250   : > { %v989_v17 = vmul.f32 0.35355338, %v983_v15  ;;  %v7195_v18 = vpop.f32.mrb[5].mxu1 }
 0x251   : > { %v986_v19 = vpop.f32.mrb[6].mxu1 }
 0x252   : > { %v7196_v20 = vpop.f32.mrb[7].mxu1  ;;  %v990_v21 = vsel %vm8573_vm3, %v989_v17, -1e+30 }
 0x253   : > { %v991_v22 = vsel %vm942_vm1, %v990_v21, -inf }
 0x254   : > { %992 = vmax.xlane.f32.xlu0 %v991_v22 }
 0x2e1   : > { %v993_v23 = vpop.xlane.xlu0 %992 }
 0x2e2   : > { %v994_v24 = vsub.f32 %v990_v21, %v993_v23  ;;  %v6144_v23 = vld [vmem:[%s9900_s5 + $0xc] ss:$0 sm:$0xff] }
 0x2e4   : > { %v995_v25 = vmul.f32 1.442695, %v994_v24 }
 0x2e6   : > { %8220 = vpow2.f32 %v995_v25 }
 0x2f0   : > { %v8221_v26 = vpop.eup %8220 }
 0x2f1   : > { %v997_v29 = vsel %vm942_vm1, %v8221_v26, 0.0 }
 0x2f2   : > { %998 = vadd.xlane.f32.xlu1 %v997_v29 }
 0x37f   : > { %v999_v30 = vpop.xlane.xlu1 %998 }
 0x380   : > { %8222 = vrcp.f32 %v999_v30 }
 0x38a   : > { %v8223_v31 = vpop.eup %8222 }
 0x38b   : > { %v1001_v32 = vmul.f32 %v8223_v31, %v8221_v26 }
 0x38d   : > { %v1002_v34 = vpack.c.bf16 %v1001_v32, %v1001_v32 }
 0x38f   : > { %7200 = vmatmul.mubr.msk.bf16.vlgmr.msra.gmra.mrb[8].mxu1 %vm942_vm1, %v1002_v34 }
 0x390   : > { %7204 = vmatpush3.bf16.msra.mxu1 %v7996_v33  ;;  %7219 = vmatprep.mubr.msk.bf16.mxu1 %vm8274_vm0, %v8273_v3 }
 0x391   : > { %7205 = vmatprep.subr.bf16.mxu1 %v8273_v3 }
 0x394   : > { %7206 = vmatpush3.bf16.msra.mxu1 %v7997_v35 }
 0x395   : > { %7207 = vmatprep.subr.bf16.mxu1 %v8273_v3 }
 0x398   : > { %7208 = vmatpush3.bf16.msra.mxu1 %v7998_v36 }
 0x399   : > { %7209 = vmatprep.subr.bf16.mxu1 %v8273_v3 }
 0x39c   : > { %7210 = vmatpush3.bf16.msra.mxu1 %v7999_v37 }
 0x39d   : > { %7211 = vmatprep.subr.bf16.mxu1 %v8273_v3 }
 0x3a0   : > { %7212 = vmatpush3.bf16.msra.mxu1 %v8000_v38 }
 0x3a1   : > { %7213 = vmatprep.subr.bf16.mxu1 %v8273_v3 }
 0x3a4   : > { %7214 = vmatpush3.bf16.msra.mxu1 %v8001_v39 }
 0x3a5   : > { %7215 = vmatprep.subr.bf16.mxu1 %v8273_v3 }
 0x3a8   : > { %7216 = vmatpush3.bf16.msra.mxu1 %v8002_v40 }
 0x3a9   : > { %7217 = vmatprep.subr.bf16.mxu1 %v8273_v3 }
 0x3ac   : > { %7218 = vmatpush3.bf16.msra.mxu1 %v8003_v41 }
 0x3ad   : > { %7243 = vmatprep.subr.bf16.mxu1 %v8273_v3 }
 0x3af   : > { %7220 = vmatmul.mubr.bf16.vlgmr.msra.gmra.mrb[12].mxu1 %v8474_v28 }
 0x3b0   : > { %7244 = vmatpush3.bf16.msra.mxu1 %v8004_v42  ;;  %7259 = vmatprep.mubr.msk.bf16.mxu1 %vm8274_vm0, %v8273_v3 }
 0x3b1   : > { %7245 = vmatprep.subr.bf16.mxu1 %v8273_v3 }
 0x3b4   : > { %7246 = vmatpush3.bf16.msra.mxu1 %v8005_v43 }
 0x3b5   : > { %7247 = vmatprep.subr.bf16.mxu1 %v8273_v3 }
 0x3b8   : > { %7248 = vmatpush3.bf16.msra.mxu1 %v8006_v44 }
 0x3b9   : > { %7249 = vmatprep.subr.bf16.mxu1 %v8273_v3 }
 0x3bc   : > { %7250 = vmatpush3.bf16.msra.mxu1 %v8007_v45 }
 0x3bd   : > { %7251 = vmatprep.subr.bf16.mxu1 %v8273_v3 }
 0x3c0   : > { %7252 = vmatpush3.bf16.msra.mxu1 %v8008_v46 }
 0x3c1   : > { %7253 = vmatprep.subr.bf16.mxu1 %v8273_v3 }
 0x3c4   : > { %7254 = vmatpush3.bf16.msra.mxu1 %v8009_v47  ;;  %v6098_v47 = vld [vmem:[%s9901_s6 + $0x4] sm:$0xf] }
 0x3c5   : > { %7255 = vmatprep.subr.bf16.mxu1 %v8273_v3  ;;  %v1507_v50 = vsel %vm1006_vm2, %v6098_v47, 0 }
 0x3c8   : > { %7256 = vmatpush3.bf16.msra.mxu1 %v8010_v48 }
 0x3c9   : > { %7257 = vmatprep.subr.bf16.mxu1 %v8273_v3 }
 0x3cc   : > { %7258 = vmatpush3.bf16.msra.mxu1 %v8011_v49 }
 0x3cd   : > { %7281 = vmatprep.subr.bf16.mxu1 %v8273_v3 }
 0x3cf   : > { %7260 = vmatmul.mubr.bf16.vlgmr.msra.gmra.mrb[16].mxu1 %v8474_v28 }
 0x3d0   : > { %7282 = vmatpush3.bf16.msra.mxu1 %v1553_v51  ;;  %7283 = vmatprep.mubr.msk.bf16.mxu1 %vm8274_vm0, %v8273_v3 }
 0x3d1   : > { %7307 = vmatprep.subr.bf16.mxu1 %v8273_v3 }
 0x462   : > { %v1044_v52 = vpop.f32.mrb[8].mxu1 }
 0x463   : > { %v1050_v54 = vpack.c.bf16 %v1044_v52, %v1044_v52  ;;  %v7201_v55 = vpop.f32.mrb[9].mxu1  ;;  %v8020_v52 = vld [vmem:[%s9899_s4 + $0x80] sm:$0xff]  }
 0x464   : > { %v1047_v56 = vpop.f32.mrb[10].mxu1 }
 0x465   : > { %v7202_v57 = vpop.f32.mrb[11].mxu1  ;;  %7284 = vmatmul.mubr.msk.bf16.vlgmr.msra.gmra.mrb[20].mxu1 %vm942_vm1, %v1050_v54 }
 0x466   : > { %7308 = vmatpush3.bf16.msra.mxu1 %v8012_v53  ;;  %7323 = vmatprep.mubr.msk.bf16.mxu1 %vm8274_vm0, %v8273_v3  ;;  %v8021_v57 = vld [vmem:[%s9899_s4 + $0x88] sm:$0xff]  }
 0x467   : > { %7309 = vmatprep.subr.bf16.mxu1 %v8273_v3 }
 0x46a   : > { %7310 = vmatpush3.bf16.msra.mxu1 %v8013_v58  ;;  %v8022_v58 = vld [vmem:[%s9899_s4 + $0x90] sm:$0xff]  }
 0x46b   : > { %7311 = vmatprep.subr.bf16.mxu1 %v8273_v3 }
 0x46e   : > { %7312 = vmatpush3.bf16.msra.mxu1 %v8014_v59  ;;  %v8023_v59 = vld [vmem:[%s9899_s4 + $0x98] sm:$0xff]  }
 0x46f   : > { %7313 = vmatprep.subr.bf16.mxu1 %v8273_v3 }
 0x472   : > { %7314 = vmatpush3.bf16.msra.mxu1 %v8015_v60  ;;  %v8024_v60 = vld [vmem:[%s9899_s4 + $0xa0] sm:$0xff]  }
 0x473   : > { %7315 = vmatprep.subr.bf16.mxu1 %v8273_v3 }
 0x476   : > { %7316 = vmatpush3.bf16.msra.mxu1 %v8016_v61  ;;  %v8025_v61 = vld [vmem:[%s9899_s4 + $0xa8] sm:$0xff]  }
 0x477   : > { %7317 = vmatprep.subr.bf16.mxu1 %v8273_v3 }
 0x47a   : > { %7318 = vmatpush3.bf16.msra.mxu1 %v8017_v62  ;;  %v8026_v62 = vld [vmem:[%s9899_s4 + $0xb0] sm:$0xff]  }
 0x47b   : > { %7319 = vmatprep.subr.bf16.mxu1 %v8273_v3 }
 0x47e   : > { %7320 = vmatpush3.bf16.msra.mxu1 %v8018_v63  ;;  %v8027_v63 = vld [vmem:[%s9899_s4 + $0xb8] sm:$0xff]  }
 0x47f   : > { %7321 = vmatprep.subr.bf16.mxu1 %v8273_v3 }
 0x482   : > { %v1159_v2 = vpop.f32.mrb[12].mxu1  ;;  %7322 = vmatpush3.bf16.msra.mxu1 %v8019_v0  ;;  %v8028_v0 = vld [vmem:[%s9899_s4 + $0x580] sm:$0xff]  }
 0x483   : > { %v1160_v4 = vadd.f32 %v6035_v1, %v1159_v2  ;;  %v7221_v5 = vpop.f32.mrb[13].mxu1  ;;  %7347 = vmatprep.subr.bf16.mxu1 %v8273_v3  ;;  %v8029_v1 = vld [vmem:[%s9899_s4 + $0x588] sm:$0xff]   ;;  %v8030_v2 = vld [vmem:[%s9899_s4 + $0x590] sm:$0xff]  }
 0x484   : > { %v1162_v6 = vpop.f32.mrb[14].mxu1  ;;  %v8032_v5 = vld [vmem:[%s9899_s4 + $0x5a0] sm:$0xff]  }
 0x485   : > { %v1391_v7 = vpack.c.bf16 %v1160_v4, %v1160_v4  ;;  %v7222_v8 = vpop.f32.mrb[15].mxu1  ;;  %7324 = vmatmul.mubr.bf16.vlgmr.msra.gmra.mrb[24].mxu1 %v8474_v28  ;;  %v8031_v4 = vld [vmem:[%s9899_s4 + $0x598] sm:$0xff]   ;;  %v8033_v6 = vld [vmem:[%s9899_s4 + $0x5a8] sm:$0xff]  }
 0x486   : > { %7349 = vmatprep.mubr.msk.bf16.mxu1 %vm8274_vm0, %v8273_v3  ;;  %v8035_v8 = vld [vmem:[%s9899_s4 + $0x5b8] sm:$0xff]  }
 0x487   : > { %7266 = vmatmul.mubr.msk.bf16.vlgmr.msra.gmra.mrb[12].mxu0 %vm942_vm1, %v1391_v7  ;;  %v8034_v7 = vld [vmem:[%s9899_s4 + $0x5b0] sm:$0xff]  }
 0x488   : > { %7271 = vmatprep.mubr.msk.bf16.mxu0 %vm8274_vm0, %v8273_v3 }
 0x4a2   : > { %v1385_v10 = vpop.f32.mrb[16].mxu1 }
 0x4a3   : > { %v1386_v11 = vadd.f32 %v6087_v9, %v1385_v10  ;;  %v7261_v12 = vpop.f32.mrb[17].mxu1  ;;  %v8036_v9 = vld [vmem:[%s9899_s4 + $0x340] sm:$0xff]   ;;  %v8037_v10 = vld [vmem:[%s9899_s4 + $0x348] sm:$0xff]  }
 0x4a4   : > { %v1388_v14 = vpop.f32.mrb[18].mxu1  ;;  %v8039_v12 = vld [vmem:[%s9899_s4 + $0x358] sm:$0xff]  }
 0x4a5   : > { %v1393_v15 = vpack.c.bf16 %v1386_v11, %v1386_v11  ;;  %v7262_v17 = vpop.f32.mrb[19].mxu1  ;;  %v8038_v11 = vld [vmem:[%s9899_s4 + $0x350] sm:$0xff]   ;;  %v8040_v14 = vld [vmem:[%s9899_s4 + $0x360] sm:$0xff]  }
 0x4a6   : > { %v8042_v17 = vld [vmem:[%s9899_s4 + $0x370] sm:$0xff]  }
 0x4a7   : > { %v1458_v18 = vsel %vm1006_vm2, %v1393_v15, 0  ;;  %v8041_v15 = vld [vmem:[%s9899_s4 + $0x368] sm:$0xff]  }
 0x4a8   : > { %7270 = vmatpush3.bf16.msra.mxu0 %v1458_v18  ;;  %v8043_v18 = vld [vmem:[%s9899_s4 + $0x378] sm:$0xff]  }
 0x4a9   : > { %7275 = vmatprep.subr.bf16.mxu0 %v8273_v3 }
 0x538   : > { %v8708_v19 = vpop.f32.mrb[20].mxu1 }
 0x539   : > { %v7285_v20 = vpop.f32.mrb[21].mxu1 }
 0x53a   : > { %v1592_v21 = vpop.f32.mrb[22].mxu1 }
 0x53b   : > { %v7286_v22 = vpop.f32.mrb[23].mxu1 }
 0x558   : > { %v1815_v24 = vpop.f32.mrb[24].mxu1 }
 0x559   : > { %v1816_v25 = vadd.f32 %v6144_v23, %v1815_v24  ;;  %v7325_v26 = vpop.f32.mrb[25].mxu1 }
 0x55a   : > { %v1434_v29 = vpop.f32.mrb[12].mxu0  ;;  %v1818_v30 = vpop.f32.mrb[26].mxu1 }
 0x55b   : > { %v1935_v31 = vpack.c.bf16 %v1816_v25, %v1816_v25  ;;  %v1440_v32 = vmul.f32 0.35355338, %v1434_v29  ;;  %v7267_v33 = vpop.f32.mrb[13].mxu0  ;;  %v7326_v34 = vpop.f32.mrb[27].mxu1  ;;  %v6118_v25 = vld [vmem:[%s9900_s5 + $0x2] ss:$0 sm:$0xff] }
 0x55c   : > { %v1437_v35 = vpop.f32.mrb[14].mxu0 }
 0x55d   : > { %v1941_v36 = vsel %vm942_vm1, %v1935_v31, 0  ;;  %v7268_v37 = vpop.f32.mrb[15].mxu0  ;;  %v1441_v38 = vsel %vm8573_vm3, %v1440_v32, -1e+30 }
 0x55e   : > { %7348 = vmatpush3.bf16.xpose.msra.mxu1 %v1941_v36  ;;  %v1442_v39 = vsel %vm942_vm1, %v1441_v38, -inf }
 0x55f   : > { %1443 = vmax.xlane.f32.xlu1 %v1442_v39  ;;  %7353 = vmatprep.subr.bf16.mxu1 %v8273_v3 }
 0x5ec   : > { %v1444_v40 = vpop.xlane.xlu1 %1443 }
 0x5ed   : > { %v1445_v41 = vsub.f32 %v1441_v38, %v1444_v40 }
 0x5ef   : > { %v1446_v42 = vmul.f32 1.442695, %v1445_v41  ;;  %v6226_v41 = vld [vmem:[%s9900_s5 + $0xd] ss:$0 sm:$0xff] }
 0x5f1   : > { %8224 = vpow2.f32 %v1446_v42 }
 0x5fb   : > { %v8225_v43 = vpop.eup %8224 }
 0x5fc   : > { %v1448_v44 = vsel %vm942_vm1, %v8225_v43, 0.0 }
 0x5fd   : > { %1449 = vadd.xlane.f32.xlu1 %v1448_v44 }
 0x68a   : > { %v1450_v45 = vpop.xlane.xlu1 %1449 }
 0x68b   : > { %8226 = vrcp.f32 %v1450_v45 }
 0x695   : > { %v8227_v46 = vpop.eup %8226 }
 0x696   : > { %v1452_v48 = vmul.f32 %v8227_v46, %v8225_v43 }
 0x698   : > { %v1453_v49 = vpack.c.bf16 %v1452_v48, %v1452_v48 }
 0x69a   : > { %7272 = vmatmul.mubr.msk.bf16.vlgmr.msra.gmra.mrb[16].mxu0 %vm942_vm1, %v1453_v49 }
 0x69b   : > { %7276 = vmatpush3.bf16.msra.mxu0 %v1507_v50  ;;  %7277 = vmatprep.mubr.msk.bf16.mxu0 %vm8274_vm0, %v8273_v3 }
 0x69c   : > { %7287 = vmatprep.subr.bf16.mxu0 %v8273_v3 }
 0x76d   : > { %v1494_v51 = vpop.f32.mrb[16].mxu0 }
 0x76e   : > { %v1500_v53 = vpack.c.bf16 %v1494_v51, %v1494_v51  ;;  %v7273_v54 = vpop.f32.mrb[17].mxu0 }
 0x76f   : > { %v1497_v55 = vpop.f32.mrb[18].mxu0 }
 0x770   : > { %v7274_v56 = vpop.f32.mrb[19].mxu0  ;;  %7278 = vmatmul.mubr.msk.bf16.vlgmr.msra.gmra.mrb[20].mxu0 %vm942_vm1, %v1500_v53 }
 0x771   : > { %7288 = vmatpush3.bf16.msra.mxu0 %v8020_v52  ;;  %7303 = vmatprep.mubr.msk.bf16.mxu0 %vm8274_vm0, %v8273_v3 }
 0x772   : > { %7289 = vmatprep.subr.bf16.mxu0 %v8273_v3 }
 0x775   : > { %7290 = vmatpush3.bf16.msra.mxu0 %v8021_v57 }
 0x776   : > { %7291 = vmatprep.subr.bf16.mxu0 %v8273_v3 }
 0x779   : > { %7292 = vmatpush3.bf16.msra.mxu0 %v8022_v58 }
 0x77a   : > { %7293 = vmatprep.subr.bf16.mxu0 %v8273_v3 }
 0x77d   : > { %7294 = vmatpush3.bf16.msra.mxu0 %v8023_v59 }
 0x77e   : > { %7295 = vmatprep.subr.bf16.mxu0 %v8273_v3 }
 0x781   : > { %7296 = vmatpush3.bf16.msra.mxu0 %v8024_v60 }
 0x782   : > { %7297 = vmatprep.subr.bf16.mxu0 %v8273_v3 }
 0x785   : > { %7298 = vmatpush3.bf16.msra.mxu0 %v8025_v61 }
 0x786   : > { %7299 = vmatprep.subr.bf16.mxu0 %v8273_v3 }
 0x789   : > { %7300 = vmatpush3.bf16.msra.mxu0 %v8026_v62 }
 0x78a   : > { %7301 = vmatprep.subr.bf16.mxu0 %v8273_v3 }
 0x78d   : > { %7302 = vmatpush3.bf16.msra.mxu0 %v8027_v63  ;;  %v6181_v63 = vld [vmem:[%s9901_s6 + $0x8] sm:$0xf] }
 0x78e   : > { %7327 = vmatprep.subr.bf16.mxu0 %v8273_v3 }
 0x790   : > { %7304 = vmatmul.mubr.bf16.vlgmr.msra.gmra.mrb[24].mxu0 %v8474_v28 }
 0x791   : > { %7328 = vmatpush3.bf16.msra.mxu0 %v8028_v0  ;;  %7343 = vmatprep.mubr.msk.bf16.mxu0 %vm8274_vm0, %v8273_v3 }
 0x792   : > { %7329 = vmatprep.subr.bf16.mxu0 %v8273_v3 }
 0x795   : > { %7330 = vmatpush3.bf16.msra.mxu0 %v8029_v1 }
 0x796   : > { %7331 = vmatprep.subr.bf16.mxu0 %v8273_v3 }
 0x799   : > { %7332 = vmatpush3.bf16.msra.mxu0 %v8030_v2  ;;  %v2050_v2 = vsel %vm1006_vm2, %v6181_v63, 0 }
 0x79a   : > { %7333 = vmatprep.subr.bf16.mxu0 %v8273_v3 }
 0x79d   : > { %7334 = vmatpush3.bf16.msra.mxu0 %v8031_v4 }
 0x79e   : > { %7335 = vmatprep.subr.bf16.mxu0 %v8273_v3 }
 0x7a1   : > { %7336 = vmatpush3.bf16.msra.mxu0 %v8032_v5  ;;  %v8044_v5 = vld [vmem:[%s9899_s4 + $0xc0] sm:$0xff]  }
 0x7a2   : > { %7337 = vmatprep.subr.bf16.mxu0 %v8273_v3 }
 0x7a5   : > { %7338 = vmatpush3.bf16.msra.mxu0 %v8033_v6 }
 0x7a6   : > { %7339 = vmatprep.subr.bf16.mxu0 %v8273_v3 }
 0x7a9   : > { %7340 = vmatpush3.bf16.msra.mxu0 %v8034_v7 }
 0x7aa   : > { %7341 = vmatprep.subr.bf16.mxu0 %v8273_v3 }
 0x7ad   : > { %7342 = vmatpush3.bf16.msra.mxu0 %v8035_v8 }
 0x7ae   : > { %7385 = vmatprep.subr.bf16.mxu0 %v8273_v3 }
 0x7b0   : > { %7344 = vmatmul.mubr.bf16.vlgmr.msra.gmra.mrb[28].mxu0 %v8474_v28 }
 0x7b1   : > { %7386 = vmatpush3.bf16.msra.mxu0 %v8036_v9  ;;  %7401 = vmatprep.mubr.msk.bf16.mxu0 %vm8274_vm0, %v8273_v3 }
 0x7b2   : > { %7387 = vmatprep.subr.bf16.mxu0 %v8273_v3 }
 0x7b5   : > { %7388 = vmatpush3.bf16.msra.mxu0 %v8037_v10  ;;  %v8045_v10 = vld [vmem:[%s9899_s4 + $0xc8] sm:$0xff]  }
 0x7b6   : > { %7389 = vmatprep.subr.bf16.mxu0 %v8273_v3 }
 0x7b9   : > { %7390 = vmatpush3.bf16.msra.mxu0 %v8038_v11  ;;  %v8046_v11 = vld [vmem:[%s9899_s4 + $0xd0] sm:$0xff]  }
 0x7ba   : > { %7391 = vmatprep.subr.bf16.mxu0 %v8273_v3 }
 0x7bd   : > { %7392 = vmatpush3.bf16.msra.mxu0 %v8039_v12  ;;  %v8047_v12 = vld [vmem:[%s9899_s4 + $0xd8] sm:$0xff]  }
 0x7be   : > { %7393 = vmatprep.subr.bf16.mxu0 %v8273_v3 }
 0x7c1   : > { %7394 = vmatpush3.bf16.msra.mxu0 %v8040_v14  ;;  %v8048_v14 = vld [vmem:[%s9899_s4 + $0xe0] sm:$0xff]  }
 0x7c2   : > { %7395 = vmatprep.subr.bf16.mxu0 %v8273_v3 }
 0x7c5   : > { %7396 = vmatpush3.bf16.msra.mxu0 %v8041_v15  ;;  %v8049_v15 = vld [vmem:[%s9899_s4 + $0xe8] sm:$0xff]  }
 0x7c6   : > { %7397 = vmatprep.subr.bf16.mxu0 %v8273_v3 }
 0x7c9   : > { %7398 = vmatpush3.bf16.msra.mxu0 %v8042_v17  ;;  %v8050_v17 = vld [vmem:[%s9899_s4 + $0xf0] sm:$0xff]  }
 0x7ca   : > { %7399 = vmatprep.subr.bf16.mxu0 %v8273_v3 }
 0x7cd   : > { %7400 = vmatpush3.bf16.msra.mxu0 %v8043_v18  ;;  %v8051_v18 = vld [vmem:[%s9899_s4 + $0xf8] sm:$0xff]  }
 0x7ce   : > { %7425 = vmatprep.subr.bf16.mxu0 %v8273_v3 }
 0x7d0   : > { %7402 = vmatmul.mubr.bf16.vlgmr.msra.gmra.mrb[32].mxu0 %v8474_v28 }
 0x7d1   : > { %7427 = vmatprep.mubr.msk.bf16.mxu0 %vm8274_vm0, %v8273_v3 }
 0x843   : > { %v1543_v20 = vpop.f32.mrb[20].mxu0 }
 0x844   : > { %v8836_v21 = vadd.f32 %v8708_v19, %v1543_v20  ;;  %v7279_v22 = vpop.f32.mrb[21].mxu0  ;;  %v6170_v19 = vld [vmem:[%s9900_s5 + $0x16] ss:$0 sm:$0xff]  ;;  %v8052_v20 = vld [vmem:[%s9899_s4 + $0x5c0] sm:$0xff]  }
 0x845   : > { %v1546_v23 = vpop.f32.mrb[22].mxu0  ;;  %v8053_v22 = vld [vmem:[%s9899_s4 + $0x5c8] sm:$0xff]  }
 0x846   : > { %v7280_v24 = vpop.f32.mrb[23].mxu0  ;;  %v8054_v23 = vld [vmem:[%s9899_s4 + $0x5d0] sm:$0xff]  }
 0x847   : > { %v8055_v24 = vld [vmem:[%s9899_s4 + $0x5d8] sm:$0xff]  }
 0x863   : > { %v1702_v26 = vpop.f32.mrb[24].mxu0 }
 0x864   : > { %v1703_v29 = vadd.f32 %v6118_v25, %v1702_v26  ;;  %v7305_v30 = vpop.f32.mrb[25].mxu0  ;;  %v8056_v25 = vld [vmem:[%s9899_s4 + $0x5e0] sm:$0xff]   ;;  %v8057_v26 = vld [vmem:[%s9899_s4 + $0x5e8] sm:$0xff]  }
 0x865   : > { %v1705_v31 = vpop.f32.mrb[26].mxu0  ;;  %v8059_v30 = vld [vmem:[%s9899_s4 + $0x5f8] sm:$0xff]  }
 0x866   : > { %v1934_v32 = vpack.c.bf16 %v1703_v29, %v1703_v29  ;;  %v7306_v33 = vpop.f32.mrb[27].mxu0  ;;  %v8058_v29 = vld [vmem:[%s9899_s4 + $0x5f0] sm:$0xff]   ;;  %v8060_v31 = vld [vmem:[%s9899_s4 + $0x380] sm:$0xff]  }
 0x867   : > { %v8062_v33 = vld [vmem:[%s9899_s4 + $0x390] sm:$0xff]  }
 0x868   : > { %7350 = vmatmul.mubr.msk.bf16.vlgmr.msra.gmra.mrb[28].mxu1 %vm942_vm1, %v1934_v32  ;;  %v8061_v32 = vld [vmem:[%s9899_s4 + $0x388] sm:$0xff]  }
 0x869   : > { %7355 = vmatprep.mubr.msk.bf16.mxu1 %vm8274_vm0, %v8273_v3 }
 0x883   : > { %v1928_v34 = vpop.f32.mrb[28].mxu0 }
 0x884   : > { %v1929_v35 = vadd.f32 %v6170_v19, %v1928_v34  ;;  %v7345_v36 = vpop.f32.mrb[29].mxu0  ;;  %v8063_v19 = vld [vmem:[%s9899_s4 + $0x398] sm:$0xff]   ;;  %v8064_v34 = vld [vmem:[%s9899_s4 + $0x3a0] sm:$0xff]  }
 0x885   : > { %v1931_v37 = vpop.f32.mrb[30].mxu0  ;;  %v8066_v36 = vld [vmem:[%s9899_s4 + $0x3b0] sm:$0xff]  }
 0x886   : > { %v1936_v38 = vpack.c.bf16 %v1929_v35, %v1929_v35  ;;  %v7346_v39 = vpop.f32.mrb[31].mxu0  ;;  %v8065_v35 = vld [vmem:[%s9899_s4 + $0x3a8] sm:$0xff]   ;;  %v8067_v37 = vld [vmem:[%s9899_s4 + $0x3b8] sm:$0xff]  }
 0x888   : > { %v2001_v40 = vsel %vm1006_vm2, %v1936_v38, 0 }
 0x889   : > { %7354 = vmatpush3.bf16.msra.mxu1 %v2001_v40 }
 0x88a   : > { %7359 = vmatprep.subr.bf16.mxu1 %v8273_v3 }
 0x8a3   : > { %v2313_v42 = vpop.f32.mrb[32].mxu0 }
 0x8a4   : > { %v2314_v43 = vadd.f32 %v6226_v41, %v2313_v42  ;;  %v7403_v44 = vpop.f32.mrb[33].mxu0 }
 0x8a5   : > { %v2316_v45 = vpop.f32.mrb[34].mxu0 }
 0x8a6   : > { %v2433_v46 = vpack.c.bf16 %v2314_v43, %v2314_v43  ;;  %v7404_v47 = vpop.f32.mrb[35].mxu0  ;;  %v6200_v43 = vld [vmem:[%s9900_s5 + $0x3] ss:$0 sm:$0xff] }
 0x8a8   : > { %v2439_v48 = vsel %vm942_vm1, %v2433_v46, 0 }
 0x8a9   : > { %7426 = vmatpush3.bf16.xpose.msra.mxu0 %v2439_v48 }
 0x8aa   : > { %7431 = vmatprep.subr.bf16.mxu0 %v8273_v3 }
 0x93b   : > { %v1977_v49 = vpop.f32.mrb[28].mxu1 }
 0x93c   : > { %v1983_v50 = vmul.f32 0.35355338, %v1977_v49  ;;  %v7351_v51 = vpop.f32.mrb[29].mxu1 }
 0x93d   : > { %v1980_v52 = vpop.f32.mrb[30].mxu1 }
 0x93e   : > { %v7352_v53 = vpop.f32.mrb[31].mxu1  ;;  %v1984_v54 = vsel %vm8573_vm3, %v1983_v50, -1e+30 }
 0x93f   : > { %v1985_v55 = vsel %vm942_vm1, %v1984_v54, -inf }
 0x940   : > { %1986 = vmax.xlane.f32.xlu1 %v1985_v55 }
 0x9cd   : > { %v1987_v56 = vpop.xlane.xlu1 %1986 }
 0x9ce   : > { %v1988_v57 = vsub.f32 %v1984_v54, %v1987_v56 }
 0x9d0   : > { %v1989_v58 = vmul.f32 1.442695, %v1988_v57  ;;  %v6308_v57 = vld [vmem:[%s9900_s5 + $0xe] ss:$0 sm:$0xff] }
 0x9d2   : > { %8228 = vpow2.f32 %v1989_v58 }
 0x9dc   : > { %v8229_v59 = vpop.eup %8228 }
 0x9dd   : > { %v1991_v60 = vsel %vm942_vm1, %v8229_v59, 0.0 }
 0x9de   : > { %1992 = vadd.xlane.f32.xlu1 %v1991_v60 }
 0xa6b   : > { %v1993_v61 = vpop.xlane.xlu1 %1992 }
 0xa6c   : > { %8230 = vrcp.f32 %v1993_v61 }
 0xa76   : > { %v8231_v62 = vpop.eup %8230 }
 0xa77   : > { %v1995_v0 = vmul.f32 %v8231_v62, %v8229_v59 }
 0xa79   : > { %v1996_v1 = vpack.c.bf16 %v1995_v0, %v1995_v0 }
 0xa7b   : > { %7356 = vmatmul.mubr.msk.bf16.vlgmr.msra.gmra.mrb[32].mxu1 %vm942_vm1, %v1996_v1 }
 0xa7c   : > { %7360 = vmatpush3.bf16.msra.mxu1 %v2050_v2  ;;  %7361 = vmatprep.mubr.msk.bf16.mxu1 %vm8274_vm0, %v8273_v3 }
 0xa7d   : > { %7365 = vmatprep.subr.bf16.mxu1 %v8273_v3 }
 0xb4e   : > { %v2037_v4 = vpop.f32.mrb[32].mxu1 }
 0xb4f   : > { %v2043_v6 = vpack.c.bf16 %v2037_v4, %v2037_v4  ;;  %v7357_v7 = vpop.f32.mrb[33].mxu1 }
 0xb50   : > { %v2040_v8 = vpop.f32.mrb[34].mxu1 }
 0xb51   : > { %v7358_v9 = vpop.f32.mrb[35].mxu1  ;;  %7362 = vmatmul.mubr.msk.bf16.vlgmr.msra.gmra.mrb[36].mxu1 %vm942_vm1, %v2043_v6 }
 0xb52   : > { %7366 = vmatpush3.bf16.msra.mxu1 %v8044_v5  ;;  %7381 = vmatprep.mubr.msk.bf16.mxu1 %vm8274_vm0, %v8273_v3 }
 0xb53   : > { %7367 = vmatprep.subr.bf16.mxu1 %v8273_v3 }
 0xb56   : > { %7368 = vmatpush3.bf16.msra.mxu1 %v8045_v10 }
 0xb57   : > { %7369 = vmatprep.subr.bf16.mxu1 %v8273_v3 }
 0xb5a   : > { %7370 = vmatpush3.bf16.msra.mxu1 %v8046_v11 }
 0xb5b   : > { %7371 = vmatprep.subr.bf16.mxu1 %v8273_v3 }
 0xb5e   : > { %7372 = vmatpush3.bf16.msra.mxu1 %v8047_v12 }
 0xb5f   : > { %7373 = vmatprep.subr.bf16.mxu1 %v8273_v3 }
 0xb62   : > { %7374 = vmatpush3.bf16.msra.mxu1 %v8048_v14 }
 0xb63   : > { %7375 = vmatprep.subr.bf16.mxu1 %v8273_v3 }
 0xb66   : > { %7376 = vmatpush3.bf16.msra.mxu1 %v8049_v15 }
 0xb67   : > { %7377 = vmatprep.subr.bf16.mxu1 %v8273_v3 }
 0xb6a   : > { %7378 = vmatpush3.bf16.msra.mxu1 %v8050_v17 }
 0xb6b   : > { %7379 = vmatprep.subr.bf16.mxu1 %v8273_v3 }
 0xb6e   : > { %7380 = vmatpush3.bf16.msra.mxu1 %v8051_v18  ;;  %v6263_v18 = vld [vmem:[%s9901_s6 + $0xc] sm:$0xf] }
 0xb6f   : > { %7405 = vmatprep.subr.bf16.mxu1 %v8273_v3 }
 0xb71   : > { %7382 = vmatmul.mubr.bf16.vlgmr.msra.gmra.mrb[40].mxu1 %v8474_v28 }
 0xb72   : > { %7406 = vmatpush3.bf16.msra.mxu1 %v8052_v20  ;;  %7421 = vmatprep.mubr.msk.bf16.mxu1 %vm8274_vm0, %v8273_v3 }
 0xb73   : > { %7407 = vmatprep.subr.bf16.mxu1 %v8273_v3 }
 0xb76   : > { %7408 = vmatpush3.bf16.msra.mxu1 %v8053_v22 }
 0xb77   : > { %7409 = vmatprep.subr.bf16.mxu1 %v8273_v3 }
 0xb7a   : > { %7410 = vmatpush3.bf16.msra.mxu1 %v8054_v23  ;;  %v2548_v23 = vsel %vm1006_vm2, %v6263_v18, 0 }
 0xb7b   : > { %7411 = vmatprep.subr.bf16.mxu1 %v8273_v3 }
 0xb7e   : > { %7412 = vmatpush3.bf16.msra.mxu1 %v8055_v24 }
 0xb7f   : > { %7413 = vmatprep.subr.bf16.mxu1 %v8273_v3 }
 0xb82   : > { %7414 = vmatpush3.bf16.msra.mxu1 %v8056_v25  ;;  %v8068_v25 = vld [vmem:[%s9899_s4 + $0x100] sm:$0xff]  }
 0xb83   : > { %7415 = vmatprep.subr.bf16.mxu1 %v8273_v3 }
 0xb86   : > { %7416 = vmatpush3.bf16.msra.mxu1 %v8057_v26 }
 0xb87   : > { %7417 = vmatprep.subr.bf16.mxu1 %v8273_v3 }
 0xb8a   : > { %7418 = vmatpush3.bf16.msra.mxu1 %v8058_v29 }
 0xb8b   : > { %7419 = vmatprep.subr.bf16.mxu1 %v8273_v3 }
 0xb8e   : > { %7420 = vmatpush3.bf16.msra.mxu1 %v8059_v30 }
 0xb8f   : > { %7463 = vmatprep.subr.bf16.mxu1 %v8273_v3 }
 0xb91   : > { %7422 = vmatmul.mubr.bf16.vlgmr.msra.gmra.mrb[44].mxu1 %v8474_v28 }
 0xb92   : > { %7464 = vmatpush3.bf16.msra.mxu1 %v8060_v31  ;;  %7479 = vmatprep.mubr.msk.bf16.mxu1 %vm8274_vm0, %v8273_v3 }
 0xb93   : > { %7465 = vmatprep.subr.bf16.mxu1 %v8273_v3 }
 0xb96   : > { %7466 = vmatpush3.bf16.msra.mxu1 %v8061_v32  ;;  %v8069_v32 = vld [vmem:[%s9899_s4 + $0x108] sm:$0xff]  }
 0xb97   : > { %7467 = vmatprep.subr.bf16.mxu1 %v8273_v3 }
 0xb9a   : > { %7468 = vmatpush3.bf16.msra.mxu1 %v8062_v33  ;;  %v8070_v33 = vld [vmem:[%s9899_s4 + $0x110] sm:$0xff]  }
 0xb9b   : > { %7469 = vmatprep.subr.bf16.mxu1 %v8273_v3 }
 0xb9e   : > { %7470 = vmatpush3.bf16.msra.mxu1 %v8063_v19  ;;  %v8071_v19 = vld [vmem:[%s9899_s4 + $0x118] sm:$0xff]  }
 0xb9f   : > { %7471 = vmatprep.subr.bf16.mxu1 %v8273_v3 }
 0xba2   : > { %7472 = vmatpush3.bf16.msra.mxu1 %v8064_v34  ;;  %v8072_v34 = vld [vmem:[%s9899_s4 + $0x120] sm:$0xff]  }
 0xba3   : > { %7473 = vmatprep.subr.bf16.mxu1 %v8273_v3 }
 0xba6   : > { %7474 = vmatpush3.bf16.msra.mxu1 %v8065_v35  ;;  %v8073_v35 = vld [vmem:[%s9899_s4 + $0x128] sm:$0xff]  }
 0xba7   : > { %7475 = vmatprep.subr.bf16.mxu1 %v8273_v3 }
 0xbaa   : > { %7476 = vmatpush3.bf16.msra.mxu1 %v8066_v36  ;;  %v8074_v36 = vld [vmem:[%s9899_s4 + $0x130] sm:$0xff]  }
 0xbab   : > { %7477 = vmatprep.subr.bf16.mxu1 %v8273_v3 }
 0xbae   : > { %7478 = vmatpush3.bf16.msra.mxu1 %v8067_v37  ;;  %v8075_v37 = vld [vmem:[%s9899_s4 + $0x138] sm:$0xff]  }
 0xbaf   : > { %7503 = vmatprep.subr.bf16.mxu1 %v8273_v3 }
 0xbb1   : > { %7480 = vmatmul.mubr.bf16.vlgmr.msra.gmra.mrb[48].mxu1 %v8474_v28 }
 0xbb2   : > { %7505 = vmatprep.mubr.msk.bf16.mxu1 %vm8274_vm0, %v8273_v3 }
 0xc24   : > { %v2086_v38 = vpop.f32.mrb[36].mxu1 }
 0xc25   : > { %v8975_v39 = vadd.f32 %v2086_v38, %v8836_v21  ;;  %v7363_v40 = vpop.f32.mrb[37].mxu1  ;;  %v6252_v21 = vld [vmem:[%s9900_s5 + $0x17] ss:$0 sm:$0xff]  ;;  %v8076_v38 = vld [vmem:[%s9899_s4 + $0x600] sm:$0xff]  }
 0xc26   : > { %v2089_v41 = vpop.f32.mrb[38].mxu1  ;;  %v8077_v40 = vld [vmem:[%s9899_s4 + $0x608] sm:$0xff]  }
 0xc27   : > { %v7364_v42 = vpop.f32.mrb[39].mxu1  ;;  %v8078_v41 = vld [vmem:[%s9899_s4 + $0x610] sm:$0xff]  }
 0xc28   : > { %v8079_v42 = vld [vmem:[%s9899_s4 + $0x618] sm:$0xff]  }
 0xc44   : > { %v2200_v44 = vpop.f32.mrb[40].mxu1 }
 0xc45   : > { %v2201_v45 = vadd.f32 %v6200_v43, %v2200_v44  ;;  %v7383_v46 = vpop.f32.mrb[41].mxu1  ;;  %v8080_v43 = vld [vmem:[%s9899_s4 + $0x620] sm:$0xff]   ;;  %v8081_v44 = vld [vmem:[%s9899_s4 + $0x628] sm:$0xff]  }
 0xc46   : > { %v2203_v47 = vpop.f32.mrb[42].mxu1  ;;  %v8083_v46 = vld [vmem:[%s9899_s4 + $0x638] sm:$0xff]  }
 0xc47   : > { %v2432_v48 = vpack.c.bf16 %v2201_v45, %v2201_v45  ;;  %v7384_v49 = vpop.f32.mrb[43].mxu1  ;;  %v8082_v45 = vld [vmem:[%s9899_s4 + $0x630] sm:$0xff]   ;;  %v8084_v47 = vld [vmem:[%s9899_s4 + $0x3c0] sm:$0xff]  }
 0xc48   : > { %v8086_v49 = vld [vmem:[%s9899_s4 + $0x3d0] sm:$0xff]  }
 0xc49   : > { %7428 = vmatmul.mubr.msk.bf16.vlgmr.msra.gmra.mrb[36].mxu0 %vm942_vm1, %v2432_v48  ;;  %v8085_v48 = vld [vmem:[%s9899_s4 + $0x3c8] sm:$0xff]  }
 0xc4a   : > { %7433 = vmatprep.mubr.msk.bf16.mxu0 %vm8274_vm0, %v8273_v3 }
 0xc64   : > { %v2426_v50 = vpop.f32.mrb[44].mxu1 }
 0xc65   : > { %v2427_v51 = vadd.f32 %v6252_v21, %v2426_v50  ;;  %v7423_v52 = vpop.f32.mrb[45].mxu1  ;;  %v8087_v21 = vld [vmem:[%s9899_s4 + $0x3d8] sm:$0xff]   ;;  %v8088_v50 = vld [vmem:[%s9899_s4 + $0x3e0] sm:$0xff]  }
 0xc66   : > { %v2429_v53 = vpop.f32.mrb[46].mxu1  ;;  %v8090_v52 = vld [vmem:[%s9899_s4 + $0x3f0] sm:$0xff]  }
 0xc67   : > { %v2434_v54 = vpack.c.bf16 %v2427_v51, %v2427_v51  ;;  %v7424_v55 = vpop.f32.mrb[47].mxu1  ;;  %v8089_v51 = vld [vmem:[%s9899_s4 + $0x3e8] sm:$0xff]   ;;  %v8091_v53 = vld [vmem:[%s9899_s4 + $0x3f8] sm:$0xff]  }
 0xc69   : > { %v2499_v56 = vsel %vm1006_vm2, %v2434_v54, 0 }
 0xc6a   : > { %7432 = vmatpush3.bf16.msra.mxu0 %v2499_v56 }
 0xc6b   : > { %7437 = vmatprep.subr.bf16.mxu0 %v8273_v3 }
 0xc84   : > { %v2811_v58 = vpop.f32.mrb[48].mxu1 }
 0xc85   : > { %v2812_v59 = vadd.f32 %v6308_v57, %v2811_v58  ;;  %v7481_v60 = vpop.f32.mrb[49].mxu1 }
 0xc86   : > { %v2814_v61 = vpop.f32.mrb[50].mxu1 }
 0xc87   : > { %v2931_v62 = vpack.c.bf16 %v2812_v59, %v2812_v59  ;;  %v7482_v63 = vpop.f32.mrb[51].mxu1  ;;  %v6282_v59 = vld [vmem:[%s9900_s5 + $0x4] ss:$0 sm:$0xff] }
 0xc89   : > { %v2937_v0 = vsel %vm942_vm1, %v2931_v62, 0 }
 0xc8a   : > { %7504 = vmatpush3.bf16.xpose.msra.mxu1 %v2937_v0 }
 0xc8b   : > { %7509 = vmatprep.subr.bf16.mxu1 %v8273_v3 }
 0xd1c   : > { %v2475_v1 = vpop.f32.mrb[36].mxu0 }
 0xd1d   : > { %v2481_v2 = vmul.f32 0.35355338, %v2475_v1  ;;  %v7429_v4 = vpop.f32.mrb[37].mxu0 }
 0xd1e   : > { %v2478_v5 = vpop.f32.mrb[38].mxu0 }
 0xd1f   : > { %v7430_v6 = vpop.f32.mrb[39].mxu0  ;;  %v2482_v7 = vsel %vm8573_vm3, %v2481_v2, -1e+30 }
 0xd20   : > { %v2483_v8 = vsel %vm942_vm1, %v2482_v7, -inf }
 0xd21   : > { %2484 = vmax.xlane.f32.xlu1 %v2483_v8 }
 0xdae   : > { %v2485_v9 = vpop.xlane.xlu1 %2484 }
 0xdaf   : > { %v2486_v10 = vsub.f32 %v2482_v7, %v2485_v9 }
 0xdb1   : > { %v2487_v11 = vmul.f32 1.442695, %v2486_v10  ;;  %v6390_v10 = vld [vmem:[%s9900_s5 + $0xf] ss:$0 sm:$0xff] }
 0xdb3   : > { %8232 = vpow2.f32 %v2487_v11 }
 0xdbd   : > { %v8233_v12 = vpop.eup %8232 }
 0xdbe   : > { %v2489_v14 = vsel %vm942_vm1, %v8233_v12, 0.0 }
 0xdbf   : > { %2490 = vadd.xlane.f32.xlu1 %v2489_v14 }
 0xe4c   : > { %v2491_v15 = vpop.xlane.xlu1 %2490 }
 0xe4d   : > { %8234 = vrcp.f32 %v2491_v15 }
 0xe57   : > { %v8235_v17 = vpop.eup %8234 }
 0xe58   : > { %v2493_v20 = vmul.f32 %v8235_v17, %v8233_v12 }
 0xe5a   : > { %v2494_v22 = vpack.c.bf16 %v2493_v20, %v2493_v20 }
 0xe5c   : > { %7434 = vmatmul.mubr.msk.bf16.vlgmr.msra.gmra.mrb[40].mxu0 %vm942_vm1, %v2494_v22 }
 0xe5d   : > { %7438 = vmatpush3.bf16.msra.mxu0 %v2548_v23  ;;  %7439 = vmatprep.mubr.msk.bf16.mxu0 %vm8274_vm0, %v8273_v3 }
 0xe5e   : > { %7443 = vmatprep.subr.bf16.mxu0 %v8273_v3 }
 0xf2f   : > { %v2535_v24 = vpop.f32.mrb[40].mxu0 }
 0xf30   : > { %v2541_v26 = vpack.c.bf16 %v2535_v24, %v2535_v24  ;;  %v7435_v29 = vpop.f32.mrb[41].mxu0 }
 0xf31   : > { %v2538_v30 = vpop.f32.mrb[42].mxu0 }
 0xf32   : > { %v7436_v31 = vpop.f32.mrb[43].mxu0  ;;  %7440 = vmatmul.mubr.msk.bf16.vlgmr.msra.gmra.mrb[44].mxu0 %vm942_vm1, %v2541_v26 }
 0xf33   : > { %7444 = vmatpush3.bf16.msra.mxu0 %v8068_v25  ;;  %7459 = vmatprep.mubr.msk.bf16.mxu0 %vm8274_vm0, %v8273_v3 }
 0xf34   : > { %7445 = vmatprep.subr.bf16.mxu0 %v8273_v3 }
 0xf37   : > { %7446 = vmatpush3.bf16.msra.mxu0 %v8069_v32 }
 0xf38   : > { %7447 = vmatprep.subr.bf16.mxu0 %v8273_v3 }
 0xf3b   : > { %7448 = vmatpush3.bf16.msra.mxu0 %v8070_v33 }
 0xf3c   : > { %7449 = vmatprep.subr.bf16.mxu0 %v8273_v3 }
 0xf3f   : > { %7450 = vmatpush3.bf16.msra.mxu0 %v8071_v19 }
 0xf40   : > { %7451 = vmatprep.subr.bf16.mxu0 %v8273_v3 }
 0xf43   : > { %7452 = vmatpush3.bf16.msra.mxu0 %v8072_v34 }
 0xf44   : > { %7453 = vmatprep.subr.bf16.mxu0 %v8273_v3 }
 0xf47   : > { %7454 = vmatpush3.bf16.msra.mxu0 %v8073_v35 }
 0xf48   : > { %7455 = vmatprep.subr.bf16.mxu0 %v8273_v3 }
 0xf4b   : > { %7456 = vmatpush3.bf16.msra.mxu0 %v8074_v36 }
 0xf4c   : > { %7457 = vmatprep.subr.bf16.mxu0 %v8273_v3 }
 0xf4f   : > { %7458 = vmatpush3.bf16.msra.mxu0 %v8075_v37  ;;  %v6345_v37 = vld [vmem:[%s9901_s6 + $0x10] sm:$0xf] }
 0xf50   : > { %7483 = vmatprep.subr.bf16.mxu0 %v8273_v3 }
 0xf52   : > { %7460 = vmatmul.mubr.bf16.vlgmr.msra.gmra.mrb[48].mxu0 %v8474_v28 }
 0xf53   : > { %7484 = vmatpush3.bf16.msra.mxu0 %v8076_v38  ;;  %7499 = vmatprep.mubr.msk.bf16.mxu0 %vm8274_vm0, %v8273_v3 }
 0xf54   : > { %7485 = vmatprep.subr.bf16.mxu0 %v8273_v3 }
 0xf57   : > { %7486 = vmatpush3.bf16.msra.mxu0 %v8077_v40 }
 0xf58   : > { %7487 = vmatprep.subr.bf16.mxu0 %v8273_v3 }
 0xf5b   : > { %7488 = vmatpush3.bf16.msra.mxu0 %v8078_v41  ;;  %v3046_v41 = vsel %vm1006_vm2, %v6345_v37, 0 }
 0xf5c   : > { %7489 = vmatprep.subr.bf16.mxu0 %v8273_v3 }
 0xf5f   : > { %7490 = vmatpush3.bf16.msra.mxu0 %v8079_v42 }
 0xf60   : > { %7491 = vmatprep.subr.bf16.mxu0 %v8273_v3 }
 0xf63   : > { %7492 = vmatpush3.bf16.msra.mxu0 %v8080_v43  ;;  %v8092_v43 = vld [vmem:[%s9899_s4 + $0x140] sm:$0xff]  }
 0xf64   : > { %7493 = vmatprep.subr.bf16.mxu0 %v8273_v3 }
 0xf67   : > { %7494 = vmatpush3.bf16.msra.mxu0 %v8081_v44 }
 0xf68   : > { %7495 = vmatprep.subr.bf16.mxu0 %v8273_v3 }
 0xf6b   : > { %7496 = vmatpush3.bf16.msra.mxu0 %v8082_v45 }
 0xf6c   : > { %7497 = vmatprep.subr.bf16.mxu0 %v8273_v3 }
 0xf6f   : > { %7498 = vmatpush3.bf16.msra.mxu0 %v8083_v46 }
 0xf70   : > { %7541 = vmatprep.subr.bf16.mxu0 %v8273_v3 }
 0xf72   : > { %7500 = vmatmul.mubr.bf16.vlgmr.msra.gmra.mrb[52].mxu0 %v8474_v28 }
 0xf73   : > { %7542 = vmatpush3.bf16.msra.mxu0 %v8084_v47  ;;  %7557 = vmatprep.mubr.msk.bf16.mxu0 %vm8274_vm0, %v8273_v3 }
 0xf74   : > { %7543 = vmatprep.subr.bf16.mxu0 %v8273_v3 }
 0xf77   : > { %7544 = vmatpush3.bf16.msra.mxu0 %v8085_v48  ;;  %v8093_v48 = vld [vmem:[%s9899_s4 + $0x148] sm:$0xff]  }
 0xf78   : > { %7545 = vmatprep.subr.bf16.mxu0 %v8273_v3 }
 0xf7b   : > { %7546 = vmatpush3.bf16.msra.mxu0 %v8086_v49  ;;  %v8094_v49 = vld [vmem:[%s9899_s4 + $0x150] sm:$0xff]  }
 0xf7c   : > { %7547 = vmatprep.subr.bf16.mxu0 %v8273_v3 }
 0xf7f   : > { %7548 = vmatpush3.bf16.msra.mxu0 %v8087_v21  ;;  %v8095_v21 = vld [vmem:[%s9899_s4 + $0x158] sm:$0xff]  }
 0xf80   : > { %7549 = vmatprep.subr.bf16.mxu0 %v8273_v3 }
 0xf83   : > { %7550 = vmatpush3.bf16.msra.mxu0 %v8088_v50  ;;  %v8096_v50 = vld [vmem:[%s9899_s4 + $0x160] sm:$0xff]  }
 0xf84   : > { %7551 = vmatprep.subr.bf16.mxu0 %v8273_v3 }
 0xf87   : > { %7552 = vmatpush3.bf16.msra.mxu0 %v8089_v51  ;;  %v8097_v51 = vld [vmem:[%s9899_s4 + $0x168] sm:$0xff]  }
 0xf88   : > { %7553 = vmatprep.subr.bf16.mxu0 %v8273_v3 }
 0xf8b   : > { %7554 = vmatpush3.bf16.msra.mxu0 %v8090_v52  ;;  %v8098_v52 = vld [vmem:[%s9899_s4 + $0x170] sm:$0xff]  }
 0xf8c   : > { %7555 = vmatprep.subr.bf16.mxu0 %v8273_v3 }
 0xf8f   : > { %7556 = vmatpush3.bf16.msra.mxu0 %v8091_v53  ;;  %v8099_v53 = vld [vmem:[%s9899_s4 + $0x178] sm:$0xff]  }
 0xf90   : > { %7581 = vmatprep.subr.bf16.mxu0 %v8273_v3 }
 0xf92   : > { %7558 = vmatmul.mubr.bf16.vlgmr.msra.gmra.mrb[56].mxu0 %v8474_v28 }
 0xf93   : > { %7583 = vmatprep.mubr.msk.bf16.mxu0 %vm8274_vm0, %v8273_v3 }
0x1005   : > { %v2584_v54 = vpop.f32.mrb[44].mxu0 }
0x1006   : > { %v9114_v55 = vadd.f32 %v2584_v54, %v8975_v39  ;;  %v7441_v56 = vpop.f32.mrb[45].mxu0  ;;  %v6334_v39 = vld [vmem:[%s9900_s5 + $0x18] ss:$0 sm:$0xff]  ;;  %v8100_v54 = vld [vmem:[%s9899_s4 + $0x640] sm:$0xff]  }
0x1007   : > { %v2587_v57 = vpop.f32.mrb[46].mxu0  ;;  %v8101_v56 = vld [vmem:[%s9899_s4 + $0x648] sm:$0xff]  }
0x1008   : > { %v7442_v58 = vpop.f32.mrb[47].mxu0  ;;  %v8102_v57 = vld [vmem:[%s9899_s4 + $0x650] sm:$0xff]  }
0x1009   : > { %v8103_v58 = vld [vmem:[%s9899_s4 + $0x658] sm:$0xff]  }
0x1025   : > { %v2698_v60 = vpop.f32.mrb[48].mxu0 }
0x1026   : > { %v2699_v61 = vadd.f32 %v6282_v59, %v2698_v60  ;;  %v7461_v62 = vpop.f32.mrb[49].mxu0  ;;  %v8104_v59 = vld [vmem:[%s9899_s4 + $0x660] sm:$0xff]   ;;  %v8105_v60 = vld [vmem:[%s9899_s4 + $0x668] sm:$0xff]  }
0x1027   : > { %v2701_v63 = vpop.f32.mrb[50].mxu0  ;;  %v8107_v62 = vld [vmem:[%s9899_s4 + $0x678] sm:$0xff]  }
0x1028   : > { %v2930_v0 = vpack.c.bf16 %v2699_v61, %v2699_v61  ;;  %v7462_v1 = vpop.f32.mrb[51].mxu0  ;;  %v8106_v61 = vld [vmem:[%s9899_s4 + $0x670] sm:$0xff]   ;;  %v8108_v63 = vld [vmem:[%s9899_s4 + $0x400] sm:$0xff]  }
0x1029   : > { %v8110_v1 = vld [vmem:[%s9899_s4 + $0x410] sm:$0xff]  }
0x102a   : > { %7506 = vmatmul.mubr.msk.bf16.vlgmr.msra.gmra.mrb[52].mxu1 %vm942_vm1, %v2930_v0  ;;  %v8109_v0 = vld [vmem:[%s9899_s4 + $0x408] sm:$0xff]  }
0x102b   : > { %7511 = vmatprep.mubr.msk.bf16.mxu1 %vm8274_vm0, %v8273_v3 }
0x1045   : > { %v2924_v2 = vpop.f32.mrb[52].mxu0 }
0x1046   : > { %v2925_v4 = vadd.f32 %v6334_v39, %v2924_v2  ;;  %v7501_v5 = vpop.f32.mrb[53].mxu0  ;;  %v8111_v39 = vld [vmem:[%s9899_s4 + $0x418] sm:$0xff]   ;;  %v8112_v2 = vld [vmem:[%s9899_s4 + $0x420] sm:$0xff]  }
0x1047   : > { %v2927_v6 = vpop.f32.mrb[54].mxu0  ;;  %v8114_v5 = vld [vmem:[%s9899_s4 + $0x430] sm:$0xff]  }
0x1048   : > { %v2932_v7 = vpack.c.bf16 %v2925_v4, %v2925_v4  ;;  %v7502_v8 = vpop.f32.mrb[55].mxu0  ;;  %v8113_v4 = vld [vmem:[%s9899_s4 + $0x428] sm:$0xff]   ;;  %v8115_v6 = vld [vmem:[%s9899_s4 + $0x438] sm:$0xff]  }
0x104a   : > { %v2997_v9 = vsel %vm1006_vm2, %v2932_v7, 0 }
0x104b   : > { %7510 = vmatpush3.bf16.msra.mxu1 %v2997_v9 }
0x104c   : > { %7515 = vmatprep.subr.bf16.mxu1 %v8273_v3 }
0x1065   : > { %v3309_v11 = vpop.f32.mrb[56].mxu0 }
0x1066   : > { %v3310_v12 = vadd.f32 %v6390_v10, %v3309_v11  ;;  %v7559_v14 = vpop.f32.mrb[57].mxu0 }
0x1067   : > { %v3312_v15 = vpop.f32.mrb[58].mxu0 }
0x1068   : > { %v3429_v17 = vpack.c.bf16 %v3310_v12, %v3310_v12  ;;  %v7560_v18 = vpop.f32.mrb[59].mxu0  ;;  %v6364_v12 = vld [vmem:[%s9900_s5 + $0x5] ss:$0 sm:$0xff] }
0x106a   : > { %v3435_v20 = vsel %vm942_vm1, %v3429_v17, 0 }
0x106b   : > { %7582 = vmatpush3.bf16.xpose.msra.mxu0 %v3435_v20 }
0x106c   : > { %7587 = vmatprep.subr.bf16.mxu0 %v8273_v3 }
0x10fd   : > { %v2973_v22 = vpop.f32.mrb[52].mxu1 }
0x10fe   : > { %v2979_v23 = vmul.f32 0.35355338, %v2973_v22  ;;  %v7507_v24 = vpop.f32.mrb[53].mxu1 }
0x10ff   : > { %v2976_v25 = vpop.f32.mrb[54].mxu1 }
0x1100   : > { %v7508_v26 = vpop.f32.mrb[55].mxu1  ;;  %v2980_v29 = vsel %vm8573_vm3, %v2979_v23, -1e+30 }
0x1101   : > { %v2981_v30 = vsel %vm942_vm1, %v2980_v29, -inf }
0x1102   : > { %2982 = vmax.xlane.f32.xlu1 %v2981_v30 }
0x118f   : > { %v2983_v31 = vpop.xlane.xlu1 %2982 }
0x1190   : > { %v2984_v32 = vsub.f32 %v2980_v29, %v2983_v31 }
0x1192   : > { %v2985_v33 = vmul.f32 1.442695, %v2984_v32  ;;  %v6472_v32 = vld [vmem:[%s9900_s5 + $0x10] ss:$0 sm:$0xff] }
0x1194   : > { %8236 = vpow2.f32 %v2985_v33 }
0x119e   : > { %v8237_v19 = vpop.eup %8236 }
0x119f   : > { %v2987_v34 = vsel %vm942_vm1, %v8237_v19, 0.0 }
0x11a0   : > { %2988 = vadd.xlane.f32.xlu1 %v2987_v34 }
0x122d   : > { %v2989_v35 = vpop.xlane.xlu1 %2988 }
0x122e   : > { %8238 = vrcp.f32 %v2989_v35 }
0x1238   : > { %v8239_v36 = vpop.eup %8238 }
0x1239   : > { %v2991_v38 = vmul.f32 %v8239_v36, %v8237_v19 }
0x123b   : > { %v2992_v40 = vpack.c.bf16 %v2991_v38, %v2991_v38 }
0x123d   : > { %7512 = vmatmul.mubr.msk.bf16.vlgmr.msra.gmra.mrb[56].mxu1 %vm942_vm1, %v2992_v40 }
0x123e   : > { %7516 = vmatpush3.bf16.msra.mxu1 %v3046_v41  ;;  %7517 = vmatprep.mubr.msk.bf16.mxu1 %vm8274_vm0, %v8273_v3 }
0x123f   : > { %7521 = vmatprep.subr.bf16.mxu1 %v8273_v3 }
0x1310   : > { %v3033_v42 = vpop.f32.mrb[56].mxu1 }
0x1311   : > { %v3039_v44 = vpack.c.bf16 %v3033_v42, %v3033_v42  ;;  %v7513_v45 = vpop.f32.mrb[57].mxu1 }
0x1312   : > { %v3036_v46 = vpop.f32.mrb[58].mxu1 }
0x1313   : > { %v7514_v47 = vpop.f32.mrb[59].mxu1  ;;  %7518 = vmatmul.mubr.msk.bf16.vlgmr.msra.gmra.mrb[60].mxu1 %vm942_vm1, %v3039_v44 }
0x1314   : > { %7522 = vmatpush3.bf16.msra.mxu1 %v8092_v43  ;;  %7537 = vmatprep.mubr.msk.bf16.mxu1 %vm8274_vm0, %v8273_v3 }
0x1315   : > { %7523 = vmatprep.subr.bf16.mxu1 %v8273_v3 }
0x1318   : > { %7524 = vmatpush3.bf16.msra.mxu1 %v8093_v48 }
0x1319   : > { %7525 = vmatprep.subr.bf16.mxu1 %v8273_v3 }
0x131c   : > { %7526 = vmatpush3.bf16.msra.mxu1 %v8094_v49 }
0x131d   : > { %7527 = vmatprep.subr.bf16.mxu1 %v8273_v3 }
0x1320   : > { %7528 = vmatpush3.bf16.msra.mxu1 %v8095_v21 }
0x1321   : > { %7529 = vmatprep.subr.bf16.mxu1 %v8273_v3 }
0x1324   : > { %7530 = vmatpush3.bf16.msra.mxu1 %v8096_v50 }
0x1325   : > { %7531 = vmatprep.subr.bf16.mxu1 %v8273_v3 }
0x1328   : > { %7532 = vmatpush3.bf16.msra.mxu1 %v8097_v51 }
0x1329   : > { %7533 = vmatprep.subr.bf16.mxu1 %v8273_v3 }
0x132c   : > { %7534 = vmatpush3.bf16.msra.mxu1 %v8098_v52 }
0x132d   : > { %7535 = vmatprep.subr.bf16.mxu1 %v8273_v3 }
0x1330   : > { %7536 = vmatpush3.bf16.msra.mxu1 %v8099_v53  ;;  %v6427_v53 = vld [vmem:[%s9901_s6 + $0x14] sm:$0xf] }
0x1331   : > { %7561 = vmatprep.subr.bf16.mxu1 %v8273_v3 }
0x1333   : > { %7538 = vmatmul.mubr.bf16.vlgmr.msra.gmra.mrb[64].mxu1 %v8474_v28 }
0x1334   : > { %7562 = vmatpush3.bf16.msra.mxu1 %v8100_v54  ;;  %7577 = vmatprep.mubr.msk.bf16.mxu1 %vm8274_vm0, %v8273_v3 }
0x1335   : > { %7563 = vmatprep.subr.bf16.mxu1 %v8273_v3 }
0x1338   : > { %7564 = vmatpush3.bf16.msra.mxu1 %v8101_v56 }
0x1339   : > { %7565 = vmatprep.subr.bf16.mxu1 %v8273_v3 }
0x133c   : > { %7566 = vmatpush3.bf16.msra.mxu1 %v8102_v57  ;;  %v3544_v57 = vsel %vm1006_vm2, %v6427_v53, 0 }
0x133d   : > { %7567 = vmatprep.subr.bf16.mxu1 %v8273_v3 }
0x1340   : > { %7568 = vmatpush3.bf16.msra.mxu1 %v8103_v58 }
0x1341   : > { %7569 = vmatprep.subr.bf16.mxu1 %v8273_v3 }
0x1344   : > { %7570 = vmatpush3.bf16.msra.mxu1 %v8104_v59  ;;  %v8116_v59 = vld [vmem:[%s9899_s4 + $0x180] sm:$0xff]  }
0x1345   : > { %7571 = vmatprep.subr.bf16.mxu1 %v8273_v3 }
0x1348   : > { %7572 = vmatpush3.bf16.msra.mxu1 %v8105_v60 }
0x1349   : > { %7573 = vmatprep.subr.bf16.mxu1 %v8273_v3 }
0x134c   : > { %7574 = vmatpush3.bf16.msra.mxu1 %v8106_v61 }
0x134d   : > { %7575 = vmatprep.subr.bf16.mxu1 %v8273_v3 }
0x1350   : > { %7576 = vmatpush3.bf16.msra.mxu1 %v8107_v62 }
0x1351   : > { %7619 = vmatprep.subr.bf16.mxu1 %v8273_v3 }
0x1353   : > { %7578 = vmatmul.mubr.bf16.vlgmr.msra.gmra.mrb[68].mxu1 %v8474_v28 }
0x1354   : > { %7620 = vmatpush3.bf16.msra.mxu1 %v8108_v63  ;;  %7635 = vmatprep.mubr.msk.bf16.mxu1 %vm8274_vm0, %v8273_v3 }
0x1355   : > { %7621 = vmatprep.subr.bf16.mxu1 %v8273_v3 }
0x1358   : > { %7622 = vmatpush3.bf16.msra.mxu1 %v8109_v0  ;;  %v8117_v0 = vld [vmem:[%s9899_s4 + $0x188] sm:$0xff]  }
0x1359   : > { %7623 = vmatprep.subr.bf16.mxu1 %v8273_v3 }
0x135c   : > { %7624 = vmatpush3.bf16.msra.mxu1 %v8110_v1  ;;  %v8118_v1 = vld [vmem:[%s9899_s4 + $0x190] sm:$0xff]  }
0x135d   : > { %7625 = vmatprep.subr.bf16.mxu1 %v8273_v3 }
0x1360   : > { %7626 = vmatpush3.bf16.msra.mxu1 %v8111_v39  ;;  %v8119_v39 = vld [vmem:[%s9899_s4 + $0x198] sm:$0xff]  }
0x1361   : > { %7627 = vmatprep.subr.bf16.mxu1 %v8273_v3 }
0x1364   : > { %7628 = vmatpush3.bf16.msra.mxu1 %v8112_v2  ;;  %v8120_v2 = vld [vmem:[%s9899_s4 + $0x1a0] sm:$0xff]  }
0x1365   : > { %7629 = vmatprep.subr.bf16.mxu1 %v8273_v3 }
0x1368   : > { %7630 = vmatpush3.bf16.msra.mxu1 %v8113_v4  ;;  %v8121_v4 = vld [vmem:[%s9899_s4 + $0x1a8] sm:$0xff]  }
0x1369   : > { %7631 = vmatprep.subr.bf16.mxu1 %v8273_v3 }
0x136c   : > { %7632 = vmatpush3.bf16.msra.mxu1 %v8114_v5  ;;  %v8122_v5 = vld [vmem:[%s9899_s4 + $0x1b0] sm:$0xff]  }
0x136d   : > { %7633 = vmatprep.subr.bf16.mxu1 %v8273_v3 }
0x1370   : > { %7634 = vmatpush3.bf16.msra.mxu1 %v8115_v6  ;;  %v8123_v6 = vld [vmem:[%s9899_s4 + $0x1b8] sm:$0xff]  }
0x1371   : > { %7659 = vmatprep.subr.bf16.mxu1 %v8273_v3 }
0x1373   : > { %7636 = vmatmul.mubr.bf16.vlgmr.msra.gmra.mrb[72].mxu1 %v8474_v28 }
0x1374   : > { %7661 = vmatprep.mubr.msk.bf16.mxu1 %vm8274_vm0, %v8273_v3 }
0x13e6   : > { %v3082_v7 = vpop.f32.mrb[60].mxu1 }
0x13e7   : > { %v9253_v8 = vadd.f32 %v3082_v7, %v9114_v55  ;;  %v7519_v9 = vpop.f32.mrb[61].mxu1  ;;  %v6416_v55 = vld [vmem:[%s9900_s5 + $0x19] ss:$0 sm:$0xff]  ;;  %v8124_v7 = vld [vmem:[%s9899_s4 + $0x680] sm:$0xff]  }
0x13e8   : > { %v3085_v10 = vpop.f32.mrb[62].mxu1  ;;  %v8125_v9 = vld [vmem:[%s9899_s4 + $0x688] sm:$0xff]  }
0x13e9   : > { %v7520_v11 = vpop.f32.mrb[63].mxu1  ;;  %v8126_v10 = vld [vmem:[%s9899_s4 + $0x690] sm:$0xff]  }
0x13ea   : > { %v8127_v11 = vld [vmem:[%s9899_s4 + $0x698] sm:$0xff]  }
0x1406   : > { %v3196_v14 = vpop.f32.mrb[64].mxu1 }
0x1407   : > { %v3197_v15 = vadd.f32 %v6364_v12, %v3196_v14  ;;  %v7539_v17 = vpop.f32.mrb[65].mxu1  ;;  %v8128_v12 = vld [vmem:[%s9899_s4 + $0x6a0] sm:$0xff]   ;;  %v8129_v14 = vld [vmem:[%s9899_s4 + $0x6a8] sm:$0xff]  }
0x1408   : > { %v3199_v18 = vpop.f32.mrb[66].mxu1  ;;  %v8131_v17 = vld [vmem:[%s9899_s4 + $0x6b8] sm:$0xff]  }
0x1409   : > { %v3428_v20 = vpack.c.bf16 %v3197_v15, %v3197_v15  ;;  %v7540_v22 = vpop.f32.mrb[67].mxu1  ;;  %v8130_v15 = vld [vmem:[%s9899_s4 + $0x6b0] sm:$0xff]   ;;  %v8132_v18 = vld [vmem:[%s9899_s4 + $0x440] sm:$0xff]  }
0x140a   : > { %v8134_v22 = vld [vmem:[%s9899_s4 + $0x450] sm:$0xff]  }
0x140b   : > { %7584 = vmatmul.mubr.msk.bf16.vlgmr.msra.gmra.mrb[60].mxu0 %vm942_vm1, %v3428_v20  ;;  %v8133_v20 = vld [vmem:[%s9899_s4 + $0x448] sm:$0xff]  }
0x140c   : > { %7589 = vmatprep.mubr.msk.bf16.mxu0 %vm8274_vm0, %v8273_v3 }
0x1426   : > { %v3422_v23 = vpop.f32.mrb[68].mxu1 }
0x1427   : > { %v3423_v24 = vadd.f32 %v6416_v55, %v3422_v23  ;;  %v7579_v25 = vpop.f32.mrb[69].mxu1  ;;  %v8135_v55 = vld [vmem:[%s9899_s4 + $0x458] sm:$0xff]   ;;  %v8136_v23 = vld [vmem:[%s9899_s4 + $0x460] sm:$0xff]  }
0x1428   : > { %v3425_v26 = vpop.f32.mrb[70].mxu1  ;;  %v8138_v25 = vld [vmem:[%s9899_s4 + $0x470] sm:$0xff]  }
0x1429   : > { %v3430_v29 = vpack.c.bf16 %v3423_v24, %v3423_v24  ;;  %v7580_v30 = vpop.f32.mrb[71].mxu1  ;;  %v8137_v24 = vld [vmem:[%s9899_s4 + $0x468] sm:$0xff]   ;;  %v8139_v26 = vld [vmem:[%s9899_s4 + $0x478] sm:$0xff]  }
0x142b   : > { %v3495_v31 = vsel %vm1006_vm2, %v3430_v29, 0 }
0x142c   : > { %7588 = vmatpush3.bf16.msra.mxu0 %v3495_v31 }
0x142d   : > { %7593 = vmatprep.subr.bf16.mxu0 %v8273_v3 }
0x1446   : > { %v3807_v33 = vpop.f32.mrb[72].mxu1 }
0x1447   : > { %v3808_v19 = vadd.f32 %v6472_v32, %v3807_v33  ;;  %v7637_v34 = vpop.f32.mrb[73].mxu1 }
0x1448   : > { %v3810_v35 = vpop.f32.mrb[74].mxu1 }
0x1449   : > { %v3927_v36 = vpack.c.bf16 %v3808_v19, %v3808_v19  ;;  %v7638_v37 = vpop.f32.mrb[75].mxu1  ;;  %v6446_v19 = vld [vmem:[%s9900_s5 + $0x6] ss:$0 sm:$0xff] }
0x144b   : > { %v3933_v38 = vsel %vm942_vm1, %v3927_v36, 0 }
0x144c   : > { %7660 = vmatpush3.bf16.xpose.msra.mxu1 %v3933_v38 }
0x144d   : > { %7665 = vmatprep.subr.bf16.mxu1 %v8273_v3 }
0x14de   : > { %v3471_v40 = vpop.f32.mrb[60].mxu0 }
0x14df   : > { %v3477_v41 = vmul.f32 0.35355338, %v3471_v40  ;;  %v7585_v42 = vpop.f32.mrb[61].mxu0 }
0x14e0   : > { %v3474_v43 = vpop.f32.mrb[62].mxu0 }
0x14e1   : > { %v7586_v44 = vpop.f32.mrb[63].mxu0  ;;  %v3478_v45 = vsel %vm8573_vm3, %v3477_v41, -1e+30 }
0x14e2   : > { %v3479_v46 = vsel %vm942_vm1, %v3478_v45, -inf }
0x14e3   : > { %3480 = vmax.xlane.f32.xlu0 %v3479_v46 }
0x1570   : > { %v3481_v47 = vpop.xlane.xlu0 %3480 }
0x1571   : > { %v3482_v48 = vsub.f32 %v3478_v45, %v3481_v47 }
0x1573   : > { %v3483_v49 = vmul.f32 1.442695, %v3482_v48  ;;  %v6554_v48 = vld [vmem:[%s9900_s5 + $0x11] ss:$0 sm:$0xff] }
0x1575   : > { %8240 = vpow2.f32 %v3483_v49 }
0x157f   : > { %v8241_v21 = vpop.eup %8240 }
0x1580   : > { %v3485_v50 = vsel %vm942_vm1, %v8241_v21, 0.0 }
0x1581   : > { %3486 = vadd.xlane.f32.xlu1 %v3485_v50 }
0x160e   : > { %v3487_v51 = vpop.xlane.xlu1 %3486 }
0x160f   : > { %8242 = vrcp.f32 %v3487_v51 }
0x1619   : > { %v8243_v52 = vpop.eup %8242 }
0x161a   : > { %v3489_v54 = vmul.f32 %v8243_v52, %v8241_v21 }
0x161c   : > { %v3490_v56 = vpack.c.bf16 %v3489_v54, %v3489_v54 }
0x161e   : > { %7590 = vmatmul.mubr.msk.bf16.vlgmr.msra.gmra.mrb[64].mxu0 %vm942_vm1, %v3490_v56 }
0x161f   : > { %7594 = vmatpush3.bf16.msra.mxu0 %v3544_v57  ;;  %7595 = vmatprep.mubr.msk.bf16.mxu0 %vm8274_vm0, %v8273_v3 }
0x1620   : > { %7599 = vmatprep.subr.bf16.mxu0 %v8273_v3 }
0x16f1   : > { %v3531_v58 = vpop.f32.mrb[64].mxu0 }
0x16f2   : > { %v3537_v60 = vpack.c.bf16 %v3531_v58, %v3531_v58  ;;  %v7591_v61 = vpop.f32.mrb[65].mxu0 }
0x16f3   : > { %v3534_v62 = vpop.f32.mrb[66].mxu0 }
0x16f4   : > { %v7592_v63 = vpop.f32.mrb[67].mxu0  ;;  %7596 = vmatmul.mubr.msk.bf16.vlgmr.msra.gmra.mrb[68].mxu0 %vm942_vm1, %v3537_v60 }
0x16f5   : > { %7600 = vmatpush3.bf16.msra.mxu0 %v8116_v59  ;;  %7615 = vmatprep.mubr.msk.bf16.mxu0 %vm8274_vm0, %v8273_v3 }
0x16f6   : > { %7601 = vmatprep.subr.bf16.mxu0 %v8273_v3 }
0x16f9   : > { %7602 = vmatpush3.bf16.msra.mxu0 %v8117_v0 }
0x16fa   : > { %7603 = vmatprep.subr.bf16.mxu0 %v8273_v3 }
0x16fd   : > { %7604 = vmatpush3.bf16.msra.mxu0 %v8118_v1 }
0x16fe   : > { %7605 = vmatprep.subr.bf16.mxu0 %v8273_v3 }
0x1701   : > { %7606 = vmatpush3.bf16.msra.mxu0 %v8119_v39 }
0x1702   : > { %7607 = vmatprep.subr.bf16.mxu0 %v8273_v3 }
0x1705   : > { %7608 = vmatpush3.bf16.msra.mxu0 %v8120_v2 }
0x1706   : > { %7609 = vmatprep.subr.bf16.mxu0 %v8273_v3 }
0x1709   : > { %7610 = vmatpush3.bf16.msra.mxu0 %v8121_v4 }
0x170a   : > { %7611 = vmatprep.subr.bf16.mxu0 %v8273_v3 }
0x170d   : > { %7612 = vmatpush3.bf16.msra.mxu0 %v8122_v5 }
0x170e   : > { %7613 = vmatprep.subr.bf16.mxu0 %v8273_v3 }
0x1711   : > { %7614 = vmatpush3.bf16.msra.mxu0 %v8123_v6  ;;  %v6509_v6 = vld [vmem:[%s9901_s6 + $0x18] sm:$0xf] }
0x1712   : > { %7639 = vmatprep.subr.bf16.mxu0 %v8273_v3 }
0x1714   : > { %7616 = vmatmul.mubr.bf16.vlgmr.msra.gmra.mrb[72].mxu0 %v8474_v28 }
0x1715   : > { %7640 = vmatpush3.bf16.msra.mxu0 %v8124_v7  ;;  %7655 = vmatprep.mubr.msk.bf16.mxu0 %vm8274_vm0, %v8273_v3 }
0x1716   : > { %7641 = vmatprep.subr.bf16.mxu0 %v8273_v3 }
0x1719   : > { %7642 = vmatpush3.bf16.msra.mxu0 %v8125_v9 }
0x171a   : > { %7643 = vmatprep.subr.bf16.mxu0 %v8273_v3 }
0x171d   : > { %7644 = vmatpush3.bf16.msra.mxu0 %v8126_v10  ;;  %v4042_v10 = vsel %vm1006_vm2, %v6509_v6, 0 }
0x171e   : > { %7645 = vmatprep.subr.bf16.mxu0 %v8273_v3 }
0x1721   : > { %7646 = vmatpush3.bf16.msra.mxu0 %v8127_v11 }
0x1722   : > { %7647 = vmatprep.subr.bf16.mxu0 %v8273_v3 }
0x1725   : > { %7648 = vmatpush3.bf16.msra.mxu0 %v8128_v12  ;;  %v8140_v12 = vld [vmem:[%s9899_s4 + $0x1c0] sm:$0xff]  }
0x1726   : > { %7649 = vmatprep.subr.bf16.mxu0 %v8273_v3 }
0x1729   : > { %7650 = vmatpush3.bf16.msra.mxu0 %v8129_v14 }
0x172a   : > { %7651 = vmatprep.subr.bf16.mxu0 %v8273_v3 }
0x172d   : > { %7652 = vmatpush3.bf16.msra.mxu0 %v8130_v15 }
0x172e   : > { %7653 = vmatprep.subr.bf16.mxu0 %v8273_v3 }
0x1731   : > { %7654 = vmatpush3.bf16.msra.mxu0 %v8131_v17 }
0x1732   : > { %7697 = vmatprep.subr.bf16.mxu0 %v8273_v3 }
0x1734   : > { %7656 = vmatmul.mubr.bf16.vlgmr.msra.gmra.mrb[76].mxu0 %v8474_v28 }
0x1735   : > { %7698 = vmatpush3.bf16.msra.mxu0 %v8132_v18  ;;  %7713 = vmatprep.mubr.msk.bf16.mxu0 %vm8274_vm0, %v8273_v3 }
0x1736   : > { %7699 = vmatprep.subr.bf16.mxu0 %v8273_v3 }
0x1739   : > { %7700 = vmatpush3.bf16.msra.mxu0 %v8133_v20  ;;  %v8141_v20 = vld [vmem:[%s9899_s4 + $0x1c8] sm:$0xff]  }
0x173a   : > { %7701 = vmatprep.subr.bf16.mxu0 %v8273_v3 }
0x173d   : > { %7702 = vmatpush3.bf16.msra.mxu0 %v8134_v22  ;;  %v8142_v22 = vld [vmem:[%s9899_s4 + $0x1d0] sm:$0xff]  }
0x173e   : > { %7703 = vmatprep.subr.bf16.mxu0 %v8273_v3 }
0x1741   : > { %7704 = vmatpush3.bf16.msra.mxu0 %v8135_v55  ;;  %v8143_v55 = vld [vmem:[%s9899_s4 + $0x1d8] sm:$0xff]  }
0x1742   : > { %7705 = vmatprep.subr.bf16.mxu0 %v8273_v3 }
0x1745   : > { %7706 = vmatpush3.bf16.msra.mxu0 %v8136_v23  ;;  %v8144_v23 = vld [vmem:[%s9899_s4 + $0x1e0] sm:$0xff]  }
0x1746   : > { %7707 = vmatprep.subr.bf16.mxu0 %v8273_v3 }
0x1749   : > { %7708 = vmatpush3.bf16.msra.mxu0 %v8137_v24  ;;  %v8145_v24 = vld [vmem:[%s9899_s4 + $0x1e8] sm:$0xff]  }
0x174a   : > { %7709 = vmatprep.subr.bf16.mxu0 %v8273_v3 }
0x174d   : > { %7710 = vmatpush3.bf16.msra.mxu0 %v8138_v25  ;;  %v8146_v25 = vld [vmem:[%s9899_s4 + $0x1f0] sm:$0xff]  }
0x174e   : > { %7711 = vmatprep.subr.bf16.mxu0 %v8273_v3 }
0x1751   : > { %7712 = vmatpush3.bf16.msra.mxu0 %v8139_v26  ;;  %v8147_v26 = vld [vmem:[%s9899_s4 + $0x1f8] sm:$0xff]  }
0x1752   : > { %7737 = vmatprep.subr.bf16.mxu0 %v8273_v3 }
0x1754   : > { %7714 = vmatmul.mubr.bf16.vlgmr.msra.gmra.mrb[80].mxu0 %v8474_v28 }
0x1755   : > { %7739 = vmatprep.mubr.msk.bf16.mxu0 %vm8274_vm0, %v8273_v3 }
0x17c7   : > { %v3580_v29 = vpop.f32.mrb[68].mxu0 }
0x17c8   : > { %v9392_v30 = vadd.f32 %v3580_v29, %v9253_v8  ;;  %v7597_v31 = vpop.f32.mrb[69].mxu0  ;;  %v6498_v8 = vld [vmem:[%s9900_s5 + $0x1a] ss:$0 sm:$0xff]  ;;  %v8148_v29 = vld [vmem:[%s9899_s4 + $0x6c0] sm:$0xff]  }
0x17c9   : > { %v3583_v32 = vpop.f32.mrb[70].mxu0  ;;  %v8149_v31 = vld [vmem:[%s9899_s4 + $0x6c8] sm:$0xff]  }
0x17ca   : > { %v7598_v33 = vpop.f32.mrb[71].mxu0  ;;  %v8150_v32 = vld [vmem:[%s9899_s4 + $0x6d0] sm:$0xff]  }
0x17cb   : > { %v8151_v33 = vld [vmem:[%s9899_s4 + $0x6d8] sm:$0xff]  }
0x17e7   : > { %v3694_v34 = vpop.f32.mrb[72].mxu0 }
0x17e8   : > { %v3695_v35 = vadd.f32 %v6446_v19, %v3694_v34  ;;  %v7617_v36 = vpop.f32.mrb[73].mxu0  ;;  %v8152_v19 = vld [vmem:[%s9899_s4 + $0x6e0] sm:$0xff]   ;;  %v8153_v34 = vld [vmem:[%s9899_s4 + $0x6e8] sm:$0xff]  }
0x17e9   : > { %v3697_v37 = vpop.f32.mrb[74].mxu0  ;;  %v8155_v36 = vld [vmem:[%s9899_s4 + $0x6f8] sm:$0xff]  }
0x17ea   : > { %v3926_v38 = vpack.c.bf16 %v3695_v35, %v3695_v35  ;;  %v7618_v40 = vpop.f32.mrb[75].mxu0  ;;  %v8154_v35 = vld [vmem:[%s9899_s4 + $0x6f0] sm:$0xff]   ;;  %v8156_v37 = vld [vmem:[%s9899_s4 + $0x480] sm:$0xff]  }
0x17eb   : > { %v8158_v40 = vld [vmem:[%s9899_s4 + $0x490] sm:$0xff]  }
0x17ec   : > { %7662 = vmatmul.mubr.msk.bf16.vlgmr.msra.gmra.mrb[76].mxu1 %vm942_vm1, %v3926_v38  ;;  %v8157_v38 = vld [vmem:[%s9899_s4 + $0x488] sm:$0xff]  }
0x17ed   : > { %7667 = vmatprep.mubr.msk.bf16.mxu1 %vm8274_vm0, %v8273_v3 }
0x1807   : > { %v3920_v41 = vpop.f32.mrb[76].mxu0 }
0x1808   : > { %v3921_v42 = vadd.f32 %v6498_v8, %v3920_v41  ;;  %v7657_v43 = vpop.f32.mrb[77].mxu0  ;;  %v8159_v8 = vld [vmem:[%s9899_s4 + $0x498] sm:$0xff]   ;;  %v8160_v41 = vld [vmem:[%s9899_s4 + $0x4a0] sm:$0xff]  }
0x1809   : > { %v3923_v44 = vpop.f32.mrb[78].mxu0  ;;  %v8162_v43 = vld [vmem:[%s9899_s4 + $0x4b0] sm:$0xff]  }
0x180a   : > { %v3928_v45 = vpack.c.bf16 %v3921_v42, %v3921_v42  ;;  %v7658_v46 = vpop.f32.mrb[79].mxu0  ;;  %v8161_v42 = vld [vmem:[%s9899_s4 + $0x4a8] sm:$0xff]   ;;  %v8163_v44 = vld [vmem:[%s9899_s4 + $0x4b8] sm:$0xff]  }
0x180c   : > { %v3993_v47 = vsel %vm1006_vm2, %v3928_v45, 0 }
0x180d   : > { %7666 = vmatpush3.bf16.msra.mxu1 %v3993_v47 }
0x180e   : > { %7671 = vmatprep.subr.bf16.mxu1 %v8273_v3 }
0x1827   : > { %v4305_v49 = vpop.f32.mrb[80].mxu0 }
0x1828   : > { %v4306_v21 = vadd.f32 %v6554_v48, %v4305_v49  ;;  %v7715_v50 = vpop.f32.mrb[81].mxu0 }
0x1829   : > { %v4308_v51 = vpop.f32.mrb[82].mxu0 }
0x182a   : > { %v4425_v52 = vpack.c.bf16 %v4306_v21, %v4306_v21  ;;  %v7716_v53 = vpop.f32.mrb[83].mxu0  ;;  %v6528_v21 = vld [vmem:[%s9900_s5 + $0x7] ss:$0 sm:$0xff] }
0x182c   : > { %v4431_v54 = vsel %vm942_vm1, %v4425_v52, 0 }
0x182d   : > { %7738 = vmatpush3.bf16.xpose.msra.mxu0 %v4431_v54 }
0x182e   : > { %7743 = vmatprep.subr.bf16.mxu0 %v8273_v3 }
0x18bf   : > { %v3969_v56 = vpop.f32.mrb[76].mxu1 }
0x18c0   : > { %v3975_v57 = vmul.f32 0.35355338, %v3969_v56  ;;  %v7663_v58 = vpop.f32.mrb[77].mxu1 }
0x18c1   : > { %v3972_v59 = vpop.f32.mrb[78].mxu1 }
0x18c2   : > { %v7664_v60 = vpop.f32.mrb[79].mxu1  ;;  %v3976_v61 = vsel %vm8573_vm3, %v3975_v57, -1e+30 }
0x18c3   : > { %v3977_v62 = vsel %vm942_vm1, %v3976_v61, -inf }
0x18c4   : > { %3978 = vmax.xlane.f32.xlu0 %v3977_v62 }
0x1951   : > { %v3979_v63 = vpop.xlane.xlu0 %3978 }
0x1952   : > { %v3980_v0 = vsub.f32 %v3976_v61, %v3979_v63 }
0x1954   : > { %v3981_v1 = vmul.f32 1.442695, %v3980_v0  ;;  %v6636_v0 = vld [vmem:[%s9900_s5 + $0x12] ss:$0 sm:$0xff] }
0x1956   : > { %8244 = vpow2.f32 %v3981_v1 }
0x1960   : > { %v8245_v39 = vpop.eup %8244 }
0x1961   : > { %v3983_v2 = vsel %vm942_vm1, %v8245_v39, 0.0 }
0x1962   : > { %3984 = vadd.xlane.f32.xlu1 %v3983_v2 }
0x19ef   : > { %v3985_v4 = vpop.xlane.xlu1 %3984 }
0x19f0   : > { %8246 = vrcp.f32 %v3985_v4 }
0x19fa   : > { %v8247_v5 = vpop.eup %8246 }
0x19fb   : > { %v3987_v7 = vmul.f32 %v8247_v5, %v8245_v39 }
0x19fd   : > { %v3988_v9 = vpack.c.bf16 %v3987_v7, %v3987_v7 }
0x19ff   : > { %7668 = vmatmul.mubr.msk.bf16.vlgmr.msra.gmra.mrb[80].mxu1 %vm942_vm1, %v3988_v9 }
0x1a00   : > { %7672 = vmatpush3.bf16.msra.mxu1 %v4042_v10  ;;  %7673 = vmatprep.mubr.msk.bf16.mxu1 %vm8274_vm0, %v8273_v3 }
0x1a01   : > { %7677 = vmatprep.subr.bf16.mxu1 %v8273_v3 }
0x1ad2   : > { %v4029_v11 = vpop.f32.mrb[80].mxu1 }
0x1ad3   : > { %v4035_v14 = vpack.c.bf16 %v4029_v11, %v4029_v11  ;;  %v7669_v15 = vpop.f32.mrb[81].mxu1 }
0x1ad4   : > { %v4032_v17 = vpop.f32.mrb[82].mxu1 }
0x1ad5   : > { %v7670_v18 = vpop.f32.mrb[83].mxu1  ;;  %7674 = vmatmul.mubr.msk.bf16.vlgmr.msra.gmra.mrb[84].mxu1 %vm942_vm1, %v4035_v14 }
0x1ad6   : > { %7678 = vmatpush3.bf16.msra.mxu1 %v8140_v12  ;;  %7693 = vmatprep.mubr.msk.bf16.mxu1 %vm8274_vm0, %v8273_v3 }
0x1ad7   : > { %7679 = vmatprep.subr.bf16.mxu1 %v8273_v3 }
0x1ada   : > { %7680 = vmatpush3.bf16.msra.mxu1 %v8141_v20 }
0x1adb   : > { %7681 = vmatprep.subr.bf16.mxu1 %v8273_v3 }
0x1ade   : > { %7682 = vmatpush3.bf16.msra.mxu1 %v8142_v22 }
0x1adf   : > { %7683 = vmatprep.subr.bf16.mxu1 %v8273_v3 }
0x1ae2   : > { %7684 = vmatpush3.bf16.msra.mxu1 %v8143_v55 }
0x1ae3   : > { %7685 = vmatprep.subr.bf16.mxu1 %v8273_v3 }
0x1ae6   : > { %7686 = vmatpush3.bf16.msra.mxu1 %v8144_v23 }
0x1ae7   : > { %7687 = vmatprep.subr.bf16.mxu1 %v8273_v3 }
0x1aea   : > { %7688 = vmatpush3.bf16.msra.mxu1 %v8145_v24 }
0x1aeb   : > { %7689 = vmatprep.subr.bf16.mxu1 %v8273_v3 }
0x1aee   : > { %7690 = vmatpush3.bf16.msra.mxu1 %v8146_v25 }
0x1aef   : > { %7691 = vmatprep.subr.bf16.mxu1 %v8273_v3 }
0x1af2   : > { %7692 = vmatpush3.bf16.msra.mxu1 %v8147_v26  ;;  %v6591_v26 = vld [vmem:[%s9901_s6 + $0x1c] sm:$0xf] }
0x1af3   : > { %7717 = vmatprep.subr.bf16.mxu1 %v8273_v3 }
0x1af5   : > { %7694 = vmatmul.mubr.bf16.vlgmr.msra.gmra.mrb[88].mxu1 %v8474_v28 }
0x1af6   : > { %7718 = vmatpush3.bf16.msra.mxu1 %v8148_v29  ;;  %7733 = vmatprep.mubr.msk.bf16.mxu1 %vm8274_vm0, %v8273_v3 }
0x1af7   : > { %7719 = vmatprep.subr.bf16.mxu1 %v8273_v3 }
0x1afa   : > { %7720 = vmatpush3.bf16.msra.mxu1 %v8149_v31 }
0x1afb   : > { %7721 = vmatprep.subr.bf16.mxu1 %v8273_v3 }
0x1afe   : > { %7722 = vmatpush3.bf16.msra.mxu1 %v8150_v32  ;;  %v4540_v32 = vsel %vm1006_vm2, %v6591_v26, 0 }
0x1aff   : > { %7723 = vmatprep.subr.bf16.mxu1 %v8273_v3 }
0x1b02   : > { %7724 = vmatpush3.bf16.msra.mxu1 %v8151_v33 }
0x1b03   : > { %7725 = vmatprep.subr.bf16.mxu1 %v8273_v3 }
0x1b06   : > { %7726 = vmatpush3.bf16.msra.mxu1 %v8152_v19  ;;  %v8164_v19 = vld [vmem:[%s9899_s4 + $0x200] sm:$0xff]  }
0x1b07   : > { %7727 = vmatprep.subr.bf16.mxu1 %v8273_v3 }
0x1b0a   : > { %7728 = vmatpush3.bf16.msra.mxu1 %v8153_v34 }
0x1b0b   : > { %7729 = vmatprep.subr.bf16.mxu1 %v8273_v3 }
0x1b0e   : > { %7730 = vmatpush3.bf16.msra.mxu1 %v8154_v35 }
0x1b0f   : > { %7731 = vmatprep.subr.bf16.mxu1 %v8273_v3 }
0x1b12   : > { %7732 = vmatpush3.bf16.msra.mxu1 %v8155_v36 }
0x1b13   : > { %7775 = vmatprep.subr.bf16.mxu1 %v8273_v3 }
0x1b15   : > { %7734 = vmatmul.mubr.bf16.vlgmr.msra.gmra.mrb[92].mxu1 %v8474_v28 }
0x1b16   : > { %7776 = vmatpush3.bf16.msra.mxu1 %v8156_v37  ;;  %7791 = vmatprep.mubr.msk.bf16.mxu1 %vm8274_vm0, %v8273_v3 }
0x1b17   : > { %7777 = vmatprep.subr.bf16.mxu1 %v8273_v3 }
0x1b1a   : > { %7778 = vmatpush3.bf16.msra.mxu1 %v8157_v38  ;;  %v8165_v38 = vld [vmem:[%s9899_s4 + $0x208] sm:$0xff]  }
0x1b1b   : > { %7779 = vmatprep.subr.bf16.mxu1 %v8273_v3 }
0x1b1e   : > { %7780 = vmatpush3.bf16.msra.mxu1 %v8158_v40  ;;  %v8166_v40 = vld [vmem:[%s9899_s4 + $0x210] sm:$0xff]  }
0x1b1f   : > { %7781 = vmatprep.subr.bf16.mxu1 %v8273_v3 }
0x1b22   : > { %7782 = vmatpush3.bf16.msra.mxu1 %v8159_v8  ;;  %v8167_v8 = vld [vmem:[%s9899_s4 + $0x218] sm:$0xff]  }
0x1b23   : > { %7783 = vmatprep.subr.bf16.mxu1 %v8273_v3 }
0x1b26   : > { %7784 = vmatpush3.bf16.msra.mxu1 %v8160_v41  ;;  %v8168_v41 = vld [vmem:[%s9899_s4 + $0x220] sm:$0xff]  }
0x1b27   : > { %7785 = vmatprep.subr.bf16.mxu1 %v8273_v3 }
0x1b2a   : > { %7786 = vmatpush3.bf16.msra.mxu1 %v8161_v42  ;;  %v8169_v42 = vld [vmem:[%s9899_s4 + $0x228] sm:$0xff]  }
0x1b2b   : > { %7787 = vmatprep.subr.bf16.mxu1 %v8273_v3 }
0x1b2e   : > { %7788 = vmatpush3.bf16.msra.mxu1 %v8162_v43  ;;  %v8170_v43 = vld [vmem:[%s9899_s4 + $0x230] sm:$0xff]  }
0x1b2f   : > { %7789 = vmatprep.subr.bf16.mxu1 %v8273_v3 }
0x1b32   : > { %7790 = vmatpush3.bf16.msra.mxu1 %v8163_v44  ;;  %v8171_v44 = vld [vmem:[%s9899_s4 + $0x238] sm:$0xff]  }
0x1b33   : > { %7815 = vmatprep.subr.bf16.mxu1 %v8273_v3 }
0x1b35   : > { %7792 = vmatmul.mubr.bf16.vlgmr.msra.gmra.mrb[96].mxu1 %v8474_v28 }
0x1b36   : > { %7817 = vmatprep.mubr.msk.bf16.mxu1 %vm8274_vm0, %v8273_v3 }
0x1ba8   : > { %v4078_v45 = vpop.f32.mrb[84].mxu1 }
0x1ba9   : > { %v9531_v46 = vadd.f32 %v4078_v45, %v9392_v30  ;;  %v7675_v47 = vpop.f32.mrb[85].mxu1  ;;  %v6580_v30 = vld [vmem:[%s9900_s5 + $0x1b] ss:$0 sm:$0xff]  ;;  %v8172_v45 = vld [vmem:[%s9899_s4 + $0x700] sm:$0xff]  }
0x1baa   : > { %v4081_v48 = vpop.f32.mrb[86].mxu1  ;;  %v8173_v47 = vld [vmem:[%s9899_s4 + $0x708] sm:$0xff]  }
0x1bab   : > { %v7676_v49 = vpop.f32.mrb[87].mxu1  ;;  %v8174_v48 = vld [vmem:[%s9899_s4 + $0x710] sm:$0xff]  }
0x1bac   : > { %v8175_v49 = vld [vmem:[%s9899_s4 + $0x718] sm:$0xff]  }
0x1bc8   : > { %v4192_v50 = vpop.f32.mrb[88].mxu1 }
0x1bc9   : > { %v4193_v51 = vadd.f32 %v6528_v21, %v4192_v50  ;;  %v7695_v52 = vpop.f32.mrb[89].mxu1  ;;  %v8176_v21 = vld [vmem:[%s9899_s4 + $0x720] sm:$0xff]   ;;  %v8177_v50 = vld [vmem:[%s9899_s4 + $0x728] sm:$0xff]  }
0x1bca   : > { %v4195_v53 = vpop.f32.mrb[90].mxu1  ;;  %v8179_v52 = vld [vmem:[%s9899_s4 + $0x738] sm:$0xff]  }
0x1bcb   : > { %v4424_v54 = vpack.c.bf16 %v4193_v51, %v4193_v51  ;;  %v7696_v56 = vpop.f32.mrb[91].mxu1  ;;  %v8178_v51 = vld [vmem:[%s9899_s4 + $0x730] sm:$0xff]   ;;  %v8180_v53 = vld [vmem:[%s9899_s4 + $0x4c0] sm:$0xff]  }
0x1bcc   : > { %v8182_v56 = vld [vmem:[%s9899_s4 + $0x4d0] sm:$0xff]  }
0x1bcd   : > { %7740 = vmatmul.mubr.msk.bf16.vlgmr.msra.gmra.mrb[84].mxu0 %vm942_vm1, %v4424_v54  ;;  %v8181_v54 = vld [vmem:[%s9899_s4 + $0x4c8] sm:$0xff]  }
0x1bce   : > { %7745 = vmatprep.mubr.msk.bf16.mxu0 %vm8274_vm0, %v8273_v3 }
0x1be8   : > { %v4418_v57 = vpop.f32.mrb[92].mxu1 }
0x1be9   : > { %v4419_v58 = vadd.f32 %v6580_v30, %v4418_v57  ;;  %v7735_v59 = vpop.f32.mrb[93].mxu1  ;;  %v8183_v30 = vld [vmem:[%s9899_s4 + $0x4d8] sm:$0xff]   ;;  %v8184_v57 = vld [vmem:[%s9899_s4 + $0x4e0] sm:$0xff]  }
0x1bea   : > { %v4421_v60 = vpop.f32.mrb[94].mxu1  ;;  %v8186_v59 = vld [vmem:[%s9899_s4 + $0x4f0] sm:$0xff]  }
0x1beb   : > { %v4426_v61 = vpack.c.bf16 %v4419_v58, %v4419_v58  ;;  %v7736_v62 = vpop.f32.mrb[95].mxu1  ;;  %v8185_v58 = vld [vmem:[%s9899_s4 + $0x4e8] sm:$0xff]   ;;  %v8187_v60 = vld [vmem:[%s9899_s4 + $0x4f8] sm:$0xff]  }
0x1bed   : > { %v4491_v63 = vsel %vm1006_vm2, %v4426_v61, 0 }
0x1bee   : > { %7744 = vmatpush3.bf16.msra.mxu0 %v4491_v63 }
0x1bef   : > { %7749 = vmatprep.subr.bf16.mxu0 %v8273_v3 }
0x1c08   : > { %v4803_v1 = vpop.f32.mrb[96].mxu1 }
0x1c09   : > { %v4804_v39 = vadd.f32 %v6636_v0, %v4803_v1  ;;  %v7793_v2 = vpop.f32.mrb[97].mxu1 }
0x1c0a   : > { %v4806_v4 = vpop.f32.mrb[98].mxu1 }
0x1c0b   : > { %v4923_v5 = vpack.c.bf16 %v4804_v39, %v4804_v39  ;;  %v7794_v6 = vpop.f32.mrb[99].mxu1  ;;  %v6610_v39 = vld [vmem:[%s9900_s5 + $0x8] ss:$0 sm:$0xff] }
0x1c0d   : > { %v4929_v7 = vsel %vm942_vm1, %v4923_v5, 0 }
0x1c0e   : > { %7816 = vmatpush3.bf16.xpose.msra.mxu1 %v4929_v7 }
0x1c0f   : > { %7821 = vmatprep.subr.bf16.mxu1 %v8273_v3 }
0x1ca0   : > { %v4467_v9 = vpop.f32.mrb[84].mxu0 }
0x1ca1   : > { %v4473_v10 = vmul.f32 0.35355338, %v4467_v9  ;;  %v7741_v11 = vpop.f32.mrb[85].mxu0 }
0x1ca2   : > { %v4470_v12 = vpop.f32.mrb[86].mxu0 }
0x1ca3   : > { %v7742_v14 = vpop.f32.mrb[87].mxu0  ;;  %v4474_v15 = vsel %vm8573_vm3, %v4473_v10, -1e+30 }
0x1ca4   : > { %v4475_v17 = vsel %vm942_vm1, %v4474_v15, -inf }
0x1ca5   : > { %4476 = vmax.xlane.f32.xlu0 %v4475_v17 }
0x1d32   : > { %v4477_v18 = vpop.xlane.xlu0 %4476 }
0x1d33   : > { %v4478_v20 = vsub.f32 %v4474_v15, %v4477_v18 }
0x1d35   : > { %v4479_v22 = vmul.f32 1.442695, %v4478_v20  ;;  %v6718_v20 = vld [vmem:[%s9900_s5 + $0x13] ss:$0 sm:$0xff] }
0x1d37   : > { %8248 = vpow2.f32 %v4479_v22 }
0x1d41   : > { %v8249_v55 = vpop.eup %8248 }
0x1d42   : > { %v4481_v23 = vsel %vm942_vm1, %v8249_v55, 0.0 }
0x1d43   : > { %4482 = vadd.xlane.f32.xlu1 %v4481_v23 }
0x1dd0   : > { %v4483_v24 = vpop.xlane.xlu1 %4482 }
0x1dd1   : > { %8250 = vrcp.f32 %v4483_v24 }
0x1ddb   : > { %v8251_v25 = vpop.eup %8250 }
0x1ddc   : > { %v4485_v29 = vmul.f32 %v8251_v25, %v8249_v55 }
0x1dde   : > { %v4486_v31 = vpack.c.bf16 %v4485_v29, %v4485_v29 }
0x1de0   : > { %7746 = vmatmul.mubr.msk.bf16.vlgmr.msra.gmra.mrb[88].mxu0 %vm942_vm1, %v4486_v31 }
0x1de1   : > { %7750 = vmatpush3.bf16.msra.mxu0 %v4540_v32  ;;  %7751 = vmatprep.mubr.msk.bf16.mxu0 %vm8274_vm0, %v8273_v3 }
0x1de2   : > { %7755 = vmatprep.subr.bf16.mxu0 %v8273_v3 }
0x1eb3   : > { %v4527_v33 = vpop.f32.mrb[88].mxu0 }
0x1eb4   : > { %v4533_v34 = vpack.c.bf16 %v4527_v33, %v4527_v33  ;;  %v7747_v35 = vpop.f32.mrb[89].mxu0 }
0x1eb5   : > { %v4530_v36 = vpop.f32.mrb[90].mxu0 }
0x1eb6   : > { %v7748_v37 = vpop.f32.mrb[91].mxu0  ;;  %7752 = vmatmul.mubr.msk.bf16.vlgmr.msra.gmra.mrb[92].mxu0 %vm942_vm1, %v4533_v34 }
0x1eb7   : > { %7756 = vmatpush3.bf16.msra.mxu0 %v8164_v19  ;;  %7771 = vmatprep.mubr.msk.bf16.mxu0 %vm8274_vm0, %v8273_v3 }
0x1eb8   : > { %7757 = vmatprep.subr.bf16.mxu0 %v8273_v3 }
0x1ebb   : > { %7758 = vmatpush3.bf16.msra.mxu0 %v8165_v38 }
0x1ebc   : > { %7759 = vmatprep.subr.bf16.mxu0 %v8273_v3 }
0x1ebf   : > { %7760 = vmatpush3.bf16.msra.mxu0 %v8166_v40 }
0x1ec0   : > { %7761 = vmatprep.subr.bf16.mxu0 %v8273_v3 }
0x1ec3   : > { %7762 = vmatpush3.bf16.msra.mxu0 %v8167_v8 }
0x1ec4   : > { %7763 = vmatprep.subr.bf16.mxu0 %v8273_v3 }
0x1ec7   : > { %7764 = vmatpush3.bf16.msra.mxu0 %v8168_v41 }
0x1ec8   : > { %7765 = vmatprep.subr.bf16.mxu0 %v8273_v3 }
0x1ecb   : > { %7766 = vmatpush3.bf16.msra.mxu0 %v8169_v42 }
0x1ecc   : > { %7767 = vmatprep.subr.bf16.mxu0 %v8273_v3 }
0x1ecf   : > { %7768 = vmatpush3.bf16.msra.mxu0 %v8170_v43 }
0x1ed0   : > { %7769 = vmatprep.subr.bf16.mxu0 %v8273_v3 }
0x1ed3   : > { %7770 = vmatpush3.bf16.msra.mxu0 %v8171_v44  ;;  %v6673_v44 = vld [vmem:[%s9901_s6 + $0x20] sm:$0xf] }
0x1ed4   : > { %7795 = vmatprep.subr.bf16.mxu0 %v8273_v3 }
0x1ed6   : > { %7772 = vmatmul.mubr.bf16.vlgmr.msra.gmra.mrb[96].mxu0 %v8474_v28 }
0x1ed7   : > { %7796 = vmatpush3.bf16.msra.mxu0 %v8172_v45  ;;  %7811 = vmatprep.mubr.msk.bf16.mxu0 %vm8274_vm0, %v8273_v3 }
0x1ed8   : > { %7797 = vmatprep.subr.bf16.mxu0 %v8273_v3 }
0x1edb   : > { %7798 = vmatpush3.bf16.msra.mxu0 %v8173_v47 }
0x1edc   : > { %7799 = vmatprep.subr.bf16.mxu0 %v8273_v3 }
0x1edf   : > { %7800 = vmatpush3.bf16.msra.mxu0 %v8174_v48  ;;  %v5038_v48 = vsel %vm1006_vm2, %v6673_v44, 0 }
0x1ee0   : > { %7801 = vmatprep.subr.bf16.mxu0 %v8273_v3 }
0x1ee3   : > { %7802 = vmatpush3.bf16.msra.mxu0 %v8175_v49 }
0x1ee4   : > { %7803 = vmatprep.subr.bf16.mxu0 %v8273_v3 }
0x1ee7   : > { %7804 = vmatpush3.bf16.msra.mxu0 %v8176_v21  ;;  %v8188_v21 = vld [vmem:[%s9899_s4 + $0x240] sm:$0xff]  }
0x1ee8   : > { %7805 = vmatprep.subr.bf16.mxu0 %v8273_v3 }
0x1eeb   : > { %7806 = vmatpush3.bf16.msra.mxu0 %v8177_v50 }
0x1eec   : > { %7807 = vmatprep.subr.bf16.mxu0 %v8273_v3 }
0x1eef   : > { %7808 = vmatpush3.bf16.msra.mxu0 %v8178_v51 }
0x1ef0   : > { %7809 = vmatprep.subr.bf16.mxu0 %v8273_v3 }
0x1ef3   : > { %7810 = vmatpush3.bf16.msra.mxu0 %v8179_v52 }
0x1ef4   : > { %7853 = vmatprep.subr.bf16.mxu0 %v8273_v3 }
0x1ef6   : > { %7812 = vmatmul.mubr.bf16.vlgmr.msra.gmra.mrb[100].mxu0 %v8474_v28 }
0x1ef7   : > { %7854 = vmatpush3.bf16.msra.mxu0 %v8180_v53  ;;  %7869 = vmatprep.mubr.msk.bf16.mxu0 %vm8274_vm0, %v8273_v3 }
0x1ef8   : > { %7855 = vmatprep.subr.bf16.mxu0 %v8273_v3 }
0x1efb   : > { %7856 = vmatpush3.bf16.msra.mxu0 %v8181_v54  ;;  %v8189_v54 = vld [vmem:[%s9899_s4 + $0x248] sm:$0xff]  }
0x1efc   : > { %7857 = vmatprep.subr.bf16.mxu0 %v8273_v3 }
0x1eff   : > { %7858 = vmatpush3.bf16.msra.mxu0 %v8182_v56  ;;  %v8190_v56 = vld [vmem:[%s9899_s4 + $0x250] sm:$0xff]  }
0x1f00   : > { %7859 = vmatprep.subr.bf16.mxu0 %v8273_v3 }
0x1f03   : > { %7860 = vmatpush3.bf16.msra.mxu0 %v8183_v30  ;;  %v8191_v30 = vld [vmem:[%s9899_s4 + $0x258] sm:$0xff]  }
0x1f04   : > { %7861 = vmatprep.subr.bf16.mxu0 %v8273_v3 }
0x1f07   : > { %7862 = vmatpush3.bf16.msra.mxu0 %v8184_v57  ;;  %v8192_v57 = vld [vmem:[%s9899_s4 + $0x260] sm:$0xff]  }
0x1f08   : > { %7863 = vmatprep.subr.bf16.mxu0 %v8273_v3 }
0x1f0b   : > { %7864 = vmatpush3.bf16.msra.mxu0 %v8185_v58  ;;  %v8193_v58 = vld [vmem:[%s9899_s4 + $0x268] sm:$0xff]  }
0x1f0c   : > { %7865 = vmatprep.subr.bf16.mxu0 %v8273_v3 }
0x1f0f   : > { %7866 = vmatpush3.bf16.msra.mxu0 %v8186_v59  ;;  %v8194_v59 = vld [vmem:[%s9899_s4 + $0x270] sm:$0xff]  }
0x1f10   : > { %7867 = vmatprep.subr.bf16.mxu0 %v8273_v3 }
0x1f13   : > { %7868 = vmatpush3.bf16.msra.mxu0 %v8187_v60  ;;  %v8195_v60 = vld [vmem:[%s9899_s4 + $0x278] sm:$0xff]  }
0x1f14   : > { %7893 = vmatprep.subr.bf16.mxu0 %v8273_v3 }
0x1f16   : > { %7870 = vmatmul.mubr.bf16.vlgmr.msra.gmra.mrb[104].mxu0 %v8474_v28 }
0x1f17   : > { %7895 = vmatprep.mubr.msk.bf16.mxu0 %vm8274_vm0, %v8273_v3 }
0x1f89   : > { %v4576_v61 = vpop.f32.mrb[92].mxu0 }
0x1f8a   : > { %v9670_v62 = vadd.f32 %v4576_v61, %v9531_v46  ;;  %v7753_v63 = vpop.f32.mrb[93].mxu0  ;;  %v6662_v46 = vld [vmem:[%s9900_s5 + $0x1c] ss:$0 sm:$0xff]  ;;  %v8196_v61 = vld [vmem:[%s9899_s4 + $0x740] sm:$0xff]  }
0x1f8b   : > { %v4579_v0 = vpop.f32.mrb[94].mxu0  ;;  %v8197_v63 = vld [vmem:[%s9899_s4 + $0x748] sm:$0xff]  }
0x1f8c   : > { %v7754_v1 = vpop.f32.mrb[95].mxu0  ;;  %v8198_v0 = vld [vmem:[%s9899_s4 + $0x750] sm:$0xff]  }
0x1f8d   : > { %v8199_v1 = vld [vmem:[%s9899_s4 + $0x758] sm:$0xff]  }
0x1fa9   : > { %v4690_v2 = vpop.f32.mrb[96].mxu0 }
0x1faa   : > { %v4691_v4 = vadd.f32 %v6610_v39, %v4690_v2  ;;  %v7773_v5 = vpop.f32.mrb[97].mxu0  ;;  %v8200_v39 = vld [vmem:[%s9899_s4 + $0x760] sm:$0xff]   ;;  %v8201_v2 = vld [vmem:[%s9899_s4 + $0x768] sm:$0xff]  }
0x1fab   : > { %v4693_v6 = vpop.f32.mrb[98].mxu0  ;;  %v8203_v5 = vld [vmem:[%s9899_s4 + $0x778] sm:$0xff]  }
0x1fac   : > { %v4922_v7 = vpack.c.bf16 %v4691_v4, %v4691_v4  ;;  %v7774_v9 = vpop.f32.mrb[99].mxu0  ;;  %v8202_v4 = vld [vmem:[%s9899_s4 + $0x770] sm:$0xff]  }
0x1fae   : > { %7818 = vmatmul.mubr.msk.bf16.vlgmr.msra.gmra.mrb[100].mxu1 %vm942_vm1, %v4922_v7 }
0x1faf   : > { %7823 = vmatprep.mubr.msk.bf16.mxu1 %vm8274_vm0, %v8273_v3 }
0x1fc9   : > { %v4916_v10 = vpop.f32.mrb[100].mxu0 }
0x1fca   : > { %v4917_v11 = vadd.f32 %v6662_v46, %v4916_v10  ;;  %v7813_v12 = vpop.f32.mrb[101].mxu0 }
0x1fcb   : > { %v4919_v14 = vpop.f32.mrb[102].mxu0 }
0x1fcc   : > { %v4924_v15 = vpack.c.bf16 %v4917_v11, %v4917_v11  ;;  %v7814_v17 = vpop.f32.mrb[103].mxu0  ;;  %v6692_v11 = vld [vmem:[%s9900_s5 + $0x9] ss:$0 sm:$0xff] }
0x1fce   : > { %v4989_v18 = vsel %vm1006_vm2, %v4924_v15, 0 }
0x1fcf   : > { %7822 = vmatpush3.bf16.msra.mxu1 %v4989_v18 }
0x1fd0   : > { %7827 = vmatprep.subr.bf16.mxu1 %v8273_v3 }
0x1fe9   : > { %v5301_v22 = vpop.f32.mrb[104].mxu0 }
0x1fea   : > { %v5302_v55 = vadd.f32 %v6718_v20, %v5301_v22  ;;  %v7871_v23 = vpop.f32.mrb[105].mxu0 }
0x1feb   : > { %v5304_v24 = vpop.f32.mrb[106].mxu0 }
0x1fec   : > { %v5421_v25 = vpack.c.bf16 %v5302_v55, %v5302_v55  ;;  %v7872_v26 = vpop.f32.mrb[107].mxu0 }
0x1fee   : > { %v5427_v29 = vsel %vm942_vm1, %v5421_v25, 0 }
0x1fef   : > { %7894 = vmatpush3.bf16.xpose.msra.mxu0 %v5427_v29 }
0x1ff0   : > { %7899 = vmatprep.subr.bf16.mxu0 %v8273_v3 }
0x2081   : > { %v4965_v31 = vpop.f32.mrb[100].mxu1 }
0x2082   : > { %v4971_v32 = vmul.f32 0.35355338, %v4965_v31  ;;  %v7819_v33 = vpop.f32.mrb[101].mxu1 }
0x2083   : > { %v4968_v19 = vpop.f32.mrb[102].mxu1 }
0x2084   : > { %v7820_v34 = vpop.f32.mrb[103].mxu1  ;;  %v4972_v35 = vsel %vm8573_vm3, %v4971_v32, -1e+30 }
0x2085   : > { %v4973_v36 = vsel %vm942_vm1, %v4972_v35, -inf }
0x2086   : > { %4974 = vmax.xlane.f32.xlu0 %v4973_v36 }
0x2113   : > { %v4975_v37 = vpop.xlane.xlu0 %4974 }
0x2114   : > { %v4976_v38 = vsub.f32 %v4972_v35, %v4975_v37 }
0x2116   : > { %v4977_v40 = vmul.f32 1.442695, %v4976_v38 }
0x2118   : > { %8252 = vpow2.f32 %v4977_v40 }
0x2122   : > { %v8253_v8 = vpop.eup %8252 }
0x2123   : > { %v4979_v41 = vsel %vm942_vm1, %v8253_v8, 0.0 }
0x2124   : > { %4980 = vadd.xlane.f32.xlu1 %v4979_v41 }
0x21b1   : > { %v4981_v42 = vpop.xlane.xlu1 %4980 }
0x21b2   : > { %8254 = vrcp.f32 %v4981_v42 }
0x21bc   : > { %v8255_v43 = vpop.eup %8254 }
0x21bd   : > { %v4983_v45 = vmul.f32 %v8255_v43, %v8253_v8  ;;  %v6755_v43 = vld [vmem:[%s9901_s6 + $0x24] sm:$0xf] }
0x21bf   : > { %v4984_v47 = vpack.c.bf16 %v4983_v45, %v4983_v45  ;;  %v5536_v45 = vsel %vm1006_vm2, %v6755_v43, 0 }
0x21c1   : > { %7824 = vmatmul.mubr.msk.bf16.vlgmr.msra.gmra.mrb[104].mxu1 %vm942_vm1, %v4984_v47 }
0x21c2   : > { %7828 = vmatpush3.bf16.msra.mxu1 %v5038_v48  ;;  %7829 = vmatprep.mubr.msk.bf16.mxu1 %vm8274_vm0, %v8273_v3 }
0x21c3   : > { %7833 = vmatprep.subr.bf16.mxu1 %v8273_v3 }
0x2294   : > { %v5025_v49 = vpop.f32.mrb[104].mxu1 }
0x2295   : > { %v5031_v50 = vpack.c.bf16 %v5025_v49, %v5025_v49  ;;  %v7825_v51 = vpop.f32.mrb[105].mxu1 }
0x2296   : > { %v5028_v52 = vpop.f32.mrb[106].mxu1  ;;  %v8204_v51 = vld [vmem:[%s9905_s10] sm:$0xff]  }
0x2297   : > { %v7826_v53 = vpop.f32.mrb[107].mxu1  ;;  %7830 = vmatmul.mubr.msk.bf16.vlgmr.msra.gmra.mrb[108].mxu1 %vm942_vm1, %v5031_v50 }
0x2298   : > { %7834 = vmatpush3.bf16.msra.mxu1 %v8188_v21  ;;  %7849 = vmatprep.mubr.msk.bf16.mxu1 %vm8274_vm0, %v8273_v3  ;;  %v6757_v53 = vld [vmem:[%s9902_s7] ss:$0 sm:$0xff] }
0x2299   : > { %7835 = vmatprep.subr.bf16.mxu1 %v8273_v3 }
0x229c   : > { %7836 = vmatpush3.bf16.msra.mxu1 %v8189_v54 }
0x229d   : > { %7837 = vmatprep.subr.bf16.mxu1 %v8273_v3 }
0x22a0   : > { %7838 = vmatpush3.bf16.msra.mxu1 %v8190_v56 }
0x22a1   : > { %7839 = vmatprep.subr.bf16.mxu1 %v8273_v3 }
0x22a4   : > { %7840 = vmatpush3.bf16.msra.mxu1 %v8191_v30 }
0x22a5   : > { %7841 = vmatprep.subr.bf16.mxu1 %v8273_v3 }
0x22a8   : > { %7842 = vmatpush3.bf16.msra.mxu1 %v8192_v57 }
0x22a9   : > { %7843 = vmatprep.subr.bf16.mxu1 %v8273_v3 }
0x22ac   : > { %7844 = vmatpush3.bf16.msra.mxu1 %v8193_v58 }
0x22ad   : > { %7845 = vmatprep.subr.bf16.mxu1 %v8273_v3 }
0x22b0   : > { %7846 = vmatpush3.bf16.msra.mxu1 %v8194_v59 }
0x22b1   : > { %7847 = vmatprep.subr.bf16.mxu1 %v8273_v3 }
0x22b4   : > { %7848 = vmatpush3.bf16.msra.mxu1 %v8195_v60 }
0x22b5   : > { %7873 = vmatprep.subr.bf16.mxu1 %v8273_v3 }
0x22b7   : > { %7850 = vmatmul.mubr.bf16.vlgmr.msra.gmra.mrb[112].mxu1 %v8474_v28 }
0x22b8   : > { %7874 = vmatpush3.bf16.msra.mxu1 %v8196_v61  ;;  %7889 = vmatprep.mubr.msk.bf16.mxu1 %vm8274_vm0, %v8273_v3  ;;  %v8205_v61 = vld [vmem:[%s9905_s10 + $0x8] sm:$0xff]  }
0x22b9   : > { %7875 = vmatprep.subr.bf16.mxu1 %v8273_v3 }
0x22bc   : > { %7876 = vmatpush3.bf16.msra.mxu1 %v8197_v63  ;;  %v8206_v63 = vld [vmem:[%s9905_s10 + $0x10] sm:$0xff]  }
0x22bd   : > { %7877 = vmatprep.subr.bf16.mxu1 %v8273_v3 }
0x22c0   : > { %7878 = vmatpush3.bf16.msra.mxu1 %v8198_v0  ;;  %v8208_v0 = vld [vmem:[%s9905_s10 + $0x20] sm:$0xff]  }
0x22c1   : > { %7879 = vmatprep.subr.bf16.mxu1 %v8273_v3 }
0x22c4   : > { %7880 = vmatpush3.bf16.msra.mxu1 %v8199_v1  ;;  %v8209_v1 = vld [vmem:[%s9905_s10 + $0x28] sm:$0xff]  }
0x22c5   : > { %7881 = vmatprep.subr.bf16.mxu1 %v8273_v3 }
0x22c8   : > { %7882 = vmatpush3.bf16.msra.mxu1 %v8200_v39  ;;  %v8210_v39 = vld [vmem:[%s9905_s10 + $0x30] sm:$0xff]  }
0x22c9   : > { %7883 = vmatprep.subr.bf16.mxu1 %v8273_v3 }
0x22cc   : > { %7884 = vmatpush3.bf16.msra.mxu1 %v8201_v2  ;;  %v8211_v2 = vld [vmem:[%s9905_s10 + $0x38] sm:$0xff]  }
0x22cd   : > { %7885 = vmatprep.subr.bf16.mxu1 %v8273_v3 }
0x22d0   : > { %7886 = vmatpush3.bf16.msra.mxu1 %v8202_v4  ;;  %v8212_v4 = vld [vmem:[%s9907_s12] sm:$0xff]  }
0x22d1   : > { %7887 = vmatprep.subr.bf16.mxu1 %v8273_v3 }
0x22d4   : > { %7888 = vmatpush3.bf16.msra.mxu1 %v8203_v5  ;;  %v8213_v5 = vld [vmem:[%s9907_s12 + $0x8] sm:$0xff]  }
0x22d5   : > { %7931 = vmatprep.subr.bf16.mxu1 %v8273_v3 }
0x22d7   : > { %7890 = vmatmul.mubr.bf16.vlgmr.msra.gmra.mrb[116].mxu1 %v8474_v28  ;;  %v6744_v28 = vld [vmem:[%s9900_s5 + $0x1d] ss:$0 sm:$0xff] }
0x22d8   : > { %7947 = vmatprep.mubr.msk.bf16.mxu1 %vm8274_vm0, %v8273_v3  ;;  %7932 = vmatpush3.bf16.msra.mxu1 %v8212_v4 }
0x22d9   : > { %7933 = vmatprep.subr.bf16.mxu1 %v8273_v3 }
0x22dc   : > { %7934 = vmatpush3.bf16.msra.mxu1 %v8213_v5 }
0x22dd   : > { %7935 = vmatprep.subr.bf16.mxu1 %v8273_v3 }
0x236a   : > { %v5074_v6 = vpop.f32.mrb[108].mxu1 }
0x236b   : > { %v5080_v7 = vadd.f32 %v5074_v6, %v9670_v62  ;;  %v7831_v9 = vpop.f32.mrb[109].mxu1  ;;  %v8214_v6 = vld [vmem:[%s9907_s12 + $0x10] sm:$0xff]  }
0x236c   : > { %v5077_v46 = vpop.f32.mrb[110].mxu1  ;;  %7936 = vmatpush3.bf16.msra.mxu1 %v8214_v6  ;;  %v8216_v9 = vld [vmem:[%s9907_s12 + $0x20] sm:$0xff]  }
0x236d   : > { %v7832_v10 = vpop.f32.mrb[111].mxu1  ;;  %7937 = vmatprep.subr.bf16.mxu1 %v8273_v3  ;;  %v8217_v46 = vld [vmem:[%s9907_s12 + $0x28] sm:$0xff]  }
0x238a   : > { %v5188_v12 = vpop.f32.mrb[112].mxu1 }
0x238b   : > { %v5189_v14 = vadd.f32 %v6692_v11, %v5188_v12  ;;  %v7851_v15 = vpop.f32.mrb[113].mxu1 }
0x238c   : > { %v5191_v17 = vpop.f32.mrb[114].mxu1 }
0x238d   : > { %v5420_v18 = vpack.c.bf16 %v5189_v14, %v5189_v14  ;;  %v7852_v20 = vpop.f32.mrb[115].mxu1 }
0x238f   : > { %7896 = vmatmul.mubr.msk.bf16.vlgmr.msra.gmra.mrb[108].mxu0 %vm942_vm1, %v5420_v18 }
0x2390   : > { %7901 = vmatprep.mubr.msk.bf16.mxu0 %vm8274_vm0, %v8273_v3 }
0x23aa   : > { %v5414_v62 = vpop.f32.mrb[116].mxu1 }
0x23ab   : > { %v5415_v22 = vadd.f32 %v6744_v28, %v5414_v62  ;;  %v7891_v55 = vpop.f32.mrb[117].mxu1 }
0x23ac   : > { %v5417_v23 = vpop.f32.mrb[118].mxu1 }
0x23ad   : > { %v5422_v24 = vpack.c.bf16 %v5415_v22, %v5415_v22  ;;  %v7892_v25 = vpop.f32.mrb[119].mxu1  ;;  %v6758_v22 = vld [vmem:[%s9903_s8] ss:$0 sm:$0xff] }
0x23ae   : > { %v6759_v23 = vld [vmem:[%s9904_s9] ss:$0 sm:$0xff] }
0x23af   : > { %v5487_v26 = vsel %vm1006_vm2, %v5422_v24, 0 }
0x23b0   : > { %7900 = vmatpush3.bf16.msra.mxu0 %v5487_v26 }
0x23b1   : > { %7905 = vmatprep.subr.bf16.mxu0 %v8273_v3 }
0x2462   : > { %v5463_v29 = vpop.f32.mrb[108].mxu0 }
0x2463   : > { %v5469_v31 = vmul.f32 0.35355338, %v5463_v29  ;;  %v7897_v32 = vpop.f32.mrb[109].mxu0  ;;  %v8218_v29 = vld [vmem:[%s9907_s12 + $0x30] sm:$0xff]  }
0x2464   : > { %v5466_v33 = vpop.f32.mrb[110].mxu0  ;;  %v6760_v32 = vld [vmem:[%s9906_s11] ss:$0 sm:$0xff] }
0x2465   : > { %v7898_v19 = vpop.f32.mrb[111].mxu0  ;;  %v5470_v34 = vsel %vm8573_vm3, %v5469_v31, -1e+30  ;;  %v8219_v31 = vld [vmem:[%s9907_s12 + $0x38] sm:$0xff]  }
0x2466   : > { %v5471_v35 = vsel %vm942_vm1, %v5470_v34, -inf }
0x2467   : > { %5472 = vmax.xlane.f32.xlu0 %v5471_v35 }
0x24f4   : > { %v5473_v36 = vpop.xlane.xlu0 %5472 }
0x24f5   : > { %v5474_v37 = vsub.f32 %v5470_v34, %v5473_v36 }
0x24f7   : > { %v5475_v38 = vmul.f32 1.442695, %v5474_v37 }
0x24f9   : > { %8256 = vpow2.f32 %v5475_v38 }
0x2503   : > { %v8257_v40 = vpop.eup %8256 }
0x2504   : > { %v5477_v8 = vsel %vm942_vm1, %v8257_v40, 0.0 }
0x2505   : > { %5478 = vadd.xlane.f32.xlu1 %v5477_v8 }
0x2592   : > { %v5479_v41 = vpop.xlane.xlu1 %5478 }
0x2593   : > { %8258 = vrcp.f32 %v5479_v41 }
0x259d   : > { %v8259_v42 = vpop.eup %8258 }
0x259e   : > { %v5481_v16 = vmul.f32 %v8259_v42, %v8257_v40 }
0x25a0   : > { %v5482_v44 = vpack.c.bf16 %v5481_v16, %v5481_v16 }
0x25a2   : > { %7902 = vmatmul.mubr.msk.bf16.vlgmr.msra.gmra.mrb[112].mxu0 %vm942_vm1, %v5482_v44 }
0x25a3   : > { %7906 = vmatpush3.bf16.msra.mxu0 %v5536_v45  ;;  %7907 = vmatprep.mubr.msk.bf16.mxu0 %vm8274_vm0, %v8273_v3 }
0x25a4   : > { %7911 = vmatprep.subr.bf16.mxu0 %v8273_v3 }
0x2675   : > { %v5523_v47 = vpop.f32.mrb[112].mxu0 }
0x2676   : > { %v5529_v48 = vpack.c.bf16 %v5523_v47, %v5523_v47  ;;  %v7903_v49 = vpop.f32.mrb[113].mxu0 }
0x2677   : > { %v5526_v21 = vpop.f32.mrb[114].mxu0 }
0x2678   : > { %v7904_v50 = vpop.f32.mrb[115].mxu0  ;;  %7908 = vmatmul.mubr.msk.bf16.vlgmr.msra.gmra.mrb[116].mxu0 %vm942_vm1, %v5529_v48 }
0x2679   : > { %7927 = vmatprep.mubr.msk.bf16.mxu0 %vm8274_vm0, %v8273_v3  ;;  %7912 = vmatpush3.bf16.msra.mxu0 %v8204_v51 }
0x267a   : > { %7913 = vmatprep.subr.bf16.mxu0 %v8273_v3 }
0x267d   : > { %7914 = vmatpush3.bf16.msra.mxu0 %v8205_v61 }
0x267e   : > { %7915 = vmatprep.subr.bf16.mxu0 %v8273_v3 }
0x2681   : > { %7916 = vmatpush3.bf16.msra.mxu0 %v8206_v63 }
0x2682   : > { %7917 = vmatprep.subr.bf16.mxu0 %v8273_v3 }
0x274b   : > { %v5572_v52 = vpop.f32.mrb[116].mxu0 }
0x274c   : > { %v5578_v54 = vadd.f32 %v5572_v52, %v5080_v7  ;;  %v7909_v56 = vpop.f32.mrb[117].mxu0  ;;  %v8215_v7 = vld [vmem:[%s9907_s12 + $0x18] sm:$0xff]  }
0x274d   : > { %v5575_v30 = vpop.f32.mrb[118].mxu0  ;;  %7938 = vmatpush3.bf16.msra.mxu1 %v8215_v7  ;;  %v6778_v56 = vld [vmem:[%s9909_s14] ss:$0 sm:$0xff] }
0x274e   : > { %v5586_v57 = vadd.f32 %v6757_v53, %v5578_v54  ;;  %v7910_v58 = vpop.f32.mrb[119].mxu0  ;;  %7939 = vmatprep.subr.bf16.mxu1 %v8273_v3 }
0x2750   : > { %v5587_v59 = vadd.f32 %v5586_v57, %v8470_v27  ;;  %v8207_v27 = vld [vmem:[%s9905_s10 + $0x18] sm:$0xff]   ;;  %v8275_v57 = vmov 1983009808  }
0x2751   : > { %7918 = vmatpush3.bf16.msra.mxu0 %v8207_v27  ;;  %7940 = vmatpush3.bf16.msra.mxu1 %v8216_v9  ;;  %v5881_v58 = vunpack.c.l.s4 %v8275_v57 }
0x2752   : > { %5590 = vadd.xlane.f32.xlu0 %v5587_v59  ;;  %v5593_v60 = vmul.f32 %v5587_v59, %v5587_v59  ;;  %7919 = vmatprep.subr.bf16.mxu0 %v8273_v3 }
0x2753   : > { %7941 = vmatprep.subr.bf16.mxu1 %v8273_v3  ;;  %v5882_v63 = vunpack.c.0.s8 %v5881_v58 }
0x2754   : > { %5594 = vadd.xlane.f32.xlu1 %v5593_v60 }
0x2755   : > { %7920 = vmatpush3.bf16.msra.mxu0 %v8208_v0  ;;  %7942 = vmatpush3.bf16.msra.mxu1 %v8217_v46 }
0x2756   : > { %7921 = vmatprep.subr.bf16.mxu0 %v8273_v3  ;;  %7943 = vmatprep.subr.bf16.mxu1 %v8273_v3 }
0x2759   : > { %7922 = vmatpush3.bf16.msra.mxu0 %v8209_v1  ;;  %7944 = vmatpush3.bf16.msra.mxu1 %v8218_v29  ;;  %v5885_v1 = vsub.s32 %v5882_v63, %v8570_v13 }
0x275a   : > { %7923 = vmatprep.subr.bf16.mxu0 %v8273_v3  ;;  %7945 = vmatprep.subr.bf16.mxu1 %v8273_v3 }
0x275d   : > { %7924 = vmatpush3.bf16.msra.mxu0 %v8210_v39  ;;  %7946 = vmatpush3.bf16.msra.mxu1 %v8219_v31 }
0x275e   : > { %7925 = vmatprep.subr.bf16.mxu0 %v8273_v3  ;;  %v6769_v3 = vld [vmem:[%s9908_s13] ss:$0 sm:$0xff] }
0x2761   : > { %7926 = vmatpush3.bf16.msra.mxu0 %v8211_v2  ;;  %v5874_v2 = vld [vmem:[%s9911_s16] sm:$0x1] }
0x2762   : > { %v5876_v5 = vunpack.c.l.bf16 %v5874_v2 }
0x27df   : > { %v5591_v10 = vpop.xlane.xlu0 %5590 }
0x27e0   : > { %v5592_v11 = vmul.f32 0.0125, %v5591_v10  ;;  %v5896_v10 = vld [vmem:[#allocation2] sm:$0x1] }
0x27e1   : > { %v5595_v12 = vpop.xlane.xlu1 %5594 }
0x27e2   : > { %v5597_v14 = vmul.f32 %v5592_v11, %v5592_v11  ;;  %v5596_v15 = vmul.f32 0.0125, %v5595_v12  ;;  %v5600_v28 = vsub.f32 %v5587_v59, %v5592_v11  ;;  %v6779_v59 = vld [vmem:[%s9910_s15] ss:$0 sm:$0xff] }
0x27e4   : > { %v5598_v17 = vsub.f32 %v5596_v15, %v5597_v14 }
0x27e6   : > { %v5599_v18 = vmax.f32 %v5598_v17, 0.0 }
0x27e8   : > { %v5601_v20 = vadd.f32 1e-05, %v5599_v18 }
0x27ea   : > { %8260 = vrsqrt.f32 %v5601_v20 }
0x27f4   : > { %v8261_v62 = vpop.eup %8260 }
0x27f5   : > { %v5603_v55 = vmul.f32 %v8261_v62, %v5600_v28 }
0x27f7   : > { %v5610_v24 = vmul.f32 %v6758_v22, %v5603_v55 }
0x27f9   : > { %v5617_v25 = vadd.f32 %v6759_v23, %v5610_v24 }
0x27fb   : > { %v5618_v26 = vpack.c.bf16 %v5617_v25, %v5617_v25 }
0x27fd   : > { %7928 = vmatmul.mubr.bf16.vlgmr.msra.gmra.mrb[120].mxu0 %v5618_v26 }
0x28d0   : > { %v5724_v33 = vpop.f32.mrb[120].mxu0 }
0x28d1   : > { %v5725_v19 = vadd.f32 %v6760_v32, %v5724_v33  ;;  %v7929_v34 = vpop.f32.mrb[121].mxu0 }
0x28d2   : > { %v5727_v35 = vpop.f32.mrb[122].mxu0 }
0x28d3   : > { %v5730_v36 = vmax.f32 %v5725_v19, 0.0  ;;  %v7930_v37 = vpop.f32.mrb[123].mxu0 }
0x28d5   : > { %v5731_v38 = vpack.c.bf16 %v5730_v36, %v5730_v36 }
0x28d7   : > { %7948 = vmatmul.mubr.bf16.vlgmr.msra.gmra.mrb[120].mxu1 %v5731_v38 }
0x29aa   : > { %v5837_v40 = vpop.f32.mrb[120].mxu1 }
0x29ab   : > { %v5838_v8 = vadd.f32 %v6769_v3, %v5837_v40  ;;  %v7949_v41 = vpop.f32.mrb[121].mxu1 }
0x29ac   : > { %v5840_v42 = vpop.f32.mrb[122].mxu1 }
0x29ad   : > { %v5843_v43 = vadd.f32 %v5838_v8, %v5617_v25  ;;  %v7950_v16 = vpop.f32.mrb[123].mxu1 }
0x29af   : > { %5846 = vadd.xlane.f32.xlu0 %v5843_v43  ;;  %v5849_v44 = vmul.f32 %v5843_v43, %v5843_v43 }
0x29b1   : > { %5850 = vadd.xlane.f32.xlu1 %v5849_v44 }
0x2a3c   : > { %v5847_v45 = vpop.xlane.xlu0 %5846 }
0x2a3d   : > { %v5848_v47 = vmul.f32 0.0125, %v5847_v45 }
0x2a3e   : > { %v5851_v48 = vpop.xlane.xlu1 %5850 }
0x2a3f   : > { %v5853_v49 = vmul.f32 %v5848_v47, %v5848_v47  ;;  %v5852_v21 = vmul.f32 0.0125, %v5851_v48  ;;  %v5856_v53 = vsub.f32 %v5843_v43, %v5848_v47 }
0x2a41   : > { %v5854_v50 = vsub.f32 %v5852_v21, %v5853_v49 }
0x2a43   : > { %v5855_v51 = vmax.f32 %v5854_v50, 0.0 }
0x2a45   : > { %v5857_v52 = vadd.f32 1e-05, %v5855_v51 }
0x2a47   : > { %8262 = vrsqrt.f32 %v5857_v52 }
0x2a51   : > { %v8263_v54 = vpop.eup %8262 }
0x2a52   : > { %v5859_v30 = vmul.f32 %v8263_v54, %v5856_v53 }
0x2a54   : > { %v5866_v60 = vmul.f32 %v6778_v56, %v5859_v30 }
0x2a56   : > { %v5873_v61 = vadd.f32 %v6779_v59, %v5866_v60 }
0x2a58   : > { %v5875_v27 = vpack.c.bf16 %v5873_v61, %v5873_v61 }
0x2a5a   : > { %v5877_v0 = vunpack.c.l.bf16 %v5875_v27 }
0x2a5c   : > { %v5879_v39 = vcombine.high %v5877_v0, %v5877_v0 }
0x2a5e   : > { %v5886_v4 = vrot.slane %v5879_v39, %v5885_v1 }
0x2a60   : > { %v5887_v6 = vcombine.high %v5886_v4, %v5886_v4 }
0x2a62   : > { %v6780_v7 = vrot.slane %v5887_v6, 9 }
0x2a64   : > { %v5891_v9 = vmul.f32 %v6780_v7, %v5876_v5 }
0x2a66   : > { %v5893_v46 = vsel %vm5892_vm4, %v5891_v9, 0.0 }
0x2a67   : > { %5894 = vadd.xlane.f32.xlu0 %v5893_v46 }
0x2af4   : > { %v5895_v13 = vpop.xlane.xlu0 %5894 }
0x2af5   : > { %v5897_v11 = vadd.f32 %v5896_v10, %v5895_v13 }
0x2af7   : > { %5899 = vst.msk [vmem:[%s570_s2] sm:$0x1] %vm5898_vm5, %v5897_v11 }
0x2af8 PF: > { %s30_s29 = sadd.s32 1, %s8270_s29  }
0x2af9   : > { %p27_p4 = scmp.ge.s32.totalorder %s30_s29, 4  }
0x2afb   :  { %29 = sbr.rel (!%p27_p4) target bundleno = 4 (0x4), region = 189 }

</bundles_post_ra>
